<compile_context>
chip_gen: v7x
topology: tpu7x:2x2x1
jax: 0.10.0
libtpu: 0.0.40
codegen_flags: <defaults>
</compile_context>

<pallas_src>
import functools

import jax
import jax.numpy as jnp
from jax import lax
from jax.experimental import pallas as pl
from jax.experimental.pallas import tpu as pltpu


def classifier_kernel(x_ref, g_ref, beta_ref, wa_ref, ba_ref, wp_ref,
                      wc_ref, bc_ref, out_ref, y_scr, pooled_scr, *, chunk_b):
    # x_ref: (Bb, T, D) bfloat16 — one block of batch rows per grid step.
    Bb, T, D = x_ref.shape
    A = wa_ref.shape[1]

    # Upcast streamed bf16 input to f32 for the LayerNorm statistics.
    x = x_ref[...].astype(jnp.float32)                              # (Bb,T,D)

    # ---- feature_extractor_norm_layer: LayerNorm over last dim (eps=1e-5,
    #      biased variance, elementwise affine), two-pass statistics ----
    d_inv = 1.0 / float(D)
    mu = jnp.sum(x, axis=-1, keepdims=True) * d_inv                 # E[x]
    xc = x - mu
    var = jnp.sum(xc * xc, axis=-1, keepdims=True) * d_inv          # Var[x]
    inv = lax.rsqrt(var + 1e-5)                                     # (Bb,T,1)
    xn = (xc * inv) * g_ref[...] + beta_ref[...]                    # (Bb,T,D)

    # ---- adapter_layer: LinearAdapter (Linear D -> A) ----
    # Flatten (Bb,T,D) -> (Bb*T,D): leading-dim merge only (layout-free),
    # feeds the MXU Bb*T rows per push instead of T=16.
    xn2 = xn.astype(jnp.bfloat16).reshape(Bb * T, D)
    y = lax.dot_general(
        xn2, wa_ref[...],
        dimension_numbers=(((1,), (0,)), ((), ())),
        preferred_element_type=jnp.float32) + ba_ref[...]           # (Bb*T,A)

    # Stage bf16 activations in VMEM scratch; bounds the live vreg set for the
    # per-chunk attention below (vs keeping x/xn/y/z all live at Bb=16).
    y_scr[...] = y.astype(jnp.bfloat16).reshape(Bb, T, A)

    scale = 1.0 / (float(A) ** 0.5)
    n_chunks = Bb // chunk_b

    # ---- seq_to_seq (SelfAttention, q=k=v) + seq_to_one (AttentionPooling),
    #      looped over batch sub-chunks read back from VMEM scratch ----
    @pl.loop(0, n_chunks, unroll=True)
    def _(c):
        i = pl.multiple_of(c * chunk_b, chunk_b)
        yc = y_scr[pl.ds(i, chunk_b)]                               # (cb,T,A) bf16

        # Scores: contract last dims of both operands (no transpose copy).
        scores = lax.dot_general(
            yc, yc,
            dimension_numbers=(((2,), (2,)), ((0,), (0,))),
            preferred_element_type=jnp.float32) * scale             # (cb,T,T)
        scores = scores - jnp.max(scores, axis=-1, keepdims=True)
        p = jnp.exp(scores)
        denom_inv = pl.reciprocal(jnp.sum(p, axis=-1, keepdims=True),
                                  approx=True)                      # (cb,T,1)
        z = lax.dot_general(
            p.astype(jnp.bfloat16), yc,
            dimension_numbers=(((2,), (1,)), ((0,), (0,))),
            preferred_element_type=jnp.float32) * denom_inv         # (cb,T,A)

        # AttentionPooling over the time axis.
        e = jnp.sum(z * wp_ref[...], axis=-1, keepdims=True)        # (cb,T,1)
        e = e - jnp.max(e, axis=1, keepdims=True)
        w = jnp.exp(e)                                              # (cb,T,1)
        pooled_un = jnp.sum(z * w, axis=1)                          # (cb,A)
        pooled = pooled_un * pl.reciprocal(jnp.sum(w, axis=1), approx=True)
        pooled_scr[pl.ds(i, chunk_b), :] = pooled

    # ---- classifier_layer: Linear A -> C (lane-padded to 128 lanes) ----
    logits = lax.dot_general(
        pooled_scr[...].astype(jnp.bfloat16), wc_ref[...],
        dimension_numbers=(((1,), (0,)), ((), ())),
        preferred_element_type=jnp.float32) + bc_ref[...]           # (Bb,Cpad)
    out_ref[...] = logits.astype(out_ref.dtype)


def classifier_forward(x, gamma, beta, w_adapt, b_adapt, w_pool, w_cls, b_cls,
                       *, block_b=16, chunk_b=8):
    """x: (B, T, D) float32 -> logits (B, C) float32."""
    B, T, D = x.shape
    A = w_adapt.shape[1]
    C = w_cls.shape[1]
    assert B % block_b == 0, "demo wrapper assumes B divisible by block_b"
    assert block_b % chunk_b == 0
    n_steps = B // block_b

    # Lane-dense output: pad the tiny class dim to a full 128-lane block so the
    # per-step store is an unmasked vst; the wrapper slices [:, :C] afterwards.
    c_pad = ((C + 127) // 128) * 128
    w_cls_pad = jnp.zeros((A, c_pad), jnp.float32).at[:, :C].set(w_cls)
    b_cls_pad = jnp.zeros((1, c_pad), jnp.float32).at[:, :C].set(b_cls)

    # MXU operands and the dominant input traffic streamed as bf16.
    x_bf = x.astype(jnp.bfloat16)
    w_adapt_bf = w_adapt.astype(jnp.bfloat16)
    w_cls_bf = w_cls_pad.astype(jnp.bfloat16)

    flops = 2 * B * (T * D * A + 2 * T * T * A + A * c_pad) + 10 * B * T * D
    transcendentals = B * T * (T + 3)
    # Constant-index (weight) blocks are fetched once by the pipeline.
    weight_bytes = (w_adapt_bf.size * 2 + w_cls_bf.size * 2 +
                    (gamma.size + beta.size + b_adapt.size + w_pool.size +
                     b_cls_pad.size) * 4)
    bytes_accessed = x_bf.size * 2 + B * c_pad * 4 + weight_bytes

    out_padded = pl.pallas_call(
        functools.partial(classifier_kernel, chunk_b=chunk_b),
        out_shape=jax.ShapeDtypeStruct((B, c_pad), jnp.float32),
        grid=(n_steps,),
        in_specs=[
            pl.BlockSpec((block_b, T, D), lambda b: (b, 0, 0)),   # x block
            pl.BlockSpec((1, D), lambda b: (0, 0)),               # LN gamma
            pl.BlockSpec((1, D), lambda b: (0, 0)),               # LN beta
            pl.BlockSpec((D, A), lambda b: (0, 0)),               # adapter W
            pl.BlockSpec((1, A), lambda b: (0, 0)),               # adapter b
            pl.BlockSpec((1, A), lambda b: (0, 0)),               # pooling w
            pl.BlockSpec((A, c_pad), lambda b: (0, 0)),           # classifier W
            pl.BlockSpec((1, c_pad), lambda b: (0, 0)),           # classifier b
        ],
        out_specs=pl.BlockSpec((block_b, c_pad), lambda b: (b, 0)),
        scratch_shapes=[
            pltpu.VMEM((block_b, T, A), jnp.bfloat16),   # staged activations
            pltpu.VMEM((block_b, A), jnp.float32),       # pooled vectors
        ],
        compiler_params=pltpu.CompilerParams(
            dimension_semantics=("parallel",)),
        cost_estimate=pl.CostEstimate(
            flops=flops,
            transcendentals=transcendentals,
            bytes_accessed=bytes_accessed),
    )(x_bf, gamma, beta, w_adapt_bf, b_adapt, w_pool, w_cls_bf, b_cls_pad)

    return out_padded[:, :C]


if __name__ == "__main__":
    # Small, lane-dense shapes consistent with the forward pass:
    #   B batch rows, T frames, D extractor features, A adapter dim, C classes.
    # B=32 with block_b=16 -> 2 grid steps (keeps both v7x TensorCores busy)
    # and Bb*T = 256 MXU rows per adapter-matmul push.
    B, T, D, A, C = 32, 16, 128, 128, 8

    key = jax.random.PRNGKey(0)
    kx, ka, kb, kp, kc, kd = jax.random.split(key, 6)

    # Input = audio feature-extractor output features (B, T, D).
    x = jax.random.normal(kx, (B, T, D), dtype=jnp.float32)

    # Deterministic parameter init (synthetic, not a checkpoint load).
    gamma   = jnp.ones((1, D), dtype=jnp.float32)
    beta    = jnp.zeros((1, D), dtype=jnp.float32)
    w_adapt = jax.random.normal(ka, (D, A), dtype=jnp.float32) * (1.0 / jnp.sqrt(D))
    b_adapt = jax.random.normal(kb, (1, A), dtype=jnp.float32) * 0.01
    w_pool  = jax.random.normal(kp, (1, A), dtype=jnp.float32) * (1.0 / jnp.sqrt(A))
    w_cls   = jax.random.normal(kc, (A, C), dtype=jnp.float32) * (1.0 / jnp.sqrt(A))
    b_cls   = jax.random.normal(kd, (1, C), dtype=jnp.float32) * 0.01

    logits = classifier_forward(x, gamma, beta, w_adapt, b_adapt,
                                w_pool, w_cls, b_cls, block_b=16, chunk_b=8)
    jax.block_until_ready(logits)
    assert logits.shape == (B, C)
    print("KERNEL_OK")
</pallas_src>

<mosaic_0001>
module attributes {stable_mosaic.version = 11 : i64} {
  func.func @classifier_kernel(%arg0: i32, %arg1: memref<16x16x128xbf16, #tpu.memory_space<vmem>>, %arg2: memref<1x128xf32, #tpu.memory_space<vmem>>, %arg3: memref<1x128xf32, #tpu.memory_space<vmem>>, %arg4: memref<128x128xbf16, #tpu.memory_space<vmem>>, %arg5: memref<1x128xf32, #tpu.memory_space<vmem>>, %arg6: memref<1x128xf32, #tpu.memory_space<vmem>>, %arg7: memref<128x128xbf16, #tpu.memory_space<vmem>>, %arg8: memref<1x128xf32, #tpu.memory_space<vmem>>, %arg9: memref<16x128xf32, #tpu.memory_space<vmem>>, %arg10: memref<16x16x128xbf16, #tpu.memory_space<vmem>>, %arg11: memref<16x128xf32, #tpu.memory_space<vmem>>) attributes {dimension_semantics = [#tpu.dimension_semantics<parallel>], iteration_bounds = array<i64: 2>, scalar_prefetch = 0 : i64, scratch_operands = 2 : i64, tpu.core_type = #tpu.core_type<tc>, window_params = [{transform_indices = @transform_0, window_bounds = array<i64: 16, 16, 128>}, {pipeline_mode = #tpu.pipeline_mode<synchronous>, transform_indices = @transform_1, window_bounds = array<i64: 1, 128>}, {pipeline_mode = #tpu.pipeline_mode<synchronous>, transform_indices = @transform_2, window_bounds = array<i64: 1, 128>}, {pipeline_mode = #tpu.pipeline_mode<synchronous>, transform_indices = @transform_3, window_bounds = array<i64: 128, 128>}, {pipeline_mode = #tpu.pipeline_mode<synchronous>, transform_indices = @transform_4, window_bounds = array<i64: 1, 128>}, {pipeline_mode = #tpu.pipeline_mode<synchronous>, transform_indices = @transform_5, window_bounds = array<i64: 1, 128>}, {pipeline_mode = #tpu.pipeline_mode<synchronous>, transform_indices = @transform_6, window_bounds = array<i64: 128, 128>}, {pipeline_mode = #tpu.pipeline_mode<synchronous>, transform_indices = @transform_7, window_bounds = array<i64: 1, 128>}, {transform_indices = @transform_8, window_bounds = array<i64: 16, 128>}]} {
    %c0 = arith.constant 0 : index
    %c0_0 = arith.constant 0 : index
    %c0_1 = arith.constant 0 : index
    %0 = vector.load %arg1[%c0, %c0_0, %c0_1] : memref<16x16x128xbf16, #tpu.memory_space<vmem>>, vector<16x16x128xbf16>
    %1 = arith.extf %0 : vector<16x16x128xbf16> to vector<16x16x128xf32>
    %cst = arith.constant dense<0.000000e+00> : vector<16x16xf32>
    %2 = vector.multi_reduction <add>, %1, %cst [2] : vector<16x16x128xf32> to vector<16x16xf32>
    %3 = vector.shape_cast %2 : vector<16x16xf32> to vector<16x16x1xf32>
    %cst_2 = arith.constant 7.812500e-03 : f32
    %4 = vector.broadcast %cst_2 : f32 to vector<16x16x1xf32>
    %5 = arith.mulf %3, %4 : vector<16x16x1xf32>
    %6 = vector.broadcast %5 : vector<16x16x1xf32> to vector<16x16x128xf32>
    %7 = arith.subf %1, %6 : vector<16x16x128xf32>
    %8 = arith.mulf %7, %7 : vector<16x16x128xf32>
    %cst_3 = arith.constant dense<0.000000e+00> : vector<16x16xf32>
    %9 = vector.multi_reduction <add>, %8, %cst_3 [2] : vector<16x16x128xf32> to vector<16x16xf32>
    %10 = vector.shape_cast %9 : vector<16x16xf32> to vector<16x16x1xf32>
    %cst_4 = arith.constant 7.812500e-03 : f32
    %11 = vector.broadcast %cst_4 : f32 to vector<16x16x1xf32>
    %12 = arith.mulf %10, %11 : vector<16x16x1xf32>
    %cst_5 = arith.constant 9.99999974E-6 : f32
    %13 = vector.broadcast %cst_5 : f32 to vector<16x16x1xf32>
    %14 = arith.addf %12, %13 : vector<16x16x1xf32>
    %15 = math.rsqrt %14 : vector<16x16x1xf32>
    %16 = vector.broadcast %15 : vector<16x16x1xf32> to vector<16x16x128xf32>
    %17 = arith.mulf %7, %16 : vector<16x16x128xf32>
    %c0_6 = arith.constant 0 : index
    %c0_7 = arith.constant 0 : index
    %18 = vector.load %arg2[%c0_6, %c0_7] : memref<1x128xf32, #tpu.memory_space<vmem>>, vector<1x128xf32>
    %19 = vector.shape_cast %18 : vector<1x128xf32> to vector<1x1x128xf32>
    %20 = vector.broadcast %19 : vector<1x1x128xf32> to vector<16x16x128xf32>
    %21 = arith.mulf %17, %20 : vector<16x16x128xf32>
    %c0_8 = arith.constant 0 : index
    %c0_9 = arith.constant 0 : index
    %22 = vector.load %arg3[%c0_8, %c0_9] : memref<1x128xf32, #tpu.memory_space<vmem>>, vector<1x128xf32>
    %23 = vector.shape_cast %22 : vector<1x128xf32> to vector<1x1x128xf32>
    %24 = vector.broadcast %23 : vector<1x1x128xf32> to vector<16x16x128xf32>
    %25 = arith.addf %21, %24 : vector<16x16x128xf32>
    %26 = arith.truncf %25 : vector<16x16x128xf32> to vector<16x16x128xbf16>
    %27 = vector.shape_cast %26 : vector<16x16x128xbf16> to vector<256x128xbf16>
    %c0_10 = arith.constant 0 : index
    %c0_11 = arith.constant 0 : index
    %28 = vector.load %arg4[%c0_10, %c0_11] : memref<128x128xbf16, #tpu.memory_space<vmem>>, vector<128x128xbf16>
    %cst_12 = arith.constant dense<0.000000e+00> : vector<256x128xf32>
    %29 = tpu.matmul %27, %28, %cst_12 {dimension_numbers = #tpu.dot_dimension_numbers<[1], [0], [0], [1], [0, 0, 1, 1], [], []>} : vector<256x128xbf16>, vector<128x128xbf16>, vector<256x128xf32> -> vector<256x128xf32>
    %c0_13 = arith.constant 0 : index
    %c0_14 = arith.constant 0 : index
    %30 = vector.load %arg5[%c0_13, %c0_14] : memref<1x128xf32, #tpu.memory_space<vmem>>, vector<1x128xf32>
    %31 = vector.broadcast %30 : vector<1x128xf32> to vector<256x128xf32>
    %32 = arith.addf %29, %31 : vector<256x128xf32>
    %33 = arith.truncf %32 : vector<256x128xf32> to vector<256x128xbf16>
    %34 = vector.shape_cast %33 : vector<256x128xbf16> to vector<16x16x128xbf16>
    %c0_15 = arith.constant 0 : index
    %c0_16 = arith.constant 0 : index
    %c0_17 = arith.constant 0 : index
    %35 = vector.load %arg10[%c0_15, %c0_16, %c0_17] : memref<16x16x128xbf16, #tpu.memory_space<vmem>>, vector<16x16x128xbf16>
    tpu.vector_store %arg10[%c0_15, %c0_16, %c0_17], %34 {strides = array<i32>} : memref<16x16x128xbf16, #tpu.memory_space<vmem>>, vector<16x16x128xbf16>,
    %c0_i32 = arith.constant 0 : i32
    %c1_i32 = arith.constant 1 : i32
    %36 = arith.muli %c0_i32, %c1_i32 : i32
    %c0_i32_18 = arith.constant 0 : i32
    %37 = arith.addi %c0_i32_18, %36 : i32
    %c8_i32 = arith.constant 8 : i32
    %38 = arith.muli %37, %c8_i32 : i32
    %39 = tpu.assume_multiple %38, 8 : i32
    %40 = arith.index_cast %39 : i32 to index
    %c0_19 = arith.constant 0 : index
    %c0_20 = arith.constant 0 : index
    %41 = vector.load %arg10[%40, %c0_19, %c0_20] : memref<16x16x128xbf16, #tpu.memory_space<vmem>>, vector<8x16x128xbf16>
    %cst_21 = arith.constant dense<0.000000e+00> : vector<8x16x16xf32>
    %42 = tpu.matmul %41, %41, %cst_21 {dimension_numbers = #tpu.dot_dimension_numbers<[2], [2], [1], [1], [0, 0, 0, 1, 1, 1], [0], [0]>} : vector<8x16x128xbf16>, vector<8x16x128xbf16>, vector<8x16x16xf32> -> vector<8x16x16xf32>
    %cst_22 = arith.constant 0.0883883461 : f32
    %43 = vector.broadcast %cst_22 : f32 to vector<8x16x16xf32>
    %44 = arith.mulf %42, %43 : vector<8x16x16xf32>
    %cst_23 = arith.constant dense<0xFF800000> : vector<8x16xf32>
    %45 = vector.multi_reduction <maximumf>, %44, %cst_23 [2] : vector<8x16x16xf32> to vector<8x16xf32>
    %46 = vector.shape_cast %45 : vector<8x16xf32> to vector<8x16x1xf32>
    %47 = vector.broadcast %46 : vector<8x16x1xf32> to vector<8x16x16xf32>
    %48 = arith.subf %44, %47 : vector<8x16x16xf32>
    %49 = math.exp %48 : vector<8x16x16xf32>
    %cst_24 = arith.constant dense<0.000000e+00> : vector<8x16xf32>
    %50 = vector.multi_reduction <add>, %49, %cst_24 [2] : vector<8x16x16xf32> to vector<8x16xf32>
    %51 = vector.shape_cast %50 : vector<8x16xf32> to vector<8x16x1xf32>
    %52 = tpu.reciprocal %51 {approx = true} : vector<8x16x1xf32> -> vector<8x16x1xf32>
    %53 = arith.truncf %49 : vector<8x16x16xf32> to vector<8x16x16xbf16>
    %cst_25 = arith.constant dense<0.000000e+00> : vector<8x16x128xf32>
    %54 = tpu.matmul %53, %41, %cst_25 {dimension_numbers = #tpu.dot_dimension_numbers<[2], [1], [1], [2], [0, 0, 0, 1, 1, 2], [0], [0]>} : vector<8x16x16xbf16>, vector<8x16x128xbf16>, vector<8x16x128xf32> -> vector<8x16x128xf32>
    %55 = vector.broadcast %52 : vector<8x16x1xf32> to vector<8x16x128xf32>
    %56 = arith.mulf %54, %55 : vector<8x16x128xf32>
    %c0_26 = arith.constant 0 : index
    %c0_27 = arith.constant 0 : index
    %57 = vector.load %arg6[%c0_26, %c0_27] : memref<1x128xf32, #tpu.memory_space<vmem>>, vector<1x128xf32>
    %58 = vector.shape_cast %57 : vector<1x128xf32> to vector<1x1x128xf32>
    %59 = vector.broadcast %58 : vector<1x1x128xf32> to vector<8x16x128xf32>
    %60 = arith.mulf %56, %59 : vector<8x16x128xf32>
    %cst_28 = arith.constant dense<0.000000e+00> : vector<8x16xf32>
    %61 = vector.multi_reduction <add>, %60, %cst_28 [2] : vector<8x16x128xf32> to vector<8x16xf32>
    %62 = vector.shape_cast %61 : vector<8x16xf32> to vector<8x16x1xf32>
    %cst_29 = arith.constant dense<0xFF800000> : vector<8x1xf32>
    %63 = vector.multi_reduction <maximumf>, %62, %cst_29 [1] : vector<8x16x1xf32> to vector<8x1xf32>
    %64 = vector.shape_cast %63 : vector<8x1xf32> to vector<8x1x1xf32>
    %65 = vector.broadcast %64 : vector<8x1x1xf32> to vector<8x16x1xf32>
    %66 = arith.subf %62, %65 : vector<8x16x1xf32>
    %67 = math.exp %66 : vector<8x16x1xf32>
    %68 = vector.broadcast %67 : vector<8x16x1xf32> to vector<8x16x128xf32>
    %69 = arith.mulf %56, %68 : vector<8x16x128xf32>
    %cst_30 = arith.constant dense<0.000000e+00> : vector<8x128xf32>
    %70 = vector.multi_reduction <add>, %69, %cst_30 [1] : vector<8x16x128xf32> to vector<8x128xf32>
    %cst_31 = arith.constant dense<0.000000e+00> : vector<8x1xf32>
    %71 = vector.multi_reduction <add>, %67, %cst_31 [1] : vector<8x16x1xf32> to vector<8x1xf32>
    %72 = tpu.reciprocal %71 {approx = true} : vector<8x1xf32> -> vector<8x1xf32>
    %73 = vector.broadcast %72 : vector<8x1xf32> to vector<8x128xf32>
    %74 = arith.mulf %70, %73 : vector<8x128xf32>
    %75 = arith.index_cast %39 : i32 to index
    %c0_32 = arith.constant 0 : index
    %76 = vector.load %arg11[%75, %c0_32] : memref<16x128xf32, #tpu.memory_space<vmem>>, vector<8x128xf32>
    tpu.vector_store %arg11[%75, %c0_32], %74 {strides = array<i32>} : memref<16x128xf32, #tpu.memory_space<vmem>>, vector<8x128xf32>,
    %c1_i32_33 = arith.constant 1 : i32
    %c1_i32_34 = arith.constant 1 : i32
    %77 = arith.muli %c1_i32_33, %c1_i32_34 : i32
    %c0_i32_35 = arith.constant 0 : i32
    %78 = arith.addi %c0_i32_35, %77 : i32
    %c8_i32_36 = arith.constant 8 : i32
    %79 = arith.muli %78, %c8_i32_36 : i32
    %80 = tpu.assume_multiple %79, 8 : i32
    %81 = arith.index_cast %80 : i32 to index
    %c0_37 = arith.constant 0 : index
    %c0_38 = arith.constant 0 : index
    %82 = vector.load %arg10[%81, %c0_37, %c0_38] : memref<16x16x128xbf16, #tpu.memory_space<vmem>>, vector<8x16x128xbf16>
    %cst_39 = arith.constant dense<0.000000e+00> : vector<8x16x16xf32>
    %83 = tpu.matmul %82, %82, %cst_39 {dimension_numbers = #tpu.dot_dimension_numbers<[2], [2], [1], [1], [0, 0, 0, 1, 1, 1], [0], [0]>} : vector<8x16x128xbf16>, vector<8x16x128xbf16>, vector<8x16x16xf32> -> vector<8x16x16xf32>
    %cst_40 = arith.constant 0.0883883461 : f32
    %84 = vector.broadcast %cst_40 : f32 to vector<8x16x16xf32>
    %85 = arith.mulf %83, %84 : vector<8x16x16xf32>
    %cst_41 = arith.constant dense<0xFF800000> : vector<8x16xf32>
    %86 = vector.multi_reduction <maximumf>, %85, %cst_41 [2] : vector<8x16x16xf32> to vector<8x16xf32>
    %87 = vector.shape_cast %86 : vector<8x16xf32> to vector<8x16x1xf32>
    %88 = vector.broadcast %87 : vector<8x16x1xf32> to vector<8x16x16xf32>
    %89 = arith.subf %85, %88 : vector<8x16x16xf32>
    %90 = math.exp %89 : vector<8x16x16xf32>
    %cst_42 = arith.constant dense<0.000000e+00> : vector<8x16xf32>
    %91 = vector.multi_reduction <add>, %90, %cst_42 [2] : vector<8x16x16xf32> to vector<8x16xf32>
    %92 = vector.shape_cast %91 : vector<8x16xf32> to vector<8x16x1xf32>
    %93 = tpu.reciprocal %92 {approx = true} : vector<8x16x1xf32> -> vector<8x16x1xf32>
    %94 = arith.truncf %90 : vector<8x16x16xf32> to vector<8x16x16xbf16>
    %cst_43 = arith.constant dense<0.000000e+00> : vector<8x16x128xf32>
    %95 = tpu.matmul %94, %82, %cst_43 {dimension_numbers = #tpu.dot_dimension_numbers<[2], [1], [1], [2], [0, 0, 0, 1, 1, 2], [0], [0]>} : vector<8x16x16xbf16>, vector<8x16x128xbf16>, vector<8x16x128xf32> -> vector<8x16x128xf32>
    %96 = vector.broadcast %93 : vector<8x16x1xf32> to vector<8x16x128xf32>
    %97 = arith.mulf %95, %96 : vector<8x16x128xf32>
    %c0_44 = arith.constant 0 : index
    %c0_45 = arith.constant 0 : index
    %98 = vector.load %arg6[%c0_44, %c0_45] : memref<1x128xf32, #tpu.memory_space<vmem>>, vector<1x128xf32>
    %99 = vector.shape_cast %98 : vector<1x128xf32> to vector<1x1x128xf32>
    %100 = vector.broadcast %99 : vector<1x1x128xf32> to vector<8x16x128xf32>
    %101 = arith.mulf %97, %100 : vector<8x16x128xf32>
    %cst_46 = arith.constant dense<0.000000e+00> : vector<8x16xf32>
    %102 = vector.multi_reduction <add>, %101, %cst_46 [2] : vector<8x16x128xf32> to vector<8x16xf32>
    %103 = vector.shape_cast %102 : vector<8x16xf32> to vector<8x16x1xf32>
    %cst_47 = arith.constant dense<0xFF800000> : vector<8x1xf32>
    %104 = vector.multi_reduction <maximumf>, %103, %cst_47 [1] : vector<8x16x1xf32> to vector<8x1xf32>
    %105 = vector.shape_cast %104 : vector<8x1xf32> to vector<8x1x1xf32>
    %106 = vector.broadcast %105 : vector<8x1x1xf32> to vector<8x16x1xf32>
    %107 = arith.subf %103, %106 : vector<8x16x1xf32>
    %108 = math.exp %107 : vector<8x16x1xf32>
    %109 = vector.broadcast %108 : vector<8x16x1xf32> to vector<8x16x128xf32>
    %110 = arith.mulf %97, %109 : vector<8x16x128xf32>
    %cst_48 = arith.constant dense<0.000000e+00> : vector<8x128xf32>
    %111 = vector.multi_reduction <add>, %110, %cst_48 [1] : vector<8x16x128xf32> to vector<8x128xf32>
    %cst_49 = arith.constant dense<0.000000e+00> : vector<8x1xf32>
    %112 = vector.multi_reduction <add>, %108, %cst_49 [1] : vector<8x16x1xf32> to vector<8x1xf32>
    %113 = tpu.reciprocal %112 {approx = true} : vector<8x1xf32> -> vector<8x1xf32>
    %114 = vector.broadcast %113 : vector<8x1xf32> to vector<8x128xf32>
    %115 = arith.mulf %111, %114 : vector<8x128xf32>
    %116 = arith.index_cast %80 : i32 to index
    %c0_50 = arith.constant 0 : index
    %117 = vector.load %arg11[%116, %c0_50] : memref<16x128xf32, #tpu.memory_space<vmem>>, vector<8x128xf32>
    tpu.vector_store %arg11[%116, %c0_50], %115 {strides = array<i32>} : memref<16x128xf32, #tpu.memory_space<vmem>>, vector<8x128xf32>,
    %c2_i32 = arith.constant 2 : i32
    %c0_51 = arith.constant 0 : index
    %c0_52 = arith.constant 0 : index
    %118 = vector.load %arg11[%c0_51, %c0_52] : memref<16x128xf32, #tpu.memory_space<vmem>>, vector<16x128xf32>
    %119 = arith.truncf %118 : vector<16x128xf32> to vector<16x128xbf16>
    %c0_53 = arith.constant 0 : index
    %c0_54 = arith.constant 0 : index
    %120 = vector.load %arg7[%c0_53, %c0_54] : memref<128x128xbf16, #tpu.memory_space<vmem>>, vector<128x128xbf16>
    %cst_55 = arith.constant dense<0.000000e+00> : vector<16x128xf32>
    %121 = tpu.matmul %119, %120, %cst_55 {dimension_numbers = #tpu.dot_dimension_numbers<[1], [0], [0], [1], [0, 0, 1, 1], [], []>} : vector<16x128xbf16>, vector<128x128xbf16>, vector<16x128xf32> -> vector<16x128xf32>
    %c0_56 = arith.constant 0 : index
    %c0_57 = arith.constant 0 : index
    %122 = vector.load %arg8[%c0_56, %c0_57] : memref<1x128xf32, #tpu.memory_space<vmem>>, vector<1x128xf32>
    %123 = vector.broadcast %122 : vector<1x128xf32> to vector<16x128xf32>
    %124 = arith.addf %121, %123 : vector<16x128xf32>
    %c0_58 = arith.constant 0 : index
    %c0_59 = arith.constant 0 : index
    %125 = vector.load %arg9[%c0_58, %c0_59] : memref<16x128xf32, #tpu.memory_space<vmem>>, vector<16x128xf32>
    tpu.vector_store %arg9[%c0_58, %c0_59], %124 {strides = array<i32>} : memref<16x128xf32, #tpu.memory_space<vmem>>, vector<16x128xf32>,
    return
  }
  func.func @transform_0(%arg0: i32) -> (i32, i32, i32) {
    %c0_i32 = arith.constant 0 : i32
    %c0_i32_0 = arith.constant 0 : i32
    %c0_i32_1 = arith.constant 0 : i32
    return %arg0, %c0_i32, %c0_i32_0 : i32, i32, i32
  }
  func.func @transform_1(%arg0: i32) -> (i32, i32) {
    %c0_i32 = arith.constant 0 : i32
    %c0_i32_0 = arith.constant 0 : i32
    %c0_i32_1 = arith.constant 0 : i32
    return %c0_i32, %c0_i32_0 : i32, i32
  }
  func.func @transform_2(%arg0: i32) -> (i32, i32) {
    %c0_i32 = arith.constant 0 : i32
    %c0_i32_0 = arith.constant 0 : i32
    %c0_i32_1 = arith.constant 0 : i32
    return %c0_i32, %c0_i32_0 : i32, i32
  }
  func.func @transform_3(%arg0: i32) -> (i32, i32) {
    %c0_i32 = arith.constant 0 : i32
    %c0_i32_0 = arith.constant 0 : i32
    %c0_i32_1 = arith.constant 0 : i32
    return %c0_i32, %c0_i32_0 : i32, i32
  }
  func.func @transform_4(%arg0: i32) -> (i32, i32) {
    %c0_i32 = arith.constant 0 : i32
    %c0_i32_0 = arith.constant 0 : i32
    %c0_i32_1 = arith.constant 0 : i32
    return %c0_i32, %c0_i32_0 : i32, i32
  }
  func.func @transform_5(%arg0: i32) -> (i32, i32) {
    %c0_i32 = arith.constant 0 : i32
    %c0_i32_0 = arith.constant 0 : i32
    %c0_i32_1 = arith.constant 0 : i32
    return %c0_i32, %c0_i32_0 : i32, i32
  }
  func.func @transform_6(%arg0: i32) -> (i32, i32) {
    %c0_i32 = arith.constant 0 : i32
    %c0_i32_0 = arith.constant 0 : i32
    %c0_i32_1 = arith.constant 0 : i32
    return %c0_i32, %c0_i32_0 : i32, i32
  }
  func.func @transform_7(%arg0: i32) -> (i32, i32) {
    %c0_i32 = arith.constant 0 : i32
    %c0_i32_0 = arith.constant 0 : i32
    %c0_i32_1 = arith.constant 0 : i32
    return %c0_i32, %c0_i32_0 : i32, i32
  }
  func.func @transform_8(%arg0: i32) -> (i32, i32) {
    %c0_i32 = arith.constant 0 : i32
    %c0_i32_0 = arith.constant 0 : i32
    return %arg0, %c0_i32 : i32, i32
  }
}

</mosaic_0001>

<bundles_post_ra>
// kernel: tpu_custom_call.1
= control target key start
LH: loop header
LB: loop body
LE: loop exit
PB: predicated region body
PF: predicated region fallthrough
CT: control target
= control target key end

     0   :  { %13 = vsyncpa [#allocation5], 0  ;;  %s6497_s0 = inlined_call_operand.hbm [shape: bf16[32,16,128], index: 0, kind: input, shape index: {}]   ;;  %s6498_s1 = inlined_call_operand.vmem [shape: f32[1,128], index: 1, kind: input, shape index: {}]   ;;  %s6499_s2 = inlined_call_operand.vmem [shape: f32[1,128], index: 2, kind: input, shape index: {}]   ;;  %s6500_s3 = inlined_call_operand.hbm [shape: bf16[128,128], index: 3, kind: input, shape index: {}]   ;;  %s6501_s4 = inlined_call_operand.vmem [shape: f32[1,128], index: 4, kind: input, shape index: {}]   ;;  %s6502_s5 = inlined_call_operand.vmem [shape: f32[1,128], index: 5, kind: input, shape index: {}]   ;;  %s6503_s6 = inlined_call_operand.hbm [shape: bf16[128,128], index: 6, kind: input, shape index: {}]   ;;  %s6504_s7 = inlined_call_operand.vmem [shape: f32[1,128], index: 7, kind: input, shape index: {}]   ;;  %s6505_s8 = inlined_call_operand.hbm [shape: f32[32,128], index: 8, kind: output, shape index: {}]  }
   0x1   :  { %15 = vsyncpa [#allocation5 + $0x1], 0 }
   0x2   :  { %16 = vsyncpa [#allocation8], 0 }
   0x3   :  { %17 = vsyncpa [#allocation6], 0 }
   0x4   :  { %19 = vsyncpa [#allocation6 + $0x1], 0  ;;  %s4866_s27 = smov 0   ;;  %s4868_s28 = smov 0  }
   0x5   :  { %s4870_s29 = smov 0   ;;  %s4872_s30 = smov 0  }
   0x6 LB: > { %s4887_s9 = sadd.s32 4294967295, %s4809_s30   ;;  %s3780_s10 = sadd.s32 4294967294, %s4809_s30   ;;  %s4809_s30 = sphi %s4872_s30, %s6569_s30   ;;  %s4805_s29 = sphi %s4870_s29, %s6568_s29   ;;  %s4801_s28 = sphi %s4868_s28, %s6567_s28   ;;  %s4797_s27 = sphi %s4866_s27, %s6566_s27  }
   0x7   : > { %p45_p0 = scmp.ne.s32.totalorder %s4801_s28, %s4797_s27  ;;  %p6506_p1 = scmp.eq.s32.totalorder %s4887_s9, 0 }
   0x8   : > { %p222_p3 = scmp.eq.s32.totalorder %s3780_s10, 1  ;;  %p3781_p5 = scmp.ge.s32.totalorder %s4809_s30, 1 }
   0x9   : > { %p4896_p4 = por %p6506_p1, %p45_p0  ;;  %p229_p7 = scmp.lt.s32.totalorder %s4809_s30, 3 }
   0xa   : > { %p4901_p6 = por %p222_p3, %p45_p0  ;;  %s4811_s14 = smov [#allocation7]  }
   0xb   : > { %s6523_s11 = scalar_select %p4896_p4, 1, 0 }
   0xc   : > { %s6524_s12 = scalar_select %p4901_p6, 1, 0 }
   0xd   : > { %p4906_p8 = pnand %p3781_p5, %p229_p7  ;;  %s247_s15 = sshll.u32 %s4811_s14, 4  ;;  %s4910_s15 = int_to_ptr.vmem [resolvable:$true] %s247_s15 }
   0xe   : > { %s4812_s17 = smov [#allocation9]   ;;  %s4653_s21 = scalar_lea.hbm %s6500_s3, 1024 }
   0xf   : > { %p4288_p9 = pneg %p4906_p8  ;;  %s266_s18 = sshll.u32 %s4812_s17, 4  ;;  %s4921_s18 = int_to_ptr.vmem [resolvable:$true] %s266_s18 }
  0x10   : > { %p4654_p12 = scmp.ne.s32.totalorder %s6500_s3, %s4653_s21  ;;  %p4660_p5 = scmp.lt.u32.totalorder %s4653_s21, %s6500_s3 }
  0x11   : > { %p4917_p11 = pnand %p4288_p9, %p6506_p1 }
  0x13   : > { %p4655_p13 = pneg %p4917_p11 }
  0x15   : > { %p4656_p0 = pnand %p4655_p13, %p4654_p12 }
  0x17   : > { %p4657_p3 = pneg %p4656_p0 }
  0x19   : > { %p4662_p7 = pnand %p4660_p5, %p4657_p3 }
  0x1b   : > { %4665 = shalt.err (!%p4662_p7)
}
  0x1c   : > { %s4666_s26 = scalar_lea.vmem %s4910_s15, 1024  ;;  %p4674_p2 = scmp.lt.s32.totalorder %s4910_s15, %s4910_s15 }
  0x1d   : > { %p4667_p9 = scmp.ne.s32.totalorder %s4910_s15, %s4666_s26  ;;  %p4675_p12 = scmp.lt.s32.totalorder %s4666_s26, %s4666_s26 }
  0x1f   : > { %p4669_p10 = pnand %p4667_p9, %p4655_p13  ;;  %p4676_p0 = por %p4675_p12, %p4674_p2 }
  0x21   : > { %p4670_p1 = pneg %p4669_p10 }
  0x23   : > { %p4677_p6 = pnand %p4676_p0, %p4670_p1 }
  0x25   : > { %4680 = shalt.err (!%p4677_p6)
}
  0x26   : > { %s6507_s10 = smov 64   ;;  %s6508_s14 = smov 4  }
  0x27   : > { %4291 = dma.hbm_to_vmem [thread:$0]  (!%p4917_p11), %s6500_s3, 1024, %s4910_s15, [#allocation8], %s6507_s10, %s6507_s10, %s6508_s14  }
  0x28   : > { %s4681_s22 = scalar_lea.hbm %s6503_s6, 1024 }
  0x29   : > { %p4682_p1 = scmp.ne.s32.totalorder %s6503_s6, %s4681_s22  ;;  %p4688_p10 = scmp.lt.u32.totalorder %s4681_s22, %s6503_s6 }
  0x2b   : > { %p4684_p2 = pnand %p4682_p1, %p4655_p13 }
  0x2d   : > { %p4685_p6 = pneg %p4684_p2 }
  0x2f   : > { %p4690_p3 = pnand %p4688_p10, %p4685_p6 }
  0x31   : > { %4693 = shalt.err (!%p4690_p3)
}
  0x32   : > { %s4694_s15 = scalar_lea.vmem %s4921_s18, 1024  ;;  %p4702_p12 = scmp.lt.s32.totalorder %s4921_s18, %s4921_s18 }
  0x33   : > { %p4695_p5 = scmp.ne.s32.totalorder %s4921_s18, %s4694_s15  ;;  %p4703_p0 = scmp.lt.s32.totalorder %s4694_s15, %s4694_s15 }
  0x35   : > { %p4697_p7 = pnand %p4695_p5, %p4655_p13  ;;  %p4704_p1 = por %p4703_p0, %p4702_p12 }
  0x37   : > { %p4698_p9 = pneg %p4697_p7 }
  0x39   : > { %p4705_p2 = pnand %p4704_p1, %p4698_p9 }
  0x3b   : > { %4708 = shalt.err (!%p4705_p2)
}
  0x3c   : > { %4294 = dma.hbm_to_vmem [thread:$0]  (!%p4917_p11), %s6503_s6, 1024, %s4921_s18, [#allocation8], %s6507_s10, %s6507_s10, %s6508_s14  }
  0x3d   : > { %s4982_s16 = sadd.s32 1, %s4809_s30   ;;  %s32_s20 = sadd.s32 1, %s4805_s29 }
  0x3e   : > { %s29_s21 = ssub.s32 %s4809_s30, %s4982_s16  ;;  %p39_p13 = scmp.ne.s32.totalorder %s4805_s29, %s4801_s28 }
  0x3f   : > { %p30_p6 = scmp.eq.s32.totalorder %s29_s21, 0  ;;  %p40_p10 = scmp.eq.s32.totalorder %s4809_s30, 0 }
  0x40   : > { %p6527_p3 = scmp.eq.s32.totalorder %s4887_s9, 1  ;;  %p4305_p7 = scmp.lt.s32.totalorder %s4809_s30, 2 }
  0x41   : > { %s4998_s23 = scalar_select %p30_p6, %s4805_s29, %s32_s20  }
  0x42   : > { %p4992_p5 = por %p6527_p3, %p39_p13  ;;  %p41_p9 = por %p40_p10, %p39_p13 }
  0x43   : > { %s283_s24 = sand.u32 1, %s4805_s29   ;;  %s3838_s18 = sshll.u32 %s4809_s30, 11 }
  0x44   : > { %s6528_s22 = scalar_select %p4992_p5, 1, 0 }
  0x45   : > { %s3785_s25 = sshll.u32 %s283_s24, 7  ;;  %s5005_s17 = scalar_lea.hbm %s6497_s0, %s3838_s18 }
  0x46   : > { %s287_s19 = scalar_lea.vmem [#allocation4], %s3785_s25  ;;  %p5009_p11 = pnand %p4305_p7, %p41_p9 }
  0x47   : > { %s295_s21 = sshll.u32 %s287_s19, 4  ;;  %s5013_s10 = scalar_lea.sflag [#allocation5], %s283_s24  ;;  %s5007_s21 = int_to_ptr.vmem [resolvable:$true] %s295_s21 }
  0x48   : > { %s4709_s14 = scalar_lea.hbm %s5005_s17, 2048  ;;  %p4711_p0 = pneg %p5009_p11 }
  0x49   : > { %p4710_p12 = scmp.ne.s32.totalorder %s5005_s17, %s4709_s14  ;;  %s4714_s26 = scalar_lea.hbm %s6497_s0, 4096 }
  0x4a   : > { %p4715_p13 = scmp.lt.u32.totalorder %s5005_s17, %s6497_s0  ;;  %p4716_p6 = scmp.lt.u32.totalorder %s4714_s26, %s4709_s14 }
  0x4b   : > { %p4712_p1 = pnand %p4711_p0, %p4710_p12  ;;  %p4718_p3 = scmp.lt.u32.totalorder %s4709_s14, %s5005_s17 }
  0x4c   : > { %p4717_p10 = por %p4716_p6, %p4715_p13 }
  0x4d   : > { %p4713_p2 = pneg %p4712_p1 }
  0x4e   : > { %p4719_p7 = por %p4718_p3, %p4717_p10 }
  0x50   : > { %p4720_p9 = pnand %p4719_p7, %p4713_p2 }
  0x52   : > { %4723 = shalt.err (!%p4720_p9)
}
  0x53   : > { %s4724_s24 = scalar_lea.vmem %s5007_s21, 2048  ;;  %s4815_s25 = smov [#allocation4]  }
  0x54   : > { %p4725_p12 = scmp.ne.s32.totalorder %s5007_s21, %s4724_s24  ;;  %s4729_s18 = sshll.u32 %s4815_s25, 4  ;;  %s4730_s18 = int_to_ptr.vmem [resolvable:$false] %s4729_s18 }
  0x55   : > { %s4731_s15 = scalar_lea.vmem %s4730_s18, 4096  ;;  %p4732_p4 = scmp.lt.s32.totalorder %s5007_s21, %s4730_s18 }
  0x56   : > { %p4727_p1 = pnand %p4725_p12, %p4711_p0  ;;  %p4733_p13 = scmp.lt.s32.totalorder %s4731_s15, %s4724_s24 }
  0x58   : > { %p4728_p5 = pneg %p4727_p1  ;;  %p4734_p6 = por %p4733_p13, %p4732_p4 }
  0x5a   : > { %p4735_p10 = pnand %p4734_p6, %p4728_p5 }
  0x5c   : > { %4738 = shalt.err (!%p4735_p10)
}
  0x5d   : > { %s6530_s14 = smov 4   ;;  %s6531_s26 = smov 64  }
  0x5e   : > { %4298 = dma.hbm_to_vmem [thread:$0]  (!%p5009_p11), %s5005_s17, 2048, %s5007_s21, %s5013_s10, %s6531_s26, %s6531_s26, %s6530_s14  }
  0x5f   : > { %307 = sbr.rel (%p4906_p8) target bundleno = 2180 (0x884), region = 52 }
  0x66   : > { %s5047_s19 = sand.u32 1, %s4801_s28   ;;  %p6532_p4 = scmp.ne.s32.totalorder %s6523_s11, 0 }
  0x67   : > { %s3790_s24 = sshll.u32 %s5047_s19, 7  ;;  %s310_s25 = scalar_lea.sflag [#allocation5], %s5047_s19 }
  0x68   : > { %s5051_s18 = scalar_lea.vmem [#allocation4], %s3790_s24 }
  0x69   : > { %4784 = dma.done.wait (%p6532_p4), %s310_s25, 2048  }
  0x6a   : > { %4786 = vsyncadd (%p6532_p4), %s310_s25, 4294965248  ;;  %p6533_p5 = scmp.eq.s32.totalorder %s4887_s9, 0 }
  0x6c   : > { %4788 = dma.done.wait (%p6533_p5), [#allocation8], 2048   ;;  %p6534_p8 = pmov %p6533_p5 }
  0x6d   : > { %v3841_v0 = vld [vmem:[%s5051_s18] sm:$0xff]   ;;  %v3904_v1 = vld [vmem:[%s5051_s18 + $0x8] sm:$0xff]   ;;  %v5064_v4 = vld [vmem:[%s5051_s18 + $0x10] sm:$0xff]   ;;  %vm4817_vm0 = vmmov 0   ;;  %vm1483_vm1 = vcmask 130048   ;;  %vm2331_vm2 = vcmask 1041409  }
  0x6e   : > { %4790 = vsyncadd (%p6534_p8), [#allocation8], 4294965248  ;;  %v3842_v2 = vunpack.c.l.bf16 %v3841_v0  ;;  %v3846_v3 = vunpack.c.l.bf16 %v3904_v1  ;;  %v3843_v5 = vunpack.c.h.bf16 %v3841_v0  ;;  %v3847_v6 = vunpack.c.h.bf16 %v3904_v1  ;;  %v5067_v7 = vld [vmem:[%s5051_s18 + $0x18] sm:$0xff]   ;;  %v5072_v10 = vld [vmem:[%s5051_s18 + $0x20] sm:$0xff]   ;;  %s3793_s26 = sshll.u32 %s5047_s19, 4  ;;  %s3839_s13 = sshll.u32 %s4887_s9, 8 }
  0x6f   : > { %v3850_v8 = vunpack.c.l.bf16 %v5064_v4  ;;  %v3851_v9 = vunpack.c.h.bf16 %v5064_v4  ;;  %v3854_v11 = vunpack.c.l.bf16 %v5067_v7  ;;  %v3855_v12 = vunpack.c.h.bf16 %v5067_v7  ;;  %v5079_v15 = vld [vmem:[%s5051_s18 + $0x28] sm:$0xff]   ;;  %v5088_v18 = vld [vmem:[%s5051_s18 + $0x30] sm:$0xff]   ;;  %v5097_v21 = vld [vmem:[%s5051_s18 + $0x38] sm:$0xff]   ;;  %s6453_s21 = scalar_lea.hbm %s6505_s8, %s3839_s13  ;;  %s3675_s20 = scalar_lea.sflag [#allocation6], %s5047_s19 }
  0x70   : > { %421 = vadd.xlane.f32.xlu0 %v3842_v2  ;;  %425 = vadd.xlane.f32.xlu1 %v3846_v3  ;;  %v3858_v13 = vunpack.c.l.bf16 %v5072_v10  ;;  %v3859_v14 = vunpack.c.h.bf16 %v5072_v10  ;;  %v3862_v16 = vunpack.c.l.bf16 %v5079_v15  ;;  %v3863_v17 = vunpack.c.h.bf16 %v5079_v15  ;;  %v4349_v24 = vld [vmem:[#allocation7] sm:$0xff]   ;;  %v4350_v4 = vld [vmem:[#allocation7 + $0x8] sm:$0xff]   ;;  %p6563_p0 = scmp.ne.s32.totalorder %s6528_s22, 0  ;;  %s4818_s15 = smov [#allocation10]  }
  0x71   : > { %v3866_v19 = vunpack.c.l.bf16 %v5088_v18  ;;  %v3867_v20 = vunpack.c.h.bf16 %v5088_v18  ;;  %v3870_v22 = vunpack.c.l.bf16 %v5097_v21  ;;  %v3871_v23 = vunpack.c.h.bf16 %v5097_v21  ;;  %4016 = vmatprep.subr.bf16.mxu0 %v4349_v24  ;;  %v5194_v21 = vld [vmem:[%s5051_s18 + $0x48] sm:$0xff]   ;;  %s4743_s14 = sshll.u32 %s4818_s15, 4  ;;  %s4744_s14 = int_to_ptr.vmem [resolvable:$false] %s4743_s14 }
  0x72   : > { %4017 = vmatpush3.bf16.msra.mxu0 %v4349_v24  ;;  %vm2333_vm3 = vcmask 1042434   ;;  %vm2335_vm4 = vcmask 1043459   ;;  %vm2337_vm5 = vcmask 1044484   ;;  %vm2339_vm6 = vcmask 1045509  }
  0x73   : > { %4018 = vmatprep.subr.bf16.mxu0 %v4350_v4  ;;  %vm2341_vm7 = vcmask 1046534   ;;  %vm2343_vm8 = vcmask 1047559  }
  0x74   : > { %423 = vadd.xlane.f32.xlu0 %v3843_v5  ;;  %427 = vadd.xlane.f32.xlu1 %v3847_v6 }
  0x76   : > { %4019 = vmatpush3.bf16.msra.mxu0 %v4350_v4 }
  0x78   : > { %429 = vadd.xlane.f32.xlu0 %v3850_v8  ;;  %431 = vadd.xlane.f32.xlu1 %v3851_v9 }
  0x7c   : > { %433 = vadd.xlane.f32.xlu0 %v3854_v11  ;;  %435 = vadd.xlane.f32.xlu1 %v3855_v12 }
  0x80   : > { %437 = vadd.xlane.f32.xlu0 %v3858_v13  ;;  %439 = vadd.xlane.f32.xlu1 %v3859_v14 }
  0x84   : > { %441 = vadd.xlane.f32.xlu0 %v3862_v16  ;;  %443 = vadd.xlane.f32.xlu1 %v3863_v17 }
  0x88   : > { %445 = vadd.xlane.f32.xlu0 %v3866_v19  ;;  %447 = vadd.xlane.f32.xlu1 %v3867_v20 }
  0x8c   : > { %449 = vadd.xlane.f32.xlu0 %v3870_v22  ;;  %451 = vadd.xlane.f32.xlu1 %v3871_v23 }
  0xfd   : > { %v422_v25 = vpop.xlane.xlu0 %421  ;;  %v426_v26 = vpop.xlane.xlu1 %425 }
  0xfe   : > { %v485_v27 = vmul.f32 0.0078125, %v422_v25  ;;  %v487_v28 = vmul.f32 0.0078125, %v426_v26 }
 0x100   : > { %v5109_v29 = vsub.f32 %v3842_v2, %v485_v27  ;;  %v5111_v30 = vsub.f32 %v3846_v3, %v487_v28  ;;  %v4352_v28 = vld [vmem:[#allocation7 + $0x18] sm:$0xff]  }
 0x101   : > { %v424_v31 = vpop.xlane.xlu0 %423  ;;  %v428_v32 = vpop.xlane.xlu1 %427 }
 0x102   : > { %v486_v33 = vmul.f32 0.0078125, %v424_v31  ;;  %v549_v34 = vmul.f32 %v5109_v29, %v5109_v29  ;;  %v488_v35 = vmul.f32 0.0078125, %v428_v32  ;;  %v551_v36 = vmul.f32 %v5111_v30, %v5111_v30  ;;  %v5186_v31 = vld [vmem:[%s5051_s18 + $0x40] sm:$0xff]  }
 0x104   : > { %581 = vadd.xlane.f32.xlu0 %v549_v34  ;;  %v5117_v37 = vsub.f32 %v3843_v5, %v486_v33  ;;  %v5119_v38 = vsub.f32 %v3847_v6, %v488_v35  ;;  %v4353_v34 = vld [vmem:[#allocation7 + $0x20] sm:$0xff]   ;;  %v3878_v35 = vunpack.c.l.bf16 %v5194_v21 }
 0x105   : > { %v430_v39 = vpop.xlane.xlu0 %429  ;;  %v432_v40 = vpop.xlane.xlu1 %431 }
 0x106   : > { %v489_v41 = vmul.f32 0.0078125, %v430_v39  ;;  %v550_v42 = vmul.f32 %v5117_v37, %v5117_v37  ;;  %v490_v43 = vmul.f32 0.0078125, %v432_v40  ;;  %v552_v44 = vmul.f32 %v5119_v38, %v5119_v38  ;;  %v5201_v39 = vld [vmem:[%s5051_s18 + $0x50] sm:$0xff]  }
 0x107   : > { %v3879_v40 = vunpack.c.h.bf16 %v5194_v21 }
 0x108   : > { %585 = vadd.xlane.f32.xlu0 %v551_v36  ;;  %583 = vadd.xlane.f32.xlu1 %v550_v42  ;;  %v5125_v45 = vsub.f32 %v3850_v8, %v489_v41  ;;  %v5127_v46 = vsub.f32 %v3851_v9, %v490_v43  ;;  %v4354_v36 = vld [vmem:[#allocation7 + $0x28] sm:$0xff]   ;;  %v3882_v41 = vunpack.c.l.bf16 %v5201_v39  ;;  %v4355_v42 = vld [vmem:[#allocation7 + $0x30] sm:$0xff]   ;;  %v5210_v43 = vld [vmem:[%s5051_s18 + $0x58] sm:$0xff]  }
 0x109   : > { %v434_v47 = vpop.xlane.xlu0 %433  ;;  %v436_v48 = vpop.xlane.xlu1 %435 }
 0x10a   : > { %v491_v49 = vmul.f32 0.0078125, %v434_v47  ;;  %v553_v50 = vmul.f32 %v5125_v45, %v5125_v45  ;;  %v492_v51 = vmul.f32 0.0078125, %v436_v48  ;;  %v554_v52 = vmul.f32 %v5127_v46, %v5127_v46  ;;  %v4356_v48 = vld [vmem:[#allocation7 + $0x38] sm:$0xff]  }
 0x10b   : > { %v3886_v47 = vunpack.c.l.bf16 %v5210_v43 }
 0x10c   : > { %587 = vadd.xlane.f32.xlu1 %v552_v44  ;;  %589 = vadd.xlane.f32.xlu0 %v553_v50  ;;  %v5133_v53 = vsub.f32 %v3854_v11, %v491_v49  ;;  %v5135_v54 = vsub.f32 %v3855_v12, %v492_v51  ;;  %v3883_v44 = vunpack.c.h.bf16 %v5201_v39  ;;  %v5219_v49 = vld [vmem:[%s5051_s18 + $0x60] sm:$0xff]   ;;  %v3887_v50 = vunpack.c.h.bf16 %v5210_v43 }
 0x10d   : > { %v438_v55 = vpop.xlane.xlu0 %437  ;;  %v440_v56 = vpop.xlane.xlu1 %439  ;;  %v3890_v51 = vunpack.c.l.bf16 %v5219_v49 }
 0x10e   : > { %v493_v57 = vmul.f32 0.0078125, %v438_v55  ;;  %v555_v58 = vmul.f32 %v5133_v53, %v5133_v53  ;;  %v494_v59 = vmul.f32 0.0078125, %v440_v56  ;;  %v556_v60 = vmul.f32 %v5135_v54, %v5135_v54 }
 0x10f   : > { %v3891_v55 = vunpack.c.h.bf16 %v5219_v49 }
 0x110   : > { %591 = vadd.xlane.f32.xlu1 %v554_v52  ;;  %593 = vadd.xlane.f32.xlu0 %v555_v58  ;;  %v5143_v61 = vsub.f32 %v3858_v13, %v493_v57  ;;  %v5147_v62 = vsub.f32 %v3859_v14, %v494_v59  ;;  %v5228_v52 = vld [vmem:[%s5051_s18 + $0x68] sm:$0xff]   ;;  %v5237_v57 = vld [vmem:[%s5051_s18 + $0x70] sm:$0xff]  }
 0x111   : > { %v442_v63 = vpop.xlane.xlu0 %441  ;;  %v444_v0 = vpop.xlane.xlu1 %443  ;;  %v3894_v56 = vunpack.c.l.bf16 %v5228_v52  ;;  %v3895_v58 = vunpack.c.h.bf16 %v5228_v52  ;;  %v3898_v59 = vunpack.c.l.bf16 %v5237_v57 }
 0x112   : > { %v495_v1 = vmul.f32 0.0078125, %v442_v63  ;;  %v557_v2 = vmul.f32 %v5143_v61, %v5143_v61  ;;  %v496_v3 = vmul.f32 0.0078125, %v444_v0  ;;  %v558_v5 = vmul.f32 %v5147_v62, %v5147_v62 }
 0x113   : > { %v3899_v63 = vunpack.c.h.bf16 %v5237_v57 }
 0x114   : > { %595 = vadd.xlane.f32.xlu1 %v556_v60  ;;  %597 = vadd.xlane.f32.xlu0 %v557_v2  ;;  %v5155_v6 = vsub.f32 %v3862_v16, %v495_v1  ;;  %v5159_v7 = vsub.f32 %v3863_v17, %v496_v3  ;;  %v4351_v16 = vld [vmem:[#allocation7 + $0x10] sm:$0xff]   ;;  %v5246_v60 = vld [vmem:[%s5051_s18 + $0x78] sm:$0xff]   ;;  %s353_s18 = scalar_lea.vmem [#allocation10], %s3793_s26  ;;  %s4745_s26 = scalar_lea.vmem %s4744_s14, 512 }
 0x115   : > { %v446_v8 = vpop.xlane.xlu0 %445  ;;  %v448_v9 = vpop.xlane.xlu1 %447  ;;  %4020 = vmatprep.subr.bf16.mxu0 %v4351_v16  ;;  %v3902_v0 = vunpack.c.l.bf16 %v5246_v60  ;;  %v3903_v1 = vunpack.c.h.bf16 %v5246_v60  ;;  %s3688_s11 = sshll.u32 %s353_s18, 4  ;;  %s6448_s11 = int_to_ptr.vmem [resolvable:$true] %s3688_s11 }
 0x116   : > { %v497_v10 = vmul.f32 0.0078125, %v446_v8  ;;  %v559_v11 = vmul.f32 %v5155_v6, %v5155_v6  ;;  %v498_v12 = vmul.f32 0.0078125, %v448_v9  ;;  %v560_v13 = vmul.f32 %v5159_v7, %v5159_v7  ;;  %4021 = vmatpush3.bf16.msra.mxu0 %v4351_v16  ;;  %s4739_s9 = scalar_lea.vmem %s6448_s11, 256  ;;  %p4746_p7 = scmp.lt.s32.totalorder %s6448_s11, %s4744_s14 }
 0x117   : > { %4022 = vmatprep.subr.bf16.mxu0 %v4352_v28  ;;  %p4740_p11 = scmp.ne.s32.totalorder %s6448_s11, %s4739_s9  ;;  %p4747_p9 = scmp.lt.s32.totalorder %s4745_s26, %s4739_s9 }
 0x118   : > { %599 = vadd.xlane.f32.xlu1 %v558_v5  ;;  %601 = vadd.xlane.f32.xlu0 %v559_v11  ;;  %v5167_v14 = vsub.f32 %v3866_v19, %v497_v10  ;;  %v5171_v15 = vsub.f32 %v3867_v20, %v498_v12 }
 0x119   : > { %v450_v17 = vpop.xlane.xlu0 %449  ;;  %v452_v24 = vpop.xlane.xlu1 %451  ;;  %p4741_p2 = pnand %p4740_p11, %p6563_p0  ;;  %p4748_p12 = por %p4747_p9, %p4746_p7 }
 0x11a   : > { %v499_v25 = vmul.f32 0.0078125, %v450_v17  ;;  %v561_v26 = vmul.f32 %v5167_v14, %v5167_v14  ;;  %v500_v27 = vmul.f32 0.0078125, %v452_v24  ;;  %v562_v19 = vmul.f32 %v5171_v15, %v5171_v15  ;;  %4023 = vmatpush3.bf16.msra.mxu0 %v4352_v28 }
 0x11b   : > { %4024 = vmatprep.subr.bf16.mxu0 %v4353_v34  ;;  %p4742_p3 = pneg %p4741_p2 }
 0x11c   : > { %603 = vadd.xlane.f32.xlu1 %v560_v13  ;;  %605 = vadd.xlane.f32.xlu0 %v561_v26  ;;  %v5179_v18 = vsub.f32 %v3870_v22, %v499_v25  ;;  %v5183_v20 = vsub.f32 %v3871_v23, %v500_v27  ;;  %v3874_v22 = vunpack.c.l.bf16 %v5186_v31  ;;  %v3875_v23 = vunpack.c.h.bf16 %v5186_v31 }
 0x11d   : > { %p4749_p1 = pnand %p4748_p12, %p4742_p3 }
 0x11e   : > { %v563_v32 = vmul.f32 %v5179_v18, %v5179_v18  ;;  %v564_v33 = vmul.f32 %v5183_v20, %v5183_v20  ;;  %4025 = vmatpush3.bf16.msra.mxu0 %v4353_v34 }
 0x11f   : > { %4026 = vmatprep.subr.bf16.mxu0 %v4354_v36 }
 0x120   : > { %607 = vadd.xlane.f32.xlu1 %v562_v19  ;;  %609 = vadd.xlane.f32.xlu0 %v563_v32 }
 0x122   : > { %4027 = vmatpush3.bf16.msra.mxu0 %v4354_v36 }
 0x123   : > { %4028 = vmatprep.subr.bf16.mxu0 %v4355_v42 }
 0x124   : > { %611 = vadd.xlane.f32.xlu1 %v564_v33  ;;  %453 = vadd.xlane.f32.xlu0 %v3874_v22 }
 0x126   : > { %4029 = vmatpush3.bf16.msra.mxu0 %v4355_v42 }
 0x127   : > { %4030 = vmatprep.subr.bf16.mxu0 %v4356_v48 }
 0x128   : > { %455 = vadd.xlane.f32.xlu1 %v3875_v23  ;;  %457 = vadd.xlane.f32.xlu0 %v3878_v35 }
 0x12a   : > { %4031 = vmatpush3.bf16.msra.mxu0 %v4356_v48 }
 0x12c   : > { %459 = vadd.xlane.f32.xlu1 %v3879_v40  ;;  %461 = vadd.xlane.f32.xlu0 %v3882_v41 }
 0x130   : > { %463 = vadd.xlane.f32.xlu1 %v3883_v44  ;;  %465 = vadd.xlane.f32.xlu0 %v3886_v47 }
 0x134   : > { %467 = vadd.xlane.f32.xlu1 %v3887_v50  ;;  %469 = vadd.xlane.f32.xlu0 %v3890_v51 }
 0x138   : > { %471 = vadd.xlane.f32.xlu1 %v3891_v55  ;;  %473 = vadd.xlane.f32.xlu0 %v3894_v56 }
 0x13c   : > { %475 = vadd.xlane.f32.xlu1 %v3895_v58  ;;  %477 = vadd.xlane.f32.xlu0 %v3898_v59 }
 0x140   : > { %479 = vadd.xlane.f32.xlu1 %v3899_v63  ;;  %481 = vadd.xlane.f32.xlu0 %v3902_v0 }
 0x144   : > { %483 = vadd.xlane.f32.xlu1 %v3903_v1 }
 0x191   : > { %v582_v2 = vpop.xlane.xlu0 %581 }
 0x192   : > { %v645_v3 = vmul.f32 0.0078125, %v582_v2 }
 0x194   : > { %v677_v4 = vadd.f32 1e-05, %v645_v3 }
 0x195   : > { %v584_v5 = vpop.xlane.xlu1 %583  ;;  %v586_v8 = vpop.xlane.xlu0 %585 }
 0x196   : > { %4365 = vrsqrt.f32 %v677_v4  ;;  %v646_v9 = vmul.f32 0.0078125, %v584_v5  ;;  %v647_v10 = vmul.f32 0.0078125, %v586_v8  ;;  %v5265_v5 = vld [vmem:[%s6498_s1] ss:$0 sm:$0xff] }
 0x198   : > { %v678_v11 = vadd.f32 1e-05, %v646_v9  ;;  %v679_v12 = vadd.f32 1e-05, %v647_v10 }
 0x199   : > { %v588_v13 = vpop.xlane.xlu1 %587  ;;  %v590_v16 = vpop.xlane.xlu0 %589 }
 0x19a   : > { %4367 = vrsqrt.f32 %v678_v11  ;;  %v648_v17 = vmul.f32 0.0078125, %v588_v13  ;;  %v649_v24 = vmul.f32 0.0078125, %v590_v16 }
 0x19b   : > { %4369 = vrsqrt.f32 %v679_v12 }
 0x19c   : > { %v680_v25 = vadd.f32 1e-05, %v648_v17  ;;  %v681_v26 = vadd.f32 1e-05, %v649_v24 }
 0x19d   : > { %v592_v27 = vpop.xlane.xlu1 %591  ;;  %v594_v19 = vpop.xlane.xlu0 %593 }
 0x19e   : > { %4371 = vrsqrt.f32 %v680_v25  ;;  %v650_v28 = vmul.f32 0.0078125, %v592_v27  ;;  %v651_v32 = vmul.f32 0.0078125, %v594_v19  ;;  %v5272_v25 = vld [vmem:[%s6499_s2] ss:$0 sm:$0xff] }
 0x19f   : > { %4373 = vrsqrt.f32 %v681_v26 }
 0x1a0   : > { %v4366_v33 = vpop.eup %4365  ;;  %v682_v34 = vadd.f32 1e-05, %v650_v28  ;;  %v683_v36 = vadd.f32 1e-05, %v651_v32 }
 0x1a1   : > { %v596_v42 = vpop.xlane.xlu1 %595  ;;  %v598_v48 = vpop.xlane.xlu0 %597  ;;  %v741_v2 = vmul.f32 %v4366_v33, %v5109_v29 }
 0x1a2   : > { %4375 = vrsqrt.f32 %v682_v34  ;;  %v652_v3 = vmul.f32 0.0078125, %v596_v42  ;;  %v653_v4 = vmul.f32 0.0078125, %v598_v48 }
 0x1a3   : > { %4377 = vrsqrt.f32 %v683_v36  ;;  %v780_v17 = vmul.f32 %v5265_v5, %v741_v2 }
 0x1a4   : > { %v4368_v8 = vpop.eup %4367  ;;  %v684_v9 = vadd.f32 1e-05, %v652_v3  ;;  %v685_v10 = vadd.f32 1e-05, %v653_v4 }
 0x1a5   : > { %v4370_v11 = vpop.eup %4369  ;;  %v600_v12 = vpop.xlane.xlu1 %599  ;;  %v742_v16 = vmul.f32 %v4368_v8, %v5117_v37  ;;  %v819_v36 = vadd.f32 %v5272_v25, %v780_v17 }
 0x1a6   : > { %v602_v13 = vpop.xlane.xlu0 %601  ;;  %4379 = vrsqrt.f32 %v684_v9  ;;  %v654_v29 = vmul.f32 0.0078125, %v600_v12  ;;  %v743_v26 = vmul.f32 %v4370_v11, %v5111_v30 }
 0x1a7   : > { %v655_v24 = vmul.f32 0.0078125, %v602_v13  ;;  %4381 = vrsqrt.f32 %v685_v10  ;;  %v781_v27 = vmul.f32 %v5265_v5, %v742_v16 }
 0x1a8   : > { %v4372_v19 = vpop.eup %4371  ;;  %v686_v28 = vadd.f32 1e-05, %v654_v29  ;;  %v782_v2 = vmul.f32 %v5265_v5, %v743_v26 }
 0x1a9   : > { %v687_v32 = vadd.f32 1e-05, %v655_v24  ;;  %v4374_v33 = vpop.eup %4373  ;;  %v604_v37 = vpop.xlane.xlu1 %603  ;;  %v820_v42 = vadd.f32 %v5272_v25, %v781_v27  ;;  %v744_v48 = vmul.f32 %v4372_v19, %v5119_v38 }
 0x1aa   : > { %v606_v34 = vpop.xlane.xlu0 %605  ;;  %4383 = vrsqrt.f32 %v686_v28  ;;  %v656_v3 = vmul.f32 0.0078125, %v604_v37  ;;  %v745_v9 = vmul.f32 %v4374_v33, %v5125_v45  ;;  %v821_v38 = vadd.f32 %v5272_v25, %v782_v2 }
 0x1ab   : > { %v657_v30 = vmul.f32 0.0078125, %v606_v34  ;;  %4385 = vrsqrt.f32 %v687_v32  ;;  %v851_v4 = vpack.c.bf16 %v820_v42, %v819_v36  ;;  %v783_v8 = vmul.f32 %v5265_v5, %v744_v48 }
 0x1ac   : > { %v4376_v10 = vpop.eup %4375  ;;  %v688_v11 = vadd.f32 1e-05, %v656_v3  ;;  %v784_v26 = vmul.f32 %v5265_v5, %v745_v9 }
 0x1ad   : > { %v689_v12 = vadd.f32 1e-05, %v657_v30  ;;  %v4378_v13 = vpop.eup %4377  ;;  %v608_v16 = vpop.xlane.xlu1 %607  ;;  %4032 = vmatprep.mubr.bf16.mxu0 %v851_v4  ;;  %v822_v29 = vadd.f32 %v5272_v25, %v783_v8  ;;  %v746_v24 = vmul.f32 %v4376_v10, %v5127_v46 }
 0x1ae   : > { %v610_v17 = vpop.xlane.xlu0 %609  ;;  %4387 = vrsqrt.f32 %v688_v11  ;;  %v658_v27 = vmul.f32 0.0078125, %v608_v16  ;;  %v747_v45 = vmul.f32 %v4378_v13, %v5133_v53  ;;  %v823_v46 = vadd.f32 %v5272_v25, %v784_v26 }
 0x1af   : > { %v659_v19 = vmul.f32 0.0078125, %v610_v17  ;;  %4389 = vrsqrt.f32 %v689_v12  ;;  %v852_v28 = vpack.c.bf16 %v822_v29, %v821_v38  ;;  %v785_v32 = vmul.f32 %v5265_v5, %v746_v24 }
 0x1b0   : > { %v4380_v33 = vpop.eup %4379  ;;  %v690_v37 = vadd.f32 1e-05, %v658_v27  ;;  %v786_v30 = vmul.f32 %v5265_v5, %v747_v45 }
 0x1b1   : > { %v691_v34 = vadd.f32 1e-05, %v659_v19  ;;  %v4382_v36 = vpop.eup %4381  ;;  %v612_v42 = vpop.xlane.xlu1 %611  ;;  %4033 = vmatmul.mubr.bf16.vlgmr.msra.gmra.mrb[0].mxu0 %v852_v28  ;;  %v824_v2 = vadd.f32 %v5272_v25, %v785_v32  ;;  %v748_v3 = vmul.f32 %v4380_v33, %v5135_v54 }
 0x1b2   : > { %v454_v48 = vpop.xlane.xlu0 %453  ;;  %4391 = vrsqrt.f32 %v690_v37  ;;  %v660_v53 = vmul.f32 0.0078125, %v612_v42  ;;  %v749_v10 = vmul.f32 %v4382_v36, %v5143_v61  ;;  %v825_v38 = vadd.f32 %v5272_v25, %v786_v30 }
 0x1b3   : > { %v501_v4 = vmul.f32 0.0078125, %v454_v48  ;;  %4393 = vrsqrt.f32 %v691_v34  ;;  %v853_v8 = vpack.c.bf16 %v824_v2, %v823_v46  ;;  %v787_v9 = vmul.f32 %v5265_v5, %v748_v3 }
 0x1b4   : > { %v4384_v11 = vpop.eup %4383  ;;  %v692_v12 = vadd.f32 1e-05, %v660_v53  ;;  %v788_v26 = vmul.f32 %v5265_v5, %v749_v10 }
 0x1b5   : > { %v5296_v13 = vsub.f32 %v3874_v22, %v501_v4  ;;  %v4386_v16 = vpop.eup %4385  ;;  %v456_v17 = vpop.xlane.xlu1 %455  ;;  %4036 = vmatprep.mubr.bf16.mxu0 %v853_v8  ;;  %v826_v29 = vadd.f32 %v5272_v25, %v787_v9  ;;  %v750_v24 = vmul.f32 %v4384_v11, %v5147_v62 }
 0x1b6   : > { %v458_v54 = vpop.xlane.xlu0 %457  ;;  %4395 = vrsqrt.f32 %v692_v12  ;;  %v502_v61 = vmul.f32 0.0078125, %v456_v17  ;;  %v751_v28 = vmul.f32 %v4386_v16, %v5155_v6  ;;  %v827_v42 = vadd.f32 %v5272_v25, %v788_v26 }
 0x1b7   : > { %v503_v27 = vmul.f32 0.0078125, %v458_v54  ;;  %v565_v19 = vmul.f32 %v5296_v13, %v5296_v13  ;;  %v854_v22 = vpack.c.bf16 %v826_v29, %v825_v38  ;;  %v789_v45 = vmul.f32 %v5265_v5, %v750_v24 }
 0x1b8   : > { %v4388_v32 = vpop.eup %4387  ;;  %v5308_v33 = vsub.f32 %v3875_v23, %v502_v61  ;;  %v790_v46 = vmul.f32 %v5265_v5, %v751_v28 }
 0x1b9   : > { %613 = vadd.xlane.f32.xlu0 %v565_v19  ;;  %v5312_v62 = vsub.f32 %v3878_v35, %v503_v27  ;;  %v4390_v37 = vpop.eup %4389  ;;  %v460_v34 = vpop.xlane.xlu1 %459  ;;  %4037 = vmatmul.mubr.bf16.gmra.mrb[4].mxu0 %v854_v22  ;;  %v828_v48 = vadd.f32 %v5272_v25, %v789_v45  ;;  %v752_v6 = vmul.f32 %v4388_v32, %v5159_v7 }
 0x1ba   : > { %v462_v36 = vpop.xlane.xlu0 %461  ;;  %v504_v2 = vmul.f32 0.0078125, %v460_v34  ;;  %v566_v23 = vmul.f32 %v5308_v33, %v5308_v33  ;;  %v753_v53 = vmul.f32 %v4390_v37, %v5167_v14  ;;  %v829_v12 = vadd.f32 %v5272_v25, %v790_v46 }
 0x1bb   : > { %v505_v31 = vmul.f32 0.0078125, %v462_v36  ;;  %v567_v35 = vmul.f32 %v5312_v62, %v5312_v62  ;;  %v855_v3 = vpack.c.bf16 %v828_v48, %v827_v42  ;;  %v791_v30 = vmul.f32 %v5265_v5, %v752_v6 }
 0x1bc   : > { %v4392_v4 = vpop.eup %4391  ;;  %615 = vadd.xlane.f32.xlu1 %v566_v23  ;;  %v5326_v7 = vsub.f32 %v3879_v40, %v504_v2  ;;  %v792_v17 = vmul.f32 %v5265_v5, %v753_v53 }
 0x1bd   : > { %617 = vadd.xlane.f32.xlu0 %v567_v35  ;;  %v5330_v8 = vsub.f32 %v3882_v41, %v505_v31  ;;  %v4394_v9 = vpop.eup %4393  ;;  %v464_v10 = vpop.xlane.xlu1 %463  ;;  %4040 = vmatprep.mubr.bf16.mxu0 %v855_v3  ;;  %v830_v16 = vadd.f32 %v5272_v25, %v791_v30  ;;  %v754_v14 = vmul.f32 %v4392_v4, %v5171_v15 }
 0x1be   : > { %v466_v11 = vpop.xlane.xlu0 %465  ;;  %v506_v54 = vmul.f32 0.0078125, %v464_v10  ;;  %v568_v40 = vmul.f32 %v5326_v7, %v5326_v7  ;;  %v755_v24 = vmul.f32 %v4394_v9, %v5179_v18  ;;  %v831_v22 = vadd.f32 %v5272_v25, %v792_v17 }
 0x1bf   : > { %v507_v21 = vmul.f32 0.0078125, %v466_v11  ;;  %v569_v41 = vmul.f32 %v5330_v8, %v5330_v8  ;;  %v856_v38 = vpack.c.bf16 %v830_v16, %v829_v12  ;;  %v793_v29 = vmul.f32 %v5265_v5, %v754_v14 }
 0x1c0   : > { %v4396_v26 = vpop.eup %4395  ;;  %619 = vadd.xlane.f32.xlu1 %v568_v40  ;;  %v5344_v15 = vsub.f32 %v3883_v44, %v506_v54  ;;  %v794_v28 = vmul.f32 %v5265_v5, %v755_v24 }
 0x1c1   : > { %621 = vadd.xlane.f32.xlu0 %v569_v41  ;;  %v5348_v61 = vsub.f32 %v3886_v47, %v507_v21  ;;  %v468_v27 = vpop.xlane.xlu1 %467  ;;  %4041 = vmatmul.mubr.bf16.gmra.mrb[8].mxu0 %v856_v38  ;;  %v832_v45 = vadd.f32 %v5272_v25, %v793_v29  ;;  %v756_v18 = vmul.f32 %v4396_v26, %v5183_v20 }
 0x1c2   : > { %v470_v19 = vpop.xlane.xlu0 %469  ;;  %v508_v32 = vmul.f32 0.0078125, %v468_v27  ;;  %v570_v39 = vmul.f32 %v5344_v15, %v5344_v15  ;;  %v833_v6 = vadd.f32 %v5272_v25, %v794_v28 }
 0x1c3   : > { %v509_v37 = vmul.f32 0.0078125, %v470_v19  ;;  %v571_v44 = vmul.f32 %v5348_v61, %v5348_v61  ;;  %v857_v47 = vpack.c.bf16 %v832_v45, %v831_v22  ;;  %v795_v34 = vmul.f32 %v5265_v5, %v756_v18 }
 0x1c4   : > { %623 = vadd.xlane.f32.xlu1 %v570_v39  ;;  %v5361_v36 = vsub.f32 %v3887_v50, %v508_v32 }
 0x1c5   : > { %625 = vadd.xlane.f32.xlu0 %v571_v44  ;;  %v5365_v20 = vsub.f32 %v3890_v51, %v509_v37  ;;  %v472_v42 = vpop.xlane.xlu1 %471  ;;  %4044 = vmatprep.mubr.bf16.mxu0 %v857_v47  ;;  %v834_v46 = vadd.f32 %v5272_v25, %v795_v34 }
 0x1c6   : > { %v474_v48 = vpop.xlane.xlu0 %473  ;;  %v510_v2 = vmul.f32 0.0078125, %v472_v42  ;;  %v572_v23 = vmul.f32 %v5361_v36, %v5361_v36 }
 0x1c7   : > { %v511_v31 = vmul.f32 0.0078125, %v474_v48  ;;  %v573_v43 = vmul.f32 %v5365_v20, %v5365_v20  ;;  %v858_v50 = vpack.c.bf16 %v834_v46, %v833_v6 }
 0x1c8   : > { %627 = vadd.xlane.f32.xlu1 %v572_v23  ;;  %v5375_v51 = vsub.f32 %v3891_v55, %v510_v2 }
 0x1c9   : > { %629 = vadd.xlane.f32.xlu0 %v573_v43  ;;  %v5379_v35 = vsub.f32 %v3894_v56, %v511_v31  ;;  %v476_v3 = vpop.xlane.xlu1 %475  ;;  %4045 = vmatmul.mubr.bf16.gmra.mrb[12].mxu0 %v858_v50 }
 0x1ca   : > { %v478_v30 = vpop.xlane.xlu0 %477  ;;  %v512_v53 = vmul.f32 0.0078125, %v476_v3  ;;  %v574_v9 = vmul.f32 %v5375_v51, %v5375_v51 }
 0x1cb   : > { %v513_v4 = vmul.f32 0.0078125, %v478_v30  ;;  %v575_v10 = vmul.f32 %v5379_v35, %v5379_v35 }
 0x1cc   : > { %631 = vadd.xlane.f32.xlu1 %v574_v9  ;;  %v5387_v49 = vsub.f32 %v3895_v58, %v512_v53 }
 0x1cd   : > { %633 = vadd.xlane.f32.xlu0 %v575_v10  ;;  %v5391_v55 = vsub.f32 %v3898_v59, %v513_v4  ;;  %v480_v56 = vpop.xlane.xlu1 %479 }
 0x1ce   : > { %v482_v11 = vpop.xlane.xlu0 %481  ;;  %v514_v12 = vmul.f32 0.0078125, %v480_v56  ;;  %v576_v14 = vmul.f32 %v5387_v49, %v5387_v49 }
 0x1cf   : > { %v515_v16 = vmul.f32 0.0078125, %v482_v11  ;;  %v577_v17 = vmul.f32 %v5391_v55, %v5391_v55 }
 0x1d0   : > { %635 = vadd.xlane.f32.xlu1 %v576_v14  ;;  %v5399_v52 = vsub.f32 %v3899_v63, %v514_v12  ;;  %v4816_v63 = vmov 0.0  }
 0x1d1   : > { %637 = vadd.xlane.f32.xlu0 %v577_v17  ;;  %v5403_v58 = vsub.f32 %v3902_v0, %v515_v16  ;;  %v484_v59 = vpop.xlane.xlu1 %483  ;;  %4070 = vmatprep.subr.bf16.mxu1 %v4816_v63 }
 0x1d2   : > { %v516_v54 = vmul.f32 0.0078125, %v484_v59  ;;  %v578_v21 = vmul.f32 %v5399_v52, %v5399_v52  ;;  %4064 = vmatprep.subr.bf16.mxu0 %v4816_v63  ;;  %4072 = vmatprep.mubr.msk.bf16.mxu1 %vm4817_vm0, %v4816_v63 }
 0x1d3   : > { %v579_v40 = vmul.f32 %v5403_v58, %v5403_v58 }
 0x1d4   : > { %639 = vadd.xlane.f32.xlu1 %v578_v21  ;;  %v5411_v41 = vsub.f32 %v3903_v1, %v516_v54 }
 0x1d5   : > { %641 = vadd.xlane.f32.xlu0 %v579_v40 }
 0x1d6   : > { %v580_v57 = vmul.f32 %v5411_v41, %v5411_v41 }
 0x1d8   : > { %643 = vadd.xlane.f32.xlu1 %v580_v57 }
 0x246   : > { %v614_v0 = vpop.xlane.xlu0 %613 }
 0x247   : > { %v661_v38 = vmul.f32 0.0078125, %v614_v0 }
 0x249   : > { %v693_v29 = vadd.f32 1e-05, %v661_v38  ;;  %v616_v24 = vpop.xlane.xlu1 %615 }
 0x24a   : > { %v618_v60 = vpop.xlane.xlu0 %617  ;;  %v662_v1 = vmul.f32 0.0078125, %v616_v24 }
 0x24b   : > { %4397 = vrsqrt.f32 %v693_v29  ;;  %v663_v26 = vmul.f32 0.0078125, %v618_v60 }
 0x24c   : > { %v694_v27 = vadd.f32 1e-05, %v662_v1 }
 0x24d   : > { %v695_v19 = vadd.f32 1e-05, %v663_v26  ;;  %v620_v22 = vpop.xlane.xlu1 %619 }
 0x24e   : > { %v622_v45 = vpop.xlane.xlu0 %621  ;;  %4399 = vrsqrt.f32 %v694_v27  ;;  %v664_v18 = vmul.f32 0.0078125, %v620_v22 }
 0x24f   : > { %v665_v28 = vmul.f32 0.0078125, %v622_v45  ;;  %4401 = vrsqrt.f32 %v695_v19 }
 0x250   : > { %v696_v32 = vadd.f32 1e-05, %v664_v18 }
 0x251   : > { %v697_v37 = vadd.f32 1e-05, %v665_v28  ;;  %v624_v39 = vpop.xlane.xlu1 %623 }
 0x252   : > { %v626_v44 = vpop.xlane.xlu0 %625  ;;  %4403 = vrsqrt.f32 %v696_v32  ;;  %v666_v47 = vmul.f32 0.0078125, %v624_v39 }
 0x253   : > { %v667_v34 = vmul.f32 0.0078125, %v626_v44  ;;  %4405 = vrsqrt.f32 %v697_v37 }
 0x254   : > { %v698_v48 = vadd.f32 1e-05, %v666_v47 }
 0x255   : > { %v4398_v42 = vpop.eup %4397  ;;  %v699_v6 = vadd.f32 1e-05, %v667_v34  ;;  %v628_v46 = vpop.xlane.xlu1 %627 }
 0x256   : > { %v630_v2 = vpop.xlane.xlu0 %629  ;;  %v757_v31 = vmul.f32 %v4398_v42, %v5296_v13  ;;  %4407 = vrsqrt.f32 %v698_v48  ;;  %v668_v23 = vmul.f32 0.0078125, %v628_v46 }
 0x257   : > { %v669_v43 = vmul.f32 0.0078125, %v630_v2  ;;  %4409 = vrsqrt.f32 %v699_v6 }
 0x258   : > { %v4400_v50 = vpop.eup %4399  ;;  %v700_v3 = vadd.f32 1e-05, %v668_v23  ;;  %v796_v56 = vmul.f32 %v5265_v5, %v757_v31 }
 0x259   : > { %v701_v30 = vadd.f32 1e-05, %v669_v43  ;;  %v4402_v53 = vpop.eup %4401  ;;  %v632_v4 = vpop.xlane.xlu1 %631  ;;  %v758_v10 = vmul.f32 %v4400_v50, %v5308_v33 }
 0x25a   : > { %v634_v9 = vpop.xlane.xlu0 %633  ;;  %4411 = vrsqrt.f32 %v700_v3  ;;  %v670_v11 = vmul.f32 0.0078125, %v632_v4  ;;  %v759_v16 = vmul.f32 %v4402_v53, %v5312_v62  ;;  %v835_v57 = vadd.f32 %v5272_v25, %v796_v56 }
 0x25b   : > { %v671_v12 = vmul.f32 0.0078125, %v634_v9  ;;  %4413 = vrsqrt.f32 %v701_v30  ;;  %v797_v13 = vmul.f32 %v5265_v5, %v758_v10 }
 0x25c   : > { %v4404_v14 = vpop.eup %4403  ;;  %v702_v17 = vadd.f32 1e-05, %v670_v11  ;;  %v798_v38 = vmul.f32 %v5265_v5, %v759_v16 }
 0x25d   : > { %v703_v59 = vadd.f32 1e-05, %v671_v12  ;;  %v4406_v54 = vpop.eup %4405  ;;  %v636_v21 = vpop.xlane.xlu1 %635  ;;  %v836_v33 = vadd.f32 %v5272_v25, %v797_v13  ;;  %v760_v0 = vmul.f32 %v4404_v14, %v5326_v7 }
 0x25e   : > { %v638_v40 = vpop.xlane.xlu0 %637  ;;  %4415 = vrsqrt.f32 %v702_v17  ;;  %v672_v29 = vmul.f32 0.0078125, %v636_v21  ;;  %v761_v1 = vmul.f32 %v4406_v54, %v5330_v8  ;;  %v837_v7 = vadd.f32 %v5272_v25, %v798_v38 }
 0x25f   : > { %v673_v62 = vmul.f32 0.0078125, %v638_v40  ;;  %4417 = vrsqrt.f32 %v703_v59  ;;  %v859_v24 = vpack.c.bf16 %v836_v33, %v835_v57  ;;  %v799_v60 = vmul.f32 %v5265_v5, %v760_v0 }
 0x260   : > { %v4408_v26 = vpop.eup %4407  ;;  %v704_v27 = vadd.f32 1e-05, %v672_v29  ;;  %v800_v37 = vmul.f32 %v5265_v5, %v761_v1 }
 0x261   : > { %v705_v19 = vadd.f32 1e-05, %v673_v62  ;;  %v4410_v22 = vpop.eup %4409  ;;  %v640_v45 = vpop.xlane.xlu1 %639  ;;  %4048 = vmatprep.mubr.bf16.mxu0 %v859_v24  ;;  %v838_v28 = vadd.f32 %v5272_v25, %v799_v60  ;;  %v762_v32 = vmul.f32 %v4408_v26, %v5344_v15 }
 0x262   : > { %v642_v18 = vpop.xlane.xlu0 %641  ;;  %4419 = vrsqrt.f32 %v704_v27  ;;  %v674_v39 = vmul.f32 0.0078125, %v640_v45  ;;  %v763_v8 = vmul.f32 %v4410_v22, %v5348_v61  ;;  %v839_v31 = vadd.f32 %v5272_v25, %v800_v37 }
 0x263   : > { %v675_v44 = vmul.f32 0.0078125, %v642_v18  ;;  %4421 = vrsqrt.f32 %v705_v19  ;;  %v860_v47 = vpack.c.bf16 %v838_v28, %v837_v7  ;;  %v801_v34 = vmul.f32 %v5265_v5, %v762_v32 }
 0x264   : > { %v4412_v42 = vpop.eup %4411  ;;  %v706_v48 = vadd.f32 1e-05, %v674_v39  ;;  %v802_v43 = vmul.f32 %v5265_v5, %v763_v8 }
 0x265   : > { %v707_v6 = vadd.f32 1e-05, %v675_v44  ;;  %v4414_v46 = vpop.eup %4413  ;;  %v644_v2 = vpop.xlane.xlu1 %643  ;;  %4049 = vmatmul.mubr.bf16.gmra.mrb[16].mxu0 %v860_v47  ;;  %v840_v15 = vadd.f32 %v5272_v25, %v801_v34  ;;  %v764_v23 = vmul.f32 %v4412_v42, %v5361_v36 }
 0x266   : > { %4423 = vrsqrt.f32 %v706_v48  ;;  %v676_v61 = vmul.f32 0.0078125, %v644_v2  ;;  %v765_v50 = vmul.f32 %v4414_v46, %v5365_v20  ;;  %v841_v10 = vadd.f32 %v5272_v25, %v802_v43 }
 0x267   : > { %4425 = vrsqrt.f32 %v707_v6  ;;  %v861_v3 = vpack.c.bf16 %v840_v15, %v839_v31  ;;  %v803_v30 = vmul.f32 %v5265_v5, %v764_v23 }
 0x268   : > { %v4416_v53 = vpop.eup %4415  ;;  %v708_v4 = vadd.f32 1e-05, %v676_v61  ;;  %v804_v11 = vmul.f32 %v5265_v5, %v765_v50 }
 0x269   : > { %v4418_v9 = vpop.eup %4417  ;;  %4052 = vmatprep.mubr.bf16.mxu0 %v861_v3  ;;  %v842_v56 = vadd.f32 %v5272_v25, %v803_v30  ;;  %v766_v36 = vmul.f32 %v4416_v53, %v5375_v51 }
 0x26a   : > { %4427 = vrsqrt.f32 %v708_v4  ;;  %v767_v12 = vmul.f32 %v4418_v9, %v5379_v35  ;;  %v843_v17 = vadd.f32 %v5272_v25, %v804_v11 }
 0x26b   : > { %v862_v20 = vpack.c.bf16 %v842_v56, %v841_v10  ;;  %v805_v16 = vmul.f32 %v5265_v5, %v766_v36 }
 0x26c   : > { %v4420_v13 = vpop.eup %4419  ;;  %v806_v21 = vmul.f32 %v5265_v5, %v767_v12 }
 0x26d   : > { %v4422_v14 = vpop.eup %4421  ;;  %4053 = vmatmul.mubr.bf16.gmra.mrb[20].mxu0 %v862_v20  ;;  %v844_v59 = vadd.f32 %v5272_v25, %v805_v16  ;;  %v768_v54 = vmul.f32 %v4420_v13, %v5387_v49 }
 0x26e   : > { %v769_v51 = vmul.f32 %v4422_v14, %v5391_v55  ;;  %v845_v0 = vadd.f32 %v5272_v25, %v806_v21 }
 0x26f   : > { %v863_v40 = vpack.c.bf16 %v844_v59, %v843_v17  ;;  %v807_v57 = vmul.f32 %v5265_v5, %v768_v54 }
 0x270   : > { %v4424_v35 = vpop.eup %4423  ;;  %v808_v62 = vmul.f32 %v5265_v5, %v769_v51 }
 0x271   : > { %v4426_v33 = vpop.eup %4425  ;;  %4056 = vmatprep.mubr.bf16.mxu0 %v863_v40  ;;  %v846_v38 = vadd.f32 %v5272_v25, %v807_v57  ;;  %v770_v29 = vmul.f32 %v4424_v35, %v5399_v52 }
 0x272   : > { %v771_v49 = vmul.f32 %v4426_v33, %v5403_v58  ;;  %v847_v1 = vadd.f32 %v5272_v25, %v808_v62 }
 0x273   : > { %v864_v24 = vpack.c.bf16 %v846_v38, %v845_v0  ;;  %v809_v60 = vmul.f32 %v5265_v5, %v770_v29 }
 0x274   : > { %v4428_v55 = vpop.eup %4427  ;;  %v810_v19 = vmul.f32 %v5265_v5, %v771_v49 }
 0x275   : > { %4057 = vmatmul.mubr.bf16.gmra.mrb[24].mxu0 %v864_v24  ;;  %v848_v26 = vadd.f32 %v5272_v25, %v809_v60  ;;  %v772_v27 = vmul.f32 %v4428_v55, %v5411_v41  ;;  %v5472_v41 = vld [vmem:[%s6501_s4] ss:$0 sm:$0xff] }
 0x276   : > { %v849_v45 = vadd.f32 %v5272_v25, %v810_v19 }
 0x277   : > { %v865_v22 = vpack.c.bf16 %v848_v26, %v847_v1  ;;  %v811_v52 = vmul.f32 %v5265_v5, %v772_v27 }
 0x279   : > { %4060 = vmatprep.mubr.bf16.mxu0 %v865_v22  ;;  %v850_v58 = vadd.f32 %v5272_v25, %v811_v52 }
 0x27b   : > { %v866_v18 = vpack.c.bf16 %v850_v58, %v849_v45 }
 0x27d   : > { %4061 = vmatmul.mubr.bf16.gmra.mrb[28].mxu0 %v866_v18 }
 0x27e   : > { %4066 = vmatprep.mubr.msk.bf16.mxu0 %vm4817_vm0, %v4816_v63 }
 0x284   : > { %v4034_v7 = vpop.f32.mrb[0].mxu0 }
 0x285   : > { %v972_v28 = vpop.f32.mrb[1].mxu0  ;;  %v981_v5 = vadd.f32 %v4034_v7, %v5472_v41 }
 0x286   : > { %v4035_v32 = vpop.f32.mrb[2].mxu0  ;;  %v973_v25 = vadd.f32 %v5472_v41, %v972_v28 }
 0x287   : > { %v984_v37 = vadd.f32 %v4035_v32, %v5472_v41  ;;  %v975_v39 = vpop.f32.mrb[3].mxu0 }
 0x288   : > { %v976_v44 = vadd.f32 %v5472_v41, %v975_v39 }
 0x289   : > { %v5478_v8 = vpack.c.bf16 %v984_v37, %v981_v5 }
 0x28a   : > { %v5480_v47 = vpack.c.bf16 %v976_v44, %v973_v25 }
 0x28b   : > { %4071 = vmatpush3.bf16.xpose.msra.mxu1 %v5478_v8 }
 0x28c   : > { %v4038_v34 = vpop.f32.mrb[4].mxu0  ;;  %4065 = vmatpush3.bf16.xpose.msra.mxu0 %v5480_v47  ;;  %4076 = vmatprep.subr.bf16.mxu1 %v4816_v63 }
 0x28d   : > { %v988_v42 = vpop.f32.mrb[5].mxu0  ;;  %4130 = vmatprep.subr.bf16.mxu0 %v4816_v63  ;;  %v997_v6 = vadd.f32 %v4038_v34, %v5472_v41 }
 0x28e   : > { %v4039_v48 = vpop.f32.mrb[6].mxu0  ;;  %v989_v31 = vadd.f32 %v5472_v41, %v988_v42 }
 0x28f   : > { %v1000_v46 = vadd.f32 %v4039_v48, %v5472_v41  ;;  %v991_v2 = vpop.f32.mrb[7].mxu0 }
 0x290   : > { %v992_v15 = vadd.f32 %v5472_v41, %v991_v2 }
 0x291   : > { %v1102_v23 = vpack.c.bf16 %v1000_v46, %v997_v6 }
 0x292   : > { %v5490_v43 = vpack.c.bf16 %v992_v15, %v989_v31  ;;  %4073 = vmatmul.mubr.bf16.vlgmr.msra.gmra.mrb[0].mxu1 %v5478_v8 }
 0x293   : > { %4067 = vmatmul.mubr.bf16.vlgmr.msra.gmra.mrb[32].mxu0 %v5480_v47  ;;  %4078 = vmatprep.mubr.msk.bf16.mxu1 %vm4817_vm0, %v4816_v63 }
 0x294   : > { %v4042_v61 = vpop.f32.mrb[8].mxu0  ;;  %4077 = vmatpush3.bf16.xpose.msra.mxu1 %v5490_v43  ;;  %4131 = vmatpush3.bf16.msra.mxu0 %v1102_v23 }
 0x295   : > { %v1004_v50 = vpop.f32.mrb[9].mxu0  ;;  %4082 = vmatprep.subr.bf16.mxu1 %v4816_v63  ;;  %4132 = vmatprep.mubr.msk.bf16.mxu0 %vm4817_vm0, %v4816_v63  ;;  %v1013_v30 = vadd.f32 %v4042_v61, %v5472_v41 }
 0x296   : > { %v4043_v3 = vpop.f32.mrb[10].mxu0  ;;  %4142 = vmatprep.subr.bf16.mxu0 %v4816_v63  ;;  %v1005_v9 = vadd.f32 %v5472_v41, %v1004_v50 }
 0x297   : > { %v1016_v53 = vadd.f32 %v4043_v3, %v5472_v41  ;;  %v1007_v4 = vpop.f32.mrb[11].mxu0 }
 0x298   : > { %v1008_v10 = vadd.f32 %v5472_v41, %v1007_v4 }
 0x299   : > { %v5505_v56 = vpack.c.bf16 %v1016_v53, %v1013_v30 }
 0x29a   : > { %v5507_v36 = vpack.c.bf16 %v1008_v10, %v1005_v9 }
 0x29b   : > { %4079 = vmatmul.mubr.bf16.vlgmr.msra.gmra.mrb[4].mxu1 %v5490_v43 }
 0x29c   : > { %v4046_v11 = vpop.f32.mrb[12].mxu0  ;;  %4083 = vmatpush3.bf16.xpose.msra.mxu1 %v1102_v23  ;;  %4084 = vmatprep.mubr.msk.bf16.mxu1 %vm4817_vm0, %v4816_v63 }
 0x29d   : > { %v1020_v12 = vpop.f32.mrb[13].mxu0  ;;  %4088 = vmatprep.subr.bf16.mxu1 %v4816_v63  ;;  %v1029_v16 = vadd.f32 %v4046_v11, %v5472_v41 }
 0x29e   : > { %v4047_v20 = vpop.f32.mrb[14].mxu0  ;;  %v1021_v17 = vadd.f32 %v5472_v41, %v1020_v12 }
 0x29f   : > { %v1032_v13 = vadd.f32 %v4047_v20, %v5472_v41  ;;  %v1023_v14 = vpop.f32.mrb[15].mxu0 }
 0x2a0   : > { %v1024_v59 = vadd.f32 %v5472_v41, %v1023_v14 }
 0x2a1   : > { %v5517_v54 = vpack.c.bf16 %v1032_v13, %v1029_v16 }
 0x2a2   : > { %v5519_v21 = vpack.c.bf16 %v1024_v59, %v1021_v17 }
 0x2a3   : > { %4085 = vmatmul.mubr.bf16.vlgmr.msra.gmra.mrb[8].mxu1 %v1102_v23 }
 0x2a4   : > { %4089 = vmatpush3.bf16.xpose.msra.mxu1 %v5507_v36  ;;  %4090 = vmatprep.mubr.msk.bf16.mxu1 %vm4817_vm0, %v4816_v63 }
 0x2a5   : > { %4094 = vmatprep.subr.bf16.mxu1 %v4816_v63 }
 0x2ab   : > { %4091 = vmatmul.mubr.bf16.vlgmr.msra.gmra.mrb[12].mxu1 %v5507_v36 }
 0x2ac   : > { %4095 = vmatpush3.bf16.xpose.msra.mxu1 %v5505_v56  ;;  %4096 = vmatprep.mubr.msk.bf16.mxu1 %vm4817_vm0, %v4816_v63 }
 0x2ad   : > { %4100 = vmatprep.subr.bf16.mxu1 %v4816_v63 }
 0x2b3   : > { %4097 = vmatmul.mubr.bf16.vlgmr.msra.gmra.mrb[16].mxu1 %v5505_v56 }
 0x2b4   : > { %4101 = vmatpush3.bf16.xpose.msra.mxu1 %v5519_v21  ;;  %4102 = vmatprep.mubr.msk.bf16.mxu1 %vm4817_vm0, %v4816_v63 }
 0x2b5   : > { %4106 = vmatprep.subr.bf16.mxu1 %v4816_v63 }
 0x2bb   : > { %4103 = vmatmul.mubr.bf16.vlgmr.msra.gmra.mrb[20].mxu1 %v5519_v21 }
 0x2bc   : > { %4107 = vmatpush3.bf16.xpose.msra.mxu1 %v5517_v54  ;;  %4108 = vmatprep.mubr.msk.bf16.mxu1 %vm4817_vm0, %v4816_v63 }
 0x2bd   : > { %4112 = vmatprep.subr.bf16.mxu1 %v4816_v63 }
 0x2c3   : > { %4109 = vmatmul.mubr.bf16.vlgmr.msra.gmra.mrb[24].mxu1 %v5517_v54 }
 0x2c4   : > { %4113 = vmatpush3.bf16.msra.mxu1 %v5480_v47  ;;  %4114 = vmatprep.mubr.msk.bf16.mxu1 %vm4817_vm0, %v4816_v63 }
 0x2c5   : > { %4118 = vmatprep.subr.bf16.mxu1 %v4816_v63 }
 0x338   : > { %v4050_v51 = vpop.f32.mrb[16].mxu0 }
 0x339   : > { %v1036_v40 = vpop.f32.mrb[17].mxu0  ;;  %v1045_v35 = vadd.f32 %v4050_v51, %v5472_v41 }
 0x33a   : > { %v4051_v57 = vpop.f32.mrb[18].mxu0  ;;  %v1037_v38 = vadd.f32 %v5472_v41, %v1036_v40 }
 0x33b   : > { %v1048_v33 = vadd.f32 %v4051_v57, %v5472_v41  ;;  %v1039_v0 = vpop.f32.mrb[19].mxu0 }
 0x33c   : > { %v1040_v29 = vadd.f32 %v5472_v41, %v1039_v0 }
 0x33d   : > { %v5549_v62 = vpack.c.bf16 %v1048_v33, %v1045_v35 }
 0x33e   : > { %v5551_v49 = vpack.c.bf16 %v1040_v29, %v1037_v38 }
 0x340   : > { %v4054_v24 = vpop.f32.mrb[20].mxu0 }
 0x341   : > { %v1052_v60 = vpop.f32.mrb[21].mxu0  ;;  %v1061_v1 = vadd.f32 %v4054_v24, %v5472_v41 }
 0x342   : > { %v4055_v55 = vpop.f32.mrb[22].mxu0  ;;  %v1053_v19 = vadd.f32 %v5472_v41, %v1052_v60 }
 0x343   : > { %v1064_v26 = vadd.f32 %v4055_v55, %v5472_v41  ;;  %v1055_v27 = vpop.f32.mrb[23].mxu0 }
 0x344   : > { %v1056_v22 = vadd.f32 %v5472_v41, %v1055_v27 }
 0x345   : > { %v5557_v52 = vpack.c.bf16 %v1064_v26, %v1061_v1 }
 0x346   : > { %v5559_v45 = vpack.c.bf16 %v1056_v22, %v1053_v19 }
 0x348   : > { %v4058_v58 = vpop.f32.mrb[24].mxu0 }
 0x349   : > { %v1068_v18 = vpop.f32.mrb[25].mxu0  ;;  %v1077_v28 = vadd.f32 %v4058_v58, %v5472_v41 }
 0x34a   : > { %v4059_v7 = vpop.f32.mrb[26].mxu0  ;;  %v1069_v37 = vadd.f32 %v5472_v41, %v1068_v18 }
 0x34b   : > { %v1080_v32 = vadd.f32 %v4059_v7, %v5472_v41  ;;  %v1071_v5 = vpop.f32.mrb[27].mxu0 }
 0x34c   : > { %v1072_v39 = vadd.f32 %v5472_v41, %v1071_v5 }
 0x34d   : > { %v5565_v25 = vpack.c.bf16 %v1080_v32, %v1077_v28 }
 0x34e   : > { %v5567_v44 = vpack.c.bf16 %v1072_v39, %v1069_v37 }
 0x350   : > { %v4062_v47 = vpop.f32.mrb[28].mxu0 }
 0x351   : > { %v1084_v34 = vpop.f32.mrb[29].mxu0  ;;  %v1093_v48 = vadd.f32 %v4062_v47, %v5472_v41 }
 0x352   : > { %v4063_v42 = vpop.f32.mrb[30].mxu0  ;;  %v1085_v2 = vadd.f32 %v5472_v41, %v1084_v34 }
 0x353   : > { %v1096_v6 = vadd.f32 %v4063_v42, %v5472_v41  ;;  %v1087_v46 = vpop.f32.mrb[31].mxu0 }
 0x354   : > { %v1088_v31 = vadd.f32 %v5472_v41, %v1087_v46 }
 0x355   : > { %v5573_v15 = vpack.c.bf16 %v1096_v6, %v1093_v48 }
 0x356   : > { %v5575_v23 = vpack.c.bf16 %v1088_v31, %v1085_v2 }
 0x365   : > { %v1214_v61 = vpop.f32.mrb[0].mxu1 }
 0x366   : > { %v1173_v50 = vpop.f32.mrb[32].mxu0  ;;  %v4074_v3 = vpop.f32.mrb[1].mxu1  ;;  %v5579_v11 = vmul.f32 0.088388346, %v1214_v61 }
 0x367   : > { %v5577_v30 = vmul.f32 0.088388346, %v1173_v50  ;;  %v4068_v53 = vpop.f32.mrb[33].mxu0  ;;  %v1217_v4 = vpop.f32.mrb[2].mxu1 }
 0x368   : > { %v1176_v9 = vpop.f32.mrb[34].mxu0  ;;  %v4075_v10 = vpop.f32.mrb[3].mxu1  ;;  %v5585_v16 = vmul.f32 0.088388346, %v1217_v4  ;;  %v1490_v14 = vsel %vm1483_vm1, %v5579_v11, -inf }
 0x369   : > { %v5581_v12 = vmul.f32 0.088388346, %v1176_v9  ;;  %v4069_v20 = vpop.f32.mrb[35].mxu0  ;;  %v1484_v41 = vsel %vm1483_vm1, %v5577_v30, -inf }
 0x36a   : > { %1485 = vmax.xlane.f32.xlu0 %v1484_v41  ;;  %v1493_v40 = vsel %vm1483_vm1, %v5585_v16, -inf }
 0x36b   : > { %v1487_v13 = vsel %vm1483_vm1, %v5581_v12, -inf }
 0x36c   : > { %1488 = vmax.xlane.f32.xlu1 %v1487_v13 }
 0x36e   : > { %v1255_v17 = vpop.f32.mrb[4].mxu1  ;;  %1491 = vmax.xlane.f32.xlu0 %v1490_v14 }
 0x36f   : > { %v5591_v59 = vmul.f32 0.088388346, %v1255_v17  ;;  %v4080_v51 = vpop.f32.mrb[5].mxu1 }
 0x370   : > { %v1258_v57 = vpop.f32.mrb[6].mxu1  ;;  %1494 = vmax.xlane.f32.xlu1 %v1493_v40 }
 0x371   : > { %v5595_v35 = vmul.f32 0.088388346, %v1258_v57  ;;  %v4081_v33 = vpop.f32.mrb[7].mxu1  ;;  %v1496_v0 = vsel %vm1483_vm1, %v5591_v59, -inf }
 0x372   : > { %1497 = vmax.xlane.f32.xlu0 %v1496_v0 }
 0x373   : > { %v1499_v38 = vsel %vm1483_vm1, %v5595_v35, -inf }
 0x374   : > { %1500 = vmax.xlane.f32.xlu1 %v1499_v38 }
 0x376   : > { %v1296_v29 = vpop.f32.mrb[8].mxu1 }
 0x377   : > { %v5601_v24 = vmul.f32 0.088388346, %v1296_v29  ;;  %v4086_v60 = vpop.f32.mrb[9].mxu1 }
 0x378   : > { %v1299_v55 = vpop.f32.mrb[10].mxu1 }
 0x379   : > { %v5603_v1 = vmul.f32 0.088388346, %v1299_v55  ;;  %v4087_v26 = vpop.f32.mrb[11].mxu1  ;;  %v1502_v27 = vsel %vm1483_vm1, %v5601_v24, -inf }
 0x37a   : > { %1503 = vmax.xlane.f32.xlu0 %v1502_v27 }
 0x37b   : > { %v1505_v19 = vsel %vm1483_vm1, %v5603_v1, -inf }
 0x37c   : > { %1506 = vmax.xlane.f32.xlu1 %v1505_v19 }
 0x37e   : > { %v1337_v22 = vpop.f32.mrb[12].mxu1 }
 0x37f   : > { %v5609_v58 = vmul.f32 0.088388346, %v1337_v22  ;;  %v4092_v18 = vpop.f32.mrb[13].mxu1 }
 0x380   : > { %v1340_v7 = vpop.f32.mrb[14].mxu1 }
 0x381   : > { %v5611_v28 = vmul.f32 0.088388346, %v1340_v7  ;;  %v4093_v32 = vpop.f32.mrb[15].mxu1  ;;  %v1508_v5 = vsel %vm1483_vm1, %v5609_v58, -inf }
 0x382   : > { %1509 = vmax.xlane.f32.xlu0 %v1508_v5 }
 0x383   : > { %v1511_v37 = vsel %vm1483_vm1, %v5611_v28, -inf }
 0x384   : > { %1512 = vmax.xlane.f32.xlu1 %v1511_v37 }
 0x386   : > { %v1378_v39 = vpop.f32.mrb[16].mxu1 }
 0x387   : > { %v5617_v47 = vmul.f32 0.088388346, %v1378_v39  ;;  %v4098_v34 = vpop.f32.mrb[17].mxu1 }
 0x388   : > { %v1381_v42 = vpop.f32.mrb[18].mxu1 }
 0x389   : > { %v5619_v48 = vmul.f32 0.088388346, %v1381_v42  ;;  %v4099_v6 = vpop.f32.mrb[19].mxu1  ;;  %v1514_v46 = vsel %vm1483_vm1, %v5617_v47, -inf }
 0x38a   : > { %1515 = vmax.xlane.f32.xlu0 %v1514_v46 }
 0x38b   : > { %v1517_v2 = vsel %vm1483_vm1, %v5619_v48, -inf }
 0x38c   : > { %1518 = vmax.xlane.f32.xlu1 %v1517_v2 }
 0x38e   : > { %v1419_v31 = vpop.f32.mrb[20].mxu1 }
 0x38f   : > { %v5625_v61 = vmul.f32 0.088388346, %v1419_v31  ;;  %v4104_v50 = vpop.f32.mrb[21].mxu1 }
 0x390   : > { %v1422_v3 = vpop.f32.mrb[22].mxu1 }
 0x391   : > { %v5627_v53 = vmul.f32 0.088388346, %v1422_v3  ;;  %v4105_v4 = vpop.f32.mrb[23].mxu1  ;;  %v1520_v9 = vsel %vm1483_vm1, %v5625_v61, -inf }
 0x392   : > { %1521 = vmax.xlane.f32.xlu0 %v1520_v9 }
 0x393   : > { %v1523_v10 = vsel %vm1483_vm1, %v5627_v53, -inf }
 0x394   : > { %1524 = vmax.xlane.f32.xlu1 %v1523_v10 }
 0x396   : > { %v1460_v20 = vpop.f32.mrb[24].mxu1 }
 0x397   : > { %v5633_v41 = vmul.f32 0.088388346, %v1460_v20  ;;  %v4110_v13 = vpop.f32.mrb[25].mxu1 }
 0x398   : > { %v1463_v14 = vpop.f32.mrb[26].mxu1 }
 0x399   : > { %v5635_v17 = vmul.f32 0.088388346, %v1463_v14  ;;  %v4111_v51 = vpop.f32.mrb[27].mxu1  ;;  %v1526_v40 = vsel %vm1483_vm1, %v5633_v41, -inf }
 0x39a   : > { %1527 = vmax.xlane.f32.xlu0 %v1526_v40 }
 0x39b   : > { %v1529_v57 = vsel %vm1483_vm1, %v5635_v17, -inf }
 0x39c   : > { %1530 = vmax.xlane.f32.xlu1 %v1529_v57 }
 0x3f7   : > { %v1486_v33 = vpop.xlane.xlu0 %1485 }
 0x3f8   : > { %v1532_v0 = vsub.f32 %v5577_v30, %v1486_v33 }
 0x3f9   : > { %v1489_v38 = vpop.xlane.xlu1 %1488 }
 0x3fa   : > { %v1548_v29 = vmul.f32 1.442695, %v1532_v0  ;;  %v1533_v60 = vsub.f32 %v5581_v12, %v1489_v38 }
 0x3fb   : > { %v1492_v55 = vpop.xlane.xlu0 %1491 }
 0x3fc   : > { %v1550_v26 = vmul.f32 1.442695, %v1533_v60  ;;  %4429 = vpow2.f32 %v1548_v29  ;;  %v1534_v19 = vsub.f32 %v5579_v11, %v1492_v55 }
 0x3fd   : > { %v1495_v27 = vpop.xlane.xlu1 %1494 }
 0x3fe   : > { %4431 = vpow2.f32 %v1550_v26  ;;  %v1535_v22 = vsub.f32 %v5585_v16, %v1495_v27  ;;  %v1552_v5 = vmul.f32 1.442695, %v1534_v19 }
 0x3ff   : > { %v1498_v7 = vpop.xlane.xlu0 %1497 }
 0x400   : > { %v1554_v18 = vmul.f32 1.442695, %v1535_v22  ;;  %v1536_v37 = vsub.f32 %v5591_v59, %v1498_v7 }
 0x401   : > { %v1501_v32 = vpop.xlane.xlu1 %1500 }
 0x402   : > { %4433 = vpow2.f32 %v1554_v18  ;;  %v1537_v30 = vsub.f32 %v5595_v35, %v1501_v32  ;;  %v1556_v39 = vmul.f32 1.442695, %v1536_v37 }
 0x403   : > { %4435 = vpow2.f32 %v1552_v5 }
 0x404   : > { %v1558_v6 = vmul.f32 1.442695, %v1537_v30  ;;  %4437 = vpow2.f32 %v1556_v39 }
 0x406   : > { %v5647_v12 = vpop.eup %4429  ;;  %4439 = vpow2.f32 %v1558_v6 }
 0x407   : > { %v1504_v34 = vpop.xlane.xlu0 %1503 }
 0x408   : > { %v5649_v42 = vpop.eup %4431  ;;  %v1538_v11 = vsub.f32 %v5601_v24, %v1504_v34 }
 0x409   : > { %v1507_v16 = vpop.xlane.xlu1 %1506  ;;  %v1644_v46 = vpack.c.bf16 %v5649_v42, %v5647_v12 }
 0x40a   : > { %v1560_v2 = vmul.f32 1.442695, %v1538_v11  ;;  %v1539_v59 = vsub.f32 %v5603_v1, %v1507_v16 }
 0x40b   : > { %4115 = vmatmul.mubr.msk.bf16.vlgmr.msra.gmra.mrb[28].mxu1 %vm1483_vm1, %v1644_v46 }
 0x40c   : > { %v1562_v35 = vmul.f32 1.442695, %v1539_v59  ;;  %4119 = vmatpush3.bf16.msra.mxu1 %v5478_v8  ;;  %4120 = vmatprep.mubr.msk.bf16.mxu1 %vm4817_vm0, %v4816_v63  ;;  %4441 = vpow2.f32 %v1560_v2  ;;  %v5660_v24 = vpop.eup %4433 }
 0x40d   : > { %4124 = vmatprep.subr.bf16.mxu1 %v4816_v63  ;;  %v5662_v50 = vpop.eup %4435 }
 0x40e   : > { %4443 = vpow2.f32 %v1562_v35  ;;  %v1645_v4 = vpack.c.bf16 %v5660_v24, %v5662_v50  ;;  %v5672_v20 = vpop.eup %4437 }
 0x40f   : > { %v1510_v31 = vpop.xlane.xlu0 %1509 }
 0x410   : > { %v1540_v1 = vsub.f32 %v5609_v58, %v1510_v31  ;;  %v5675_v58 = vpop.eup %4439 }
 0x411   : > { %v1513_v3 = vpop.xlane.xlu1 %1512 }
 0x412   : > { %v1564_v9 = vmul.f32 1.442695, %v1540_v1  ;;  %v1541_v8 = vsub.f32 %v5611_v28, %v1513_v3 }
 0x413   : > { %4121 = vmatmul.mubr.msk.bf16.vlgmr.msra.gmra.mrb[32].mxu1 %vm1483_vm1, %v1645_v4 }
 0x414   : > { %v1566_v10 = vmul.f32 1.442695, %v1541_v8  ;;  %4125 = vmatpush3.bf16.msra.mxu1 %v5490_v43  ;;  %4126 = vmatprep.mubr.msk.bf16.mxu1 %vm4817_vm0, %v4816_v63  ;;  %4445 = vpow2.f32 %v1564_v9  ;;  %v1646_v43 = vpack.c.bf16 %v5675_v58, %v5672_v20 }
 0x415   : > { %4136 = vmatprep.subr.bf16.mxu1 %v4816_v63 }
 0x416   : > { %4447 = vpow2.f32 %v1566_v10  ;;  %v5677_v13 = vpop.eup %4441 }
 0x417   : > { %v1516_v14 = vpop.xlane.xlu0 %1515 }
 0x418   : > { %v5679_v28 = vpop.eup %4443  ;;  %v1542_v51 = vsub.f32 %v5617_v47, %v1516_v14 }
 0x419   : > { %v1519_v40 = vpop.xlane.xlu1 %1518  ;;  %v1647_v57 = vpack.c.bf16 %v5679_v28, %v5677_v13 }
 0x41a   : > { %v1568_v33 = vmul.f32 1.442695, %v1542_v51  ;;  %v1543_v0 = vsub.f32 %v5619_v48, %v1519_v40 }
 0x41b   : > { %4127 = vmatmul.mubr.msk.bf16.vlgmr.msra.gmra.mrb[36].mxu1 %vm1483_vm1, %v1646_v43  ;;  %4133 = vmatmul.mubr.msk.bf16.vlgmr.msra.gmra.mrb[36].mxu0 %vm1483_vm1, %v1647_v57 }
 0x41c   : > { %v1570_v38 = vmul.f32 1.442695, %v1543_v0  ;;  %4137 = vmatpush3.bf16.msra.mxu1 %v5507_v36  ;;  %4143 = vmatpush3.bf16.msra.mxu0 %v5505_v56  ;;  %4449 = vpow2.f32 %v1568_v33 }
 0x41d   : > { %4138 = vmatprep.mubr.msk.bf16.mxu1 %vm4817_vm0, %v4816_v63  ;;  %4148 = vmatprep.subr.bf16.mxu1 %v4816_v63 }
 0x41e   : > { %4451 = vpow2.f32 %v1570_v38  ;;  %4144 = vmatprep.mubr.msk.bf16.mxu0 %vm4817_vm0, %v4816_v63  ;;  %4154 = vmatprep.subr.bf16.mxu0 %v4816_v63  ;;  %v5697_v47 = vpop.eup %4445 }
 0x41f   : > { %v1522_v48 = vpop.xlane.xlu0 %1521 }
 0x420   : > { %v5699_v29 = vpop.eup %4447  ;;  %v1544_v36 = vsub.f32 %v5625_v61, %v1522_v48 }
 0x421   : > { %v1525_v56 = vpop.xlane.xlu1 %1524  ;;  %v1648_v60 = vpack.c.bf16 %v5699_v29, %v5697_v47 }
 0x422   : > { %v1572_v55 = vmul.f32 1.442695, %v1544_v36  ;;  %v1545_v26 = vsub.f32 %v5627_v53, %v1525_v56 }
 0x423   : > { %4139 = vmatmul.mubr.msk.bf16.vlgmr.msra.gmra.mrb[40].mxu1 %vm1483_vm1, %v1648_v60 }
 0x424   : > { %v1574_v27 = vmul.f32 1.442695, %v1545_v26  ;;  %4149 = vmatpush3.bf16.msra.mxu1 %v5519_v21  ;;  %4150 = vmatprep.mubr.msk.bf16.mxu1 %vm4817_vm0, %v4816_v63  ;;  %4453 = vpow2.f32 %v1572_v55 }
 0x425   : > { %4160 = vmatprep.subr.bf16.mxu1 %v4816_v63 }
 0x426   : > { %4455 = vpow2.f32 %v1574_v27  ;;  %v5710_v61 = vpop.eup %4449 }
 0x427   : > { %v1528_v19 = vpop.xlane.xlu0 %1527 }
 0x428   : > { %v5712_v22 = vpop.eup %4451  ;;  %v1546_v18 = vsub.f32 %v5633_v41, %v1528_v19 }
 0x429   : > { %v1531_v53 = vpop.xlane.xlu1 %1530  ;;  %v1649_v7 = vpack.c.bf16 %v5712_v22, %v5710_v61 }
 0x42a   : > { %v1576_v32 = vmul.f32 1.442695, %v1546_v18  ;;  %v1547_v21 = vsub.f32 %v5635_v17, %v1531_v53 }
 0x42b   : > { %4145 = vmatmul.mubr.msk.bf16.vlgmr.msra.gmra.mrb[40].mxu0 %vm1483_vm1, %v1649_v7 }
 0x42c   : > { %v1578_v5 = vmul.f32 1.442695, %v1547_v21  ;;  %4155 = vmatpush3.bf16.msra.mxu0 %v5517_v54  ;;  %4156 = vmatprep.mubr.msk.bf16.mxu0 %vm4817_vm0, %v4816_v63  ;;  %4457 = vpow2.f32 %v1576_v32 }
 0x42d   : > { %4166 = vmatprep.subr.bf16.mxu0 %v4816_v63 }
 0x42e   : > { %4459 = vpow2.f32 %v1578_v5  ;;  %v5723_v41 = vpop.eup %4453 }
 0x430   : > { %v5725_v37 = vpop.eup %4455 }
 0x431   : > { %v1650_v30 = vpack.c.bf16 %v5725_v37, %v5723_v41 }
 0x433   : > { %4151 = vmatmul.mubr.msk.bf16.vlgmr.msra.gmra.mrb[44].mxu1 %vm1483_vm1, %v1650_v30 }
 0x434   : > { %4161 = vmatpush3.bf16.xpose.msra.mxu1 %v5551_v49  ;;  %4162 = vmatprep.mubr.msk.bf16.mxu1 %vm4817_vm0, %v4816_v63 }
 0x435   : > { %4172 = vmatprep.subr.bf16.mxu1 %v4816_v63 }
 0x436   : > { %v5734_v54 = vpop.eup %4457 }
 0x438   : > { %v5736_v17 = vpop.eup %4459 }
 0x439   : > { %v1651_v39 = vpack.c.bf16 %v5736_v17, %v5734_v54 }
 0x43b   : > { %4157 = vmatmul.mubr.msk.bf16.vlgmr.msra.gmra.mrb[44].mxu0 %vm1483_vm1, %v1651_v39  ;;  %4163 = vmatmul.mubr.bf16.vlgmr.msra.gmra.mrb[48].mxu1 %v5551_v49 }
 0x43c   : > { %4167 = vmatpush3.bf16.xpose.msra.mxu0 %v5549_v62  ;;  %4173 = vmatpush3.bf16.xpose.msra.mxu1 %v5559_v45 }
 0x43d   : > { %4168 = vmatprep.mubr.msk.bf16.mxu0 %vm4817_vm0, %v4816_v63  ;;  %4174 = vmatprep.mubr.msk.bf16.mxu1 %vm4817_vm0, %v4816_v63 }
 0x43e   : > { %4178 = vmatprep.subr.bf16.mxu0 %v4816_v63  ;;  %4184 = vmatprep.subr.bf16.mxu1 %v4816_v63 }
 0x443   : > { %4169 = vmatmul.mubr.bf16.vlgmr.msra.gmra.mrb[48].mxu0 %v5549_v62  ;;  %4175 = vmatmul.mubr.bf16.vlgmr.msra.gmra.mrb[52].mxu1 %v5559_v45 }
 0x444   : > { %4179 = vmatpush3.bf16.xpose.msra.mxu0 %v5557_v52  ;;  %4185 = vmatpush3.bf16.xpose.msra.mxu1 %v5567_v44 }
 0x445   : > { %4180 = vmatprep.mubr.msk.bf16.mxu0 %vm4817_vm0, %v4816_v63  ;;  %4186 = vmatprep.mubr.msk.bf16.mxu1 %vm4817_vm0, %v4816_v63 }
 0x446   : > { %4190 = vmatprep.subr.bf16.mxu0 %v4816_v63  ;;  %4196 = vmatprep.subr.bf16.mxu1 %v4816_v63 }
 0x44b   : > { %4181 = vmatmul.mubr.bf16.vlgmr.msra.gmra.mrb[52].mxu0 %v5557_v52  ;;  %4187 = vmatmul.mubr.bf16.vlgmr.msra.gmra.mrb[56].mxu1 %v5567_v44 }
 0x44c   : > { %4191 = vmatpush3.bf16.xpose.msra.mxu0 %v5565_v25  ;;  %4197 = vmatpush3.bf16.xpose.msra.mxu1 %v5575_v23 }
 0x44d   : > { %4192 = vmatprep.mubr.msk.bf16.mxu0 %vm4817_vm0, %v4816_v63  ;;  %4198 = vmatprep.mubr.msk.bf16.mxu1 %vm4817_vm0, %v4816_v63 }
 0x44e   : > { %4202 = vmatprep.subr.bf16.mxu0 %v4816_v63  ;;  %4208 = vmatprep.subr.bf16.mxu1 %v4816_v63 }
 0x453   : > { %4193 = vmatmul.mubr.bf16.vlgmr.msra.gmra.mrb[56].mxu0 %v5565_v25  ;;  %4199 = vmatmul.mubr.bf16.vlgmr.msra.gmra.mrb[60].mxu1 %v5575_v23 }
 0x454   : > { %4203 = vmatpush3.bf16.xpose.msra.mxu0 %v5573_v15  ;;  %4209 = vmatpush3.bf16.msra.mxu1 %v5551_v49 }
 0x455   : > { %4204 = vmatprep.mubr.msk.bf16.mxu0 %vm4817_vm0, %v4816_v63  ;;  %4214 = vmatprep.subr.bf16.mxu0 %v4816_v63 }
 0x456   : > { %4210 = vmatprep.mubr.msk.bf16.mxu1 %vm4817_vm0, %v4816_v63  ;;  %4220 = vmatprep.subr.bf16.mxu1 %v4816_v63 }
 0x45b   : > { %4205 = vmatmul.mubr.bf16.vlgmr.msra.gmra.mrb[60].mxu0 %v5573_v15 }
 0x45c   : > { %4215 = vmatpush3.bf16.msra.mxu0 %v5549_v62  ;;  %4216 = vmatprep.mubr.msk.bf16.mxu0 %vm4817_vm0, %v4816_v63 }
 0x45d   : > { %4226 = vmatprep.subr.bf16.mxu0 %v4816_v63 }
 0x4de   : > { %v5785_v49 = vpop.f32.mrb[28].mxu1 }
 0x4df   : > { %v4116_v34 = vpop.f32.mrb[29].mxu1 }
 0x4e0   : > { %v5787_v6 = vpop.f32.mrb[30].mxu1 }
 0x4e1   : > { %v4117_v11 = vpop.f32.mrb[31].mxu1 }
 0x4e6   : > { %v5789_v16 = vpop.f32.mrb[32].mxu1 }
 0x4e7   : > { %v4122_v46 = vpop.f32.mrb[33].mxu1 }
 0x4e8   : > { %v5791_v2 = vpop.f32.mrb[34].mxu1 }
 0x4e9   : > { %v4123_v59 = vpop.f32.mrb[35].mxu1 }
 0x4ee   : > { %v5793_v35 = vpop.f32.mrb[36].mxu1  ;;  %v5795_v62 = vpop.f32.mrb[36].mxu0 }
 0x4ef   : > { %v4128_v31 = vpop.f32.mrb[37].mxu1  ;;  %v4134_v1 = vpop.f32.mrb[37].mxu0 }
 0x4f0   : > { %v5797_v3 = vpop.f32.mrb[38].mxu1  ;;  %v5799_v4 = vpop.f32.mrb[38].mxu0 }
 0x4f1   : > { %v4129_v9 = vpop.f32.mrb[39].mxu1  ;;  %v4135_v8 = vpop.f32.mrb[39].mxu0 }
 0x4f6   : > { %v5801_v10 = vpop.f32.mrb[40].mxu1 }
 0x4f7   : > { %v4140_v14 = vpop.f32.mrb[41].mxu1 }
 0x4f8   : > { %v5803_v51 = vpop.f32.mrb[42].mxu1 }
 0x4f9   : > { %v4141_v40 = vpop.f32.mrb[43].mxu1 }
 0x4fe   : > { %v5805_v43 = vpop.f32.mrb[40].mxu0 }
 0x4ff   : > { %v4146_v57 = vpop.f32.mrb[41].mxu0 }
 0x500   : > { %v5807_v33 = vpop.f32.mrb[42].mxu0 }
 0x501   : > { %v4147_v0 = vpop.f32.mrb[43].mxu0 }
 0x506   : > { %v5809_v38 = vpop.f32.mrb[44].mxu1 }
 0x507   : > { %v4152_v48 = vpop.f32.mrb[45].mxu1 }
 0x508   : > { %v5811_v36 = vpop.f32.mrb[46].mxu1 }
 0x509   : > { %v4153_v56 = vpop.f32.mrb[47].mxu1 }
 0x50e   : > { %v5813_v60 = vpop.f32.mrb[44].mxu0  ;;  %v2390_v55 = vpop.f32.mrb[48].mxu1 }
 0x50f   : > { %v5815_v26 = vmul.f32 0.088388346, %v2390_v55  ;;  %v4158_v27 = vpop.f32.mrb[45].mxu0  ;;  %v4164_v19 = vpop.f32.mrb[49].mxu1 }
 0x510   : > { %v5817_v18 = vpop.f32.mrb[46].mxu0  ;;  %v2393_v53 = vpop.f32.mrb[50].mxu1 }
 0x511   : > { %v5819_v7 = vmul.f32 0.088388346, %v2393_v53  ;;  %v4159_v32 = vpop.f32.mrb[47].mxu0  ;;  %v4165_v21 = vpop.f32.mrb[51].mxu1  ;;  %v2700_v5 = vsel %vm1483_vm1, %v5815_v26, -inf }
 0x512   : > { %2701 = vmax.xlane.f32.xlu0 %v2700_v5 }
 0x513   : > { %v2703_v30 = vsel %vm1483_vm1, %v5819_v7, -inf }
 0x514   : > { %2704 = vmax.xlane.f32.xlu1 %v2703_v30 }
 0x516   : > { %v2431_v39 = vpop.f32.mrb[48].mxu0  ;;  %v2472_v34 = vpop.f32.mrb[52].mxu1 }
 0x517   : > { %v5825_v11 = vmul.f32 0.088388346, %v2431_v39  ;;  %v4170_v46 = vpop.f32.mrb[49].mxu0  ;;  %v4176_v59 = vpop.f32.mrb[53].mxu1  ;;  %v5829_v40 = vmul.f32 0.088388346, %v2472_v34 }
 0x518   : > { %v2434_v31 = vpop.f32.mrb[50].mxu0  ;;  %v2475_v1 = vpop.f32.mrb[54].mxu1 }
 0x519   : > { %v5827_v9 = vmul.f32 0.088388346, %v2434_v31  ;;  %v4171_v8 = vpop.f32.mrb[51].mxu0  ;;  %v4177_v14 = vpop.f32.mrb[55].mxu1  ;;  %v2706_v57 = vsel %vm1483_vm1, %v5825_v11, -inf  ;;  %v2712_v55 = vsel %vm1483_vm1, %v5829_v40, -inf }
 0x51a   : > { %v5833_v0 = vmul.f32 0.088388346, %v2475_v1  ;;  %2707 = vmax.xlane.f32.xlu0 %v2706_v57 }
 0x51b   : > { %v2709_v48 = vsel %vm1483_vm1, %v5827_v9, -inf }
 0x51c   : > { %2710 = vmax.xlane.f32.xlu1 %v2709_v48  ;;  %v2715_v21 = vsel %vm1483_vm1, %v5833_v0, -inf }
 0x51e   : > { %v2554_v56 = vpop.f32.mrb[56].mxu1  ;;  %v2513_v27 = vpop.f32.mrb[52].mxu0  ;;  %2713 = vmax.xlane.f32.xlu0 %v2712_v55 }
 0x51f   : > { %v5839_v19 = vmul.f32 0.088388346, %v2513_v27  ;;  %v4182_v53 = vpop.f32.mrb[53].mxu0  ;;  %v4188_v32 = vpop.f32.mrb[57].mxu1  ;;  %v5845_v59 = vmul.f32 0.088388346, %v2554_v56 }
 0x520   : > { %v2557_v5 = vpop.f32.mrb[58].mxu1  ;;  %2716 = vmax.xlane.f32.xlu1 %v2715_v21  ;;  %v2516_v30 = vpop.f32.mrb[54].mxu0 }
 0x521   : > { %v5843_v39 = vmul.f32 0.088388346, %v2516_v30  ;;  %v4183_v34 = vpop.f32.mrb[55].mxu0  ;;  %v4189_v46 = vpop.f32.mrb[59].mxu1  ;;  %v2718_v31 = vsel %vm1483_vm1, %v5839_v19, -inf  ;;  %v2724_v14 = vsel %vm1483_vm1, %v5845_v59, -inf }
 0x522   : > { %v5849_v1 = vmul.f32 0.088388346, %v2557_v5  ;;  %2719 = vmax.xlane.f32.xlu0 %v2718_v31 }
 0x523   : > { %v2721_v8 = vsel %vm1483_vm1, %v5843_v39, -inf }
 0x524   : > { %2722 = vmax.xlane.f32.xlu1 %v2721_v8  ;;  %v2727_v53 = vsel %vm1483_vm1, %v5849_v1, -inf }
 0x526   : > { %v2595_v57 = vpop.f32.mrb[56].mxu0  ;;  %v2636_v48 = vpop.f32.mrb[60].mxu1  ;;  %2725 = vmax.xlane.f32.xlu0 %v2724_v14 }
 0x527   : > { %v5855_v55 = vmul.f32 0.088388346, %v2595_v57  ;;  %v4194_v56 = vpop.f32.mrb[57].mxu0  ;;  %v4200_v27 = vpop.f32.mrb[61].mxu1  ;;  %v5861_v46 = vmul.f32 0.088388346, %v2636_v48 }
 0x528   : > { %2728 = vmax.xlane.f32.xlu1 %v2727_v53  ;;  %v2598_v32 = vpop.f32.mrb[58].mxu0  ;;  %v2639_v21 = vpop.f32.mrb[62].mxu1 }
 0x529   : > { %v5859_v5 = vmul.f32 0.088388346, %v2598_v32  ;;  %v4195_v30 = vpop.f32.mrb[59].mxu0  ;;  %v4201_v34 = vpop.f32.mrb[63].mxu1  ;;  %v2730_v31 = vsel %vm1483_vm1, %v5855_v55, -inf  ;;  %v2736_v56 = vsel %vm1483_vm1, %v5861_v46, -inf }
 0x52a   : > { %v5865_v8 = vmul.f32 0.088388346, %v2639_v21  ;;  %2731 = vmax.xlane.f32.xlu0 %v2730_v31 }
 0x52b   : > { %v2733_v14 = vsel %vm1483_vm1, %v5859_v5, -inf }
 0x52c   : > { %2734 = vmax.xlane.f32.xlu1 %v2733_v14  ;;  %v2739_v48 = vsel %vm1483_vm1, %v5865_v8, -inf  ;;  %v1580_v14 = vsel %vm1483_vm1, %v5647_v12, 0.0  ;;  %v1595_v12 = vsel %vm1483_vm1, %v5675_v58, 0.0  ;;  %v1610_v58 = vsel %vm1483_vm1, %v5710_v61, 0.0 }
 0x52d   : > { %v1625_v61 = vsel %vm1483_vm1, %v5736_v17, 0.0 }
 0x52e   : > { %v2677_v57 = vpop.f32.mrb[60].mxu0  ;;  %2737 = vmax.xlane.f32.xlu0 %v2736_v56  ;;  %v1586_v56 = vsel %vm1483_vm1, %v5662_v50, 0.0  ;;  %v1601_v50 = vsel %vm1483_vm1, %v5679_v28, 0.0  ;;  %v1616_v28 = vsel %vm1483_vm1, %v5723_v41, 0.0 }
 0x52f   : > { %v5871_v27 = vmul.f32 0.088388346, %v2677_v57  ;;  %v4206_v53 = vpop.f32.mrb[61].mxu0  ;;  %v1583_v57 = vsel %vm1483_vm1, %v5649_v42, 0.0  ;;  %v1598_v42 = vsel %vm1483_vm1, %v5677_v13, 0.0  ;;  %v1613_v13 = vsel %vm1483_vm1, %v5712_v22, 0.0 }
 0x530   : > { %v2680_v32 = vpop.f32.mrb[62].mxu0  ;;  %2740 = vmax.xlane.f32.xlu1 %v2739_v48  ;;  %v1589_v53 = vsel %vm1483_vm1, %v5660_v24, 0.0  ;;  %v1592_v48 = vsel %vm1483_vm1, %v5672_v20, 0.0  ;;  %v1604_v24 = vsel %vm1483_vm1, %v5697_v47, 0.0  ;;  %v1607_v20 = vsel %vm1483_vm1, %v5699_v29, 0.0 }
 0x531   : > { %v5875_v21 = vmul.f32 0.088388346, %v2680_v32  ;;  %v4207_v30 = vpop.f32.mrb[63].mxu0  ;;  %v2742_v34 = vsel %vm1483_vm1, %v5871_v27, -inf  ;;  %v1619_v47 = vsel %vm1483_vm1, %v5725_v37, 0.0  ;;  %v1622_v29 = vsel %vm1483_vm1, %v5734_v54, 0.0 }
 0x532   : > { %2743 = vmax.xlane.f32.xlu0 %v2742_v34 }
 0x533   : > { %v2745_v31 = vsel %vm1483_vm1, %v5875_v21, -inf }
 0x534   : > { %2746 = vmax.xlane.f32.xlu1 %v2745_v31 }
 0x536   : > { %1581 = vadd.xlane.f32.xlu0 %v1580_v14 }
 0x538   : > { %1584 = vadd.xlane.f32.xlu1 %v1583_v57 }
 0x53a   : > { %1587 = vadd.xlane.f32.xlu0 %v1586_v56 }
 0x53c   : > { %1590 = vadd.xlane.f32.xlu1 %v1589_v53 }
 0x53e   : > { %1593 = vadd.xlane.f32.xlu0 %v1592_v48 }
 0x540   : > { %1596 = vadd.xlane.f32.xlu1 %v1595_v12 }
 0x542   : > { %1599 = vadd.xlane.f32.xlu0 %v1598_v42 }
 0x544   : > { %1602 = vadd.xlane.f32.xlu1 %v1601_v50 }
 0x546   : > { %1605 = vadd.xlane.f32.xlu0 %v1604_v24 }
 0x548   : > { %1608 = vadd.xlane.f32.xlu1 %v1607_v20 }
 0x54a   : > { %1611 = vadd.xlane.f32.xlu0 %v1610_v58 }
 0x54c   : > { %1614 = vadd.xlane.f32.xlu1 %v1613_v13 }
 0x54e   : > { %1617 = vadd.xlane.f32.xlu0 %v1616_v28 }
 0x550   : > { %1620 = vadd.xlane.f32.xlu1 %v1619_v47 }
 0x552   : > { %1623 = vadd.xlane.f32.xlu0 %v1622_v29 }
 0x554   : > { %1626 = vadd.xlane.f32.xlu1 %v1625_v61 }
 0x59f   : > { %v2702_v32 = vpop.xlane.xlu0 %2701 }
 0x5a0   : > { %v2748_v22 = vsub.f32 %v5815_v26, %v2702_v32 }
 0x5a1   : > { %v2705_v30 = vpop.xlane.xlu1 %2704 }
 0x5a2   : > { %v2764_v34 = vmul.f32 1.442695, %v2748_v22  ;;  %v2749_v41 = vsub.f32 %v5819_v7, %v2705_v30 }
 0x5a4   : > { %4461 = vpow2.f32 %v2764_v34  ;;  %v2766_v31 = vmul.f32 1.442695, %v2749_v41 }
 0x5a6   : > { %4463 = vpow2.f32 %v2766_v31 }
 0x5a7   : > { %v2708_v37 = vpop.xlane.xlu0 %2707 }
 0x5a8   : > { %v2750_v14 = vsub.f32 %v5825_v11, %v2708_v37 }
 0x5a9   : > { %v2711_v57 = vpop.xlane.xlu1 %2710 }
 0x5aa   : > { %v2751_v54 = vsub.f32 %v5827_v9, %v2711_v57  ;;  %v2768_v56 = vmul.f32 1.442695, %v2750_v14 }
 0x5ab   : > { %v2714_v17 = vpop.xlane.xlu0 %2713 }
 0x5ac   : > { %v2770_v53 = vmul.f32 1.442695, %v2751_v54  ;;  %4465 = vpow2.f32 %v2768_v56  ;;  %v2752_v48 = vsub.f32 %v5829_v40, %v2714_v17 }
 0x5ad   : > { %v2717_v26 = vpop.xlane.xlu1 %2716 }
 0x5ae   : > { %v4462_v12 = vpop.eup %4461  ;;  %4467 = vpow2.f32 %v2770_v53  ;;  %v2753_v7 = vsub.f32 %v5833_v0, %v2717_v26  ;;  %v2772_v42 = vmul.f32 1.442695, %v2752_v48 }
 0x5af   : > { %v2796_v50 = vsel %vm1483_vm1, %v4462_v12, 0.0  ;;  %v2720_v11 = vpop.xlane.xlu0 %2719 }
 0x5b0   : > { %v4464_v24 = vpop.eup %4463  ;;  %v2774_v20 = vmul.f32 1.442695, %v2753_v7  ;;  %2797 = vadd.xlane.f32.xlu0 %v2796_v50  ;;  %4469 = vpow2.f32 %v2772_v42  ;;  %v2754_v9 = vsub.f32 %v5839_v19, %v2720_v11 }
 0x5b1   : > { %v2723_v58 = vpop.xlane.xlu1 %2722  ;;  %v2799_v13 = vsel %vm1483_vm1, %v4464_v24, 0.0  ;;  %v2860_v28 = vpack.c.bf16 %v4464_v24, %v4462_v12 }
 0x5b2   : > { %4471 = vpow2.f32 %v2774_v20  ;;  %v2755_v40 = vsub.f32 %v5843_v39, %v2723_v58  ;;  %2800 = vadd.xlane.f32.xlu1 %v2799_v13  ;;  %v2776_v47 = vmul.f32 1.442695, %v2754_v9 }
 0x5b3   : > { %4211 = vmatmul.mubr.msk.bf16.vlgmr.msra.gmra.mrb[64].mxu1 %vm1483_vm1, %v2860_v28  ;;  %v2726_v29 = vpop.xlane.xlu0 %2725 }
 0x5b4   : > { %v2778_v0 = vmul.f32 1.442695, %v2755_v40  ;;  %4221 = vmatpush3.bf16.msra.mxu1 %v5559_v45  ;;  %4222 = vmatprep.mubr.msk.bf16.mxu1 %vm4817_vm0, %v4816_v63  ;;  %4473 = vpow2.f32 %v2776_v47  ;;  %v2756_v19 = vsub.f32 %v5845_v59, %v2726_v29 }
 0x5b5   : > { %v2729_v61 = vpop.xlane.xlu1 %2728  ;;  %4232 = vmatprep.subr.bf16.mxu1 %v4816_v63 }
 0x5b6   : > { %4475 = vpow2.f32 %v2778_v0  ;;  %v2757_v39 = vsub.f32 %v5849_v1, %v2729_v61  ;;  %v4466_v32 = vpop.eup %4465  ;;  %v2780_v22 = vmul.f32 1.442695, %v2756_v19 }
 0x5b7   : > { %v2732_v41 = vpop.xlane.xlu0 %2731  ;;  %v2802_v31 = vsel %vm1483_vm1, %v4466_v32, 0.0 }
 0x5b8   : > { %v4468_v30 = vpop.eup %4467  ;;  %v2782_v34 = vmul.f32 1.442695, %v2757_v39  ;;  %4477 = vpow2.f32 %v2780_v22  ;;  %v2758_v45 = vsub.f32 %v5855_v55, %v2732_v41  ;;  %2803 = vadd.xlane.f32.xlu0 %v2802_v31 }
 0x5b9   : > { %v2735_v37 = vpop.xlane.xlu1 %2734  ;;  %v2805_v59 = vsel %vm1483_vm1, %v4468_v30, 0.0  ;;  %v2861_v14 = vpack.c.bf16 %v4468_v30, %v4466_v32 }
 0x5ba   : > { %4479 = vpow2.f32 %v2782_v34  ;;  %v2759_v57 = vsub.f32 %v5859_v5, %v2735_v37  ;;  %2806 = vadd.xlane.f32.xlu1 %v2805_v59  ;;  %v4470_v1 = vpop.eup %4469  ;;  %v2784_v54 = vmul.f32 1.442695, %v2758_v45 }
 0x5bb   : > { %4217 = vmatmul.mubr.msk.bf16.vlgmr.msra.gmra.mrb[64].mxu0 %vm1483_vm1, %v2861_v14  ;;  %v2738_v17 = vpop.xlane.xlu0 %2737  ;;  %v2808_v55 = vsel %vm1483_vm1, %v4470_v1, 0.0 }
 0x5bc   : > { %v4472_v56 = vpop.eup %4471  ;;  %v2786_v53 = vmul.f32 1.442695, %v2759_v57  ;;  %4227 = vmatpush3.bf16.msra.mxu0 %v5557_v52  ;;  %4228 = vmatprep.mubr.msk.bf16.mxu0 %vm4817_vm0, %v4816_v63  ;;  %4481 = vpow2.f32 %v2784_v54  ;;  %v2760_v48 = vsub.f32 %v5861_v46, %v2738_v17 }
 0x5bd   : > { %2809 = vadd.xlane.f32.xlu0 %v2808_v55  ;;  %v2741_v5 = vpop.xlane.xlu1 %2740  ;;  %v2811_v26 = vsel %vm1483_vm1, %v4472_v56, 0.0  ;;  %v2862_v12 = vpack.c.bf16 %v4472_v56, %v4470_v1  ;;  %4238 = vmatprep.subr.bf16.mxu0 %v4816_v63 }
 0x5be   : > { %4483 = vpow2.f32 %v2786_v53  ;;  %v2761_v7 = vsub.f32 %v5865_v8, %v2741_v5  ;;  %2812 = vadd.xlane.f32.xlu1 %v2811_v26  ;;  %v4474_v52 = vpop.eup %4473  ;;  %v2788_v42 = vmul.f32 1.442695, %v2760_v48  ;;  %v5980_v48 = vld [vmem:[%s6502_s5] ss:$0 sm:$0xff] }
 0x5bf   : > { %4223 = vmatmul.mubr.msk.bf16.vlgmr.msra.gmra.mrb[68].mxu1 %vm1483_vm1, %v2862_v12  ;;  %v2744_v46 = vpop.xlane.xlu0 %2743  ;;  %v2814_v20 = vsel %vm1483_vm1, %v4474_v52, 0.0 }
 0x5c0   : > { %v4476_v50 = vpop.eup %4475  ;;  %v2790_v24 = vmul.f32 1.442695, %v2761_v7  ;;  %4233 = vmatpush3.bf16.msra.mxu1 %v5567_v44  ;;  %4234 = vmatprep.mubr.msk.bf16.mxu1 %vm4817_vm0, %v4816_v63  ;;  %4485 = vpow2.f32 %v2788_v42  ;;  %v2762_v11 = vsub.f32 %v5871_v27, %v2744_v46 }
 0x5c1   : > { %2815 = vadd.xlane.f32.xlu0 %v2814_v20  ;;  %v2747_v8 = vpop.xlane.xlu1 %2746  ;;  %v2817_v9 = vsel %vm1483_vm1, %v4476_v50, 0.0  ;;  %v2863_v58 = vpack.c.bf16 %v4476_v50, %v4474_v52  ;;  %4244 = vmatprep.subr.bf16.mxu1 %v4816_v63 }
 0x5c2   : > { %4487 = vpow2.f32 %v2790_v24  ;;  %v2763_v13 = vsub.f32 %v5875_v21, %v2747_v8  ;;  %2818 = vadd.xlane.f32.xlu1 %v2817_v9  ;;  %v4478_v44 = vpop.eup %4477  ;;  %v2792_v28 = vmul.f32 1.442695, %v2762_v11 }
 0x5c3   : > { %4229 = vmatmul.mubr.msk.bf16.vlgmr.msra.gmra.mrb[68].mxu0 %vm1483_vm1, %v2863_v58  ;;  %v1582_v27 = vpop.xlane.xlu0 %1581  ;;  %v2820_v0 = vsel %vm1483_vm1, %v4478_v44, 0.0 }
 0x5c4   : > { %v4480_v40 = vpop.eup %4479  ;;  %v2794_v47 = vmul.f32 1.442695, %v2763_v13  ;;  %4239 = vmatpush3.bf16.msra.mxu0 %v5565_v25  ;;  %4240 = vmatprep.mubr.msk.bf16.mxu0 %vm4817_vm0, %v4816_v63  ;;  %4489 = vpow2.f32 %v2792_v28 }
 0x5c5   : > { %2821 = vadd.xlane.f32.xlu0 %v2820_v0  ;;  %v1585_v29 = vpop.xlane.xlu1 %1584  ;;  %v2823_v21 = vsel %vm1483_vm1, %v4480_v40, 0.0  ;;  %v2864_v19 = vpack.c.bf16 %v4480_v40, %v4478_v44  ;;  %4250 = vmatprep.subr.bf16.mxu0 %v4816_v63 }
 0x5c6   : > { %4491 = vpow2.f32 %v2794_v47  ;;  %2824 = vadd.xlane.f32.xlu1 %v2823_v21  ;;  %v4482_v61 = vpop.eup %4481 }
 0x5c7   : > { %4493 = vrcp.f32 %v1582_v27  ;;  %4235 = vmatmul.mubr.msk.bf16.vlgmr.msra.gmra.mrb[72].mxu1 %vm1483_vm1, %v2864_v19  ;;  %v1588_v39 = vpop.xlane.xlu0 %1587  ;;  %v2826_v32 = vsel %vm1483_vm1, %v4482_v61, 0.0 }
 0x5c8   : > { %v4484_v25 = vpop.eup %4483  ;;  %4495 = vrcp.f32 %v1585_v29  ;;  %4245 = vmatpush3.bf16.msra.mxu1 %v5575_v23  ;;  %4246 = vmatprep.mubr.msk.bf16.mxu1 %vm4817_vm0, %v4816_v63 }
 0x5c9   : > { %4497 = vrcp.f32 %v1588_v39  ;;  %2827 = vadd.xlane.f32.xlu0 %v2826_v32  ;;  %v1591_v22 = vpop.xlane.xlu1 %1590  ;;  %v2829_v30 = vsel %vm1483_vm1, %v4484_v25, 0.0  ;;  %v2865_v34 = vpack.c.bf16 %v4484_v25, %v4482_v61  ;;  %4256 = vmatprep.subr.bf16.mxu1 %v4816_v63 }
 0x5ca   : > { %4499 = vrcp.f32 %v1591_v22  ;;  %2830 = vadd.xlane.f32.xlu1 %v2829_v30  ;;  %v4486_v41 = vpop.eup %4485 }
 0x5cb   : > { %4241 = vmatmul.mubr.msk.bf16.vlgmr.msra.gmra.mrb[72].mxu0 %vm1483_vm1, %v2865_v34  ;;  %v1594_v31 = vpop.xlane.xlu0 %1593  ;;  %v2832_v45 = vsel %vm1483_vm1, %v4486_v41, 0.0 }
 0x5cc   : > { %v4488_v23 = vpop.eup %4487  ;;  %4251 = vmatpush3.bf16.msra.mxu0 %v5573_v15  ;;  %4252 = vmatprep.mubr.msk.bf16.mxu0 %vm4817_vm0, %v4816_v63  ;;  %4501 = vrcp.f32 %v1594_v31 }
 0x5cd   : > { %2833 = vadd.xlane.f32.xlu0 %v2832_v45  ;;  %v1597_v37 = vpop.xlane.xlu1 %1596  ;;  %v2835_v59 = vsel %vm1483_vm1, %v4488_v23, 0.0  ;;  %v2866_v14 = vpack.c.bf16 %v4488_v23, %v4486_v41 }
 0x5ce   : > { %4503 = vrcp.f32 %v1597_v37  ;;  %2836 = vadd.xlane.f32.xlu1 %v2835_v59  ;;  %v4490_v57 = vpop.eup %4489 }
 0x5cf   : > { %4247 = vmatmul.mubr.msk.bf16.vlgmr.msra.gmra.mrb[76].mxu1 %vm1483_vm1, %v2866_v14  ;;  %v1600_v54 = vpop.xlane.xlu0 %1599  ;;  %v2838_v15 = vsel %vm1483_vm1, %v4490_v57, 0.0 }
 0x5d0   : > { %v4492_v1 = vpop.eup %4491  ;;  %4272 = vmatprep.mubr.msk.bf16.mxu1 %vm4817_vm0, %v4816_v63  ;;  %4505 = vrcp.f32 %v1600_v54 }
 0x5d1   : > { %v4494_v56 = vpop.eup %4493  ;;  %2839 = vadd.xlane.f32.xlu0 %v2838_v15  ;;  %v1603_v53 = vpop.xlane.xlu1 %1602  ;;  %v2841_v17 = vsel %vm1483_vm1, %v4492_v1, 0.0  ;;  %v2867_v55 = vpack.c.bf16 %v4492_v1, %v4490_v57 }
 0x5d2   : > { %v4496_v5 = vpop.eup %4495  ;;  %4507 = vrcp.f32 %v1603_v53  ;;  %2842 = vadd.xlane.f32.xlu1 %v2841_v17  ;;  %v5983_v26 = vmul.f32 %v4494_v56, %v5785_v49 }
 0x5d3   : > { %v4498_v12 = vpop.eup %4497  ;;  %4253 = vmatmul.mubr.msk.bf16.vlgmr.msra.gmra.mrb[76].mxu0 %vm1483_vm1, %v2867_v55  ;;  %v5987_v7 = vmul.f32 %v4496_v5, %v5787_v6  ;;  %v1606_v42 = vpop.xlane.xlu0 %1605 }
 0x5d4   : > { %v4500_v52 = vpop.eup %4499  ;;  %v2027_v50 = vmul.f32 %v5980_v48, %v5983_v26  ;;  %v5992_v24 = vmul.f32 %v4498_v12, %v5789_v16  ;;  %4509 = vrcp.f32 %v1606_v42 }
 0x5d5   : > { %v1609_v46 = vpop.xlane.xlu1 %1608  ;;  %v2028_v49 = vmul.f32 %v5980_v48, %v5987_v7  ;;  %v5997_v20 = vmul.f32 %v4500_v52, %v5791_v2 }
 0x5d6   : > { %2043 = vadd.xlane.f32.xlu0 %v2027_v50  ;;  %4511 = vrcp.f32 %v1609_v46  ;;  %v2029_v6 = vmul.f32 %v5980_v48, %v5992_v24  ;;  %v4502_v11 = vpop.eup %4501 }
 0x5d7   : > { %2045 = vadd.xlane.f32.xlu1 %v2028_v49  ;;  %v2030_v8 = vmul.f32 %v5980_v48, %v5997_v20  ;;  %v1612_v9 = vpop.xlane.xlu0 %1611  ;;  %v6004_v58 = vmul.f32 %v4502_v11, %v5793_v35 }
 0x5d8   : > { %v4504_v16 = vpop.eup %4503  ;;  %4513 = vrcp.f32 %v1612_v9 }
 0x5d9   : > { %v1615_v13 = vpop.xlane.xlu1 %1614  ;;  %v6007_v2 = vmul.f32 %v4504_v16, %v5797_v3  ;;  %v2031_v44 = vmul.f32 %v5980_v48, %v6004_v58 }
 0x5da   : > { %2047 = vadd.xlane.f32.xlu0 %v2029_v6  ;;  %4515 = vrcp.f32 %v1615_v13  ;;  %v4506_v28 = vpop.eup %4505 }
 0x5db   : > { %2049 = vadd.xlane.f32.xlu1 %v2030_v8  ;;  %v2032_v40 = vmul.f32 %v5980_v48, %v6007_v2  ;;  %v1618_v27 = vpop.xlane.xlu0 %1617  ;;  %v6014_v35 = vmul.f32 %v4506_v28, %v5795_v62 }
 0x5dc   : > { %v4508_v47 = vpop.eup %4507  ;;  %4517 = vrcp.f32 %v1618_v27 }
 0x5dd   : > { %v1621_v0 = vpop.xlane.xlu1 %1620  ;;  %v6017_v3 = vmul.f32 %v4508_v47, %v5799_v4  ;;  %v2033_v29 = vmul.f32 %v5980_v48, %v6014_v35 }
 0x5de   : > { %2051 = vadd.xlane.f32.xlu0 %v2031_v44  ;;  %4519 = vrcp.f32 %v1621_v0  ;;  %v4510_v21 = vpop.eup %4509 }
 0x5df   : > { %2053 = vadd.xlane.f32.xlu1 %v2032_v40  ;;  %v2034_v19 = vmul.f32 %v5980_v48, %v6017_v3  ;;  %v1624_v25 = vpop.xlane.xlu0 %1623  ;;  %v6024_v62 = vmul.f32 %v4510_v21, %v5801_v10 }
 0x5e0   : > { %v4512_v61 = vpop.eup %4511  ;;  %4521 = vrcp.f32 %v1624_v25 }
 0x5e1   : > { %v1627_v39 = vpop.xlane.xlu1 %1626  ;;  %v6027_v4 = vmul.f32 %v4512_v61, %v5803_v51  ;;  %v2035_v32 = vmul.f32 %v5980_v48, %v6024_v62 }
 0x5e2   : > { %2055 = vadd.xlane.f32.xlu0 %v2033_v29  ;;  %4523 = vrcp.f32 %v1627_v39  ;;  %v4514_v22 = vpop.eup %4513 }
 0x5e3   : > { %2057 = vadd.xlane.f32.xlu1 %v2034_v19  ;;  %v2036_v30 = vmul.f32 %v5980_v48, %v6027_v4  ;;  %v6034_v41 = vmul.f32 %v4514_v22, %v5805_v43 }
 0x5e4   : > { %v4516_v34 = vpop.eup %4515 }
 0x5e5   : > { %v6037_v10 = vmul.f32 %v4516_v34, %v5807_v33  ;;  %v2037_v51 = vmul.f32 %v5980_v48, %v6034_v41 }
 0x5e6   : > { %2059 = vadd.xlane.f32.xlu0 %v2035_v32  ;;  %v4518_v23 = vpop.eup %4517 }
 0x5e7   : > { %2061 = vadd.xlane.f32.xlu1 %v2036_v30  ;;  %v2038_v31 = vmul.f32 %v5980_v48, %v6037_v10  ;;  %v6044_v37 = vmul.f32 %v4518_v23, %v5809_v38 }
 0x5e8   : > { %v4520_v45 = vpop.eup %4519 }
 0x5e9   : > { %v6047_v59 = vmul.f32 %v4520_v45, %v5811_v36  ;;  %v2039_v43 = vmul.f32 %v5980_v48, %v6044_v37 }
 0x5ea   : > { %2063 = vadd.xlane.f32.xlu0 %v2037_v51  ;;  %v4522_v33 = vpop.eup %4521 }
 0x5eb   : > { %2065 = vadd.xlane.f32.xlu1 %v2038_v31  ;;  %v2040_v14 = vmul.f32 %v5980_v48, %v6047_v59  ;;  %v6054_v1 = vmul.f32 %v4522_v33, %v5813_v60 }
 0x5ec   : > { %v4524_v57 = vpop.eup %4523 }
 0x5ed   : > { %v6057_v54 = vmul.f32 %v4524_v57, %v5817_v18  ;;  %v2041_v38 = vmul.f32 %v5980_v48, %v6054_v1 }
 0x5ee   : > { %2067 = vadd.xlane.f32.xlu0 %v2039_v43 }
 0x5ef   : > { %2069 = vadd.xlane.f32.xlu1 %v2040_v14  ;;  %v2042_v36 = vmul.f32 %v5980_v48, %v6057_v54 }
 0x5f2   : > { %2071 = vadd.xlane.f32.xlu0 %v2041_v38 }
 0x5f3   : > { %2073 = vadd.xlane.f32.xlu1 %v2042_v36 }
 0x63d   : > { %v6063_v15 = vpop.xlane.xlu0 %2797 }
 0x63f   : > { %v6065_v56 = vpop.xlane.xlu1 %2800 }
 0x645   : > { %v6067_v53 = vpop.xlane.xlu0 %2803 }
 0x647   : > { %v6069_v60 = vpop.xlane.xlu1 %2806 }
 0x64a   : > { %v6071_v18 = vpop.xlane.xlu0 %2809 }
 0x64b   : > { %v6073_v17 = vpop.xlane.xlu1 %2812 }
 0x64e   : > { %v6075_v55 = vpop.xlane.xlu0 %2815 }
 0x64f   : > { %v6077_v5 = vpop.xlane.xlu1 %2818 }
 0x652   : > { %v6079_v12 = vpop.xlane.xlu0 %2821 }
 0x653   : > { %v6081_v52 = vpop.xlane.xlu1 %2824 }
 0x656   : > { %v6083_v42 = vpop.xlane.xlu0 %2827 }
 0x657   : > { %v6085_v50 = vpop.xlane.xlu1 %2830 }
 0x65a   : > { %v6087_v46 = vpop.xlane.xlu0 %2833 }
 0x65b   : > { %v6089_v49 = vpop.xlane.xlu1 %2836 }
 0x65e   : > { %v6091_v6 = vpop.xlane.xlu0 %2839 }
 0x65f   : > { %v6093_v11 = vpop.xlane.xlu1 %2842 }
 0x663   : > { %v2044_v8 = vpop.xlane.xlu0 %2043 }
 0x664   : > { %v2046_v16 = vpop.xlane.xlu1 %2045 }
 0x665   : > { %v2075_v9 = vmax.f32 %v2044_v8, %v2046_v16 }
 0x667   : > { %v2076_v13 = vrot.slane %v2075_v9, 4  ;;  %v2048_v44 = vpop.xlane.xlu0 %2047 }
 0x668   : > { %v2050_v28 = vpop.xlane.xlu1 %2049 }
 0x669   : > { %v2077_v40 = vmax.f32 %v2075_v9, %v2076_v13  ;;  %v2082_v47 = vmax.f32 %v2048_v44, %v2050_v28 }
 0x66b   : > { %v2078_v27 = vrot.slane %v2077_v40, 2  ;;  %v2083_v0 = vrot.slane %v2082_v47, 4 }
 0x66d   : > { %v2079_v29 = vmax.f32 %v2077_v40, %v2078_v27  ;;  %v2084_v21 = vmax.f32 %v2082_v47, %v2083_v0 }
 0x66f   : > { %v2080_v19 = vrot.slane %v2079_v29, 1  ;;  %v2085_v61 = vrot.slane %v2084_v21, 2 }
 0x671   : > { %v2081_v25 = vmax.f32 %v2079_v29, %v2080_v19  ;;  %v2086_v39 = vmax.f32 %v2084_v21, %v2085_v61 }
 0x673   : > { %v2131_v32 = vsub.f32 %v2044_v8, %v2081_v25  ;;  %v2132_v22 = vsub.f32 %v2046_v16, %v2081_v25  ;;  %v2087_v30 = vrot.slane %v2086_v39, 1 }
 0x675   : > { %v2147_v34 = vmul.f32 1.442695, %v2131_v32  ;;  %v2149_v51 = vmul.f32 1.442695, %v2132_v22  ;;  %v2088_v23 = vmax.f32 %v2086_v39, %v2087_v30 }
 0x677   : > { %4525 = vpow2.f32 %v2147_v34  ;;  %v2133_v31 = vsub.f32 %v2048_v44, %v2088_v23  ;;  %v2134_v45 = vsub.f32 %v2050_v28, %v2088_v23 }
 0x678   : > { %4527 = vpow2.f32 %v2149_v51 }
 0x679   : > { %v2151_v43 = vmul.f32 1.442695, %v2133_v31  ;;  %v2153_v33 = vmul.f32 1.442695, %v2134_v45 }
 0x67b   : > { %4529 = vpow2.f32 %v2151_v43 }
 0x67c   : > { %4531 = vpow2.f32 %v2153_v33 }
 0x681   : > { %v4526_v14 = vpop.eup %4525 }
 0x682   : > { %v4528_v57 = vpop.eup %4527  ;;  %v2179_v38 = vmul.f32 %v4526_v14, %v5983_v26 }
 0x683   : > { %v2180_v36 = vmul.f32 %v4528_v57, %v5987_v7  ;;  %v2251_v8 = vadd.f32 %v4528_v57, %v4526_v14 }
 0x685   : > { %v4530_v16 = vpop.eup %4529  ;;  %v2195_v9 = vadd.f32 %v2180_v36, %v2179_v38  ;;  %v2252_v13 = vrot.slane %v2251_v8, 4 }
 0x686   : > { %v4532_v40 = vpop.eup %4531  ;;  %v2181_v47 = vmul.f32 %v4530_v16, %v5992_v24  ;;  %v6098_v44 = vpop.f32.mrb[64].mxu1 }
 0x687   : > { %v2196_v28 = vrot.slane %v2195_v9, 4  ;;  %v2253_v27 = vadd.f32 %v2252_v13, %v2251_v8  ;;  %v2182_v0 = vmul.f32 %v4532_v40, %v5997_v20  ;;  %v2258_v29 = vadd.f32 %v4532_v40, %v4530_v16  ;;  %v4212_v21 = vpop.f32.mrb[65].mxu1 }
 0x688   : > { %v6101_v19 = vpop.f32.mrb[66].mxu1 }
 0x689   : > { %v2254_v26 = vrot.slane %v2253_v27, 2  ;;  %v2202_v61 = vadd.f32 %v2182_v0, %v2181_v47  ;;  %v2259_v7 = vrot.slane %v2258_v29, 4  ;;  %v4213_v25 = vpop.f32.mrb[67].mxu1  ;;  %v2197_v39 = vadd.f32 %v2196_v28, %v2195_v9 }
 0x68b   : > { %v2255_v32 = vadd.f32 %v2254_v26, %v2253_v27  ;;  %v2203_v22 = vrot.slane %v2202_v61, 4  ;;  %v2260_v30 = vadd.f32 %v2259_v7, %v2258_v29  ;;  %v2198_v51 = vrot.slane %v2197_v39, 2 }
 0x68d   : > { %v2256_v34 = vrot.slane %v2255_v32, 1  ;;  %v2261_v24 = vrot.slane %v2260_v30, 2  ;;  %v2204_v23 = vadd.f32 %v2203_v22, %v2202_v61  ;;  %v2199_v38 = vadd.f32 %v2198_v51, %v2197_v39 }
 0x68e   : > { %v2949_v31 = vpop.f32.mrb[64].mxu0 }
 0x68f   : > { %v2257_v45 = vadd.f32 %v2256_v34, %v2255_v32  ;;  %v2262_v43 = vadd.f32 %v2261_v24, %v2260_v30  ;;  %v4218_v20 = vpop.f32.mrb[65].mxu0  ;;  %v2205_v36 = vrot.slane %v2204_v23, 2  ;;  %v2200_v47 = vrot.slane %v2199_v38, 1 }
 0x690   : > { %v2952_v33 = vpop.f32.mrb[66].mxu0 }
 0x691   : > { %4533 = vrcp.f32 %v2257_v45  ;;  %v2263_v14 = vrot.slane %v2262_v43, 1  ;;  %v4219_v57 = vpop.f32.mrb[67].mxu0  ;;  %v2206_v28 = vadd.f32 %v2205_v36, %v2204_v23  ;;  %v2201_v26 = vadd.f32 %v2200_v47, %v2199_v38 }
 0x692   : > { %v2993_v8 = vpop.f32.mrb[68].mxu1  ;;  %4535 = vrcp.f32 %v6063_v15 }
 0x693   : > { %v2264_v16 = vadd.f32 %v2263_v14, %v2262_v43  ;;  %v4224_v9 = vpop.f32.mrb[69].mxu1  ;;  %v2207_v61 = vrot.slane %v2206_v28, 1 }
 0x694   : > { %v2996_v13 = vpop.f32.mrb[70].mxu1 }
 0x695   : > { %4537 = vrcp.f32 %v2264_v16  ;;  %v4225_v40 = vpop.f32.mrb[71].mxu1  ;;  %v2208_v22 = vadd.f32 %v2207_v61, %v2206_v28 }
 0x696   : > { %4539 = vrcp.f32 %v6065_v56  ;;  %v3037_v27 = vpop.f32.mrb[68].mxu0 }
 0x697   : > { %4541 = vrcp.f32 %v6067_v53  ;;  %v4230_v0 = vpop.f32.mrb[69].mxu0 }
 0x698   : > { %4543 = vrcp.f32 %v6069_v60  ;;  %v3040_v29 = vpop.f32.mrb[70].mxu0 }
 0x699   : > { %4545 = vrcp.f32 %v6071_v18  ;;  %v4231_v21 = vpop.f32.mrb[71].mxu0 }
 0x69a   : > { %v3081_v15 = vpop.f32.mrb[72].mxu1  ;;  %4547 = vrcp.f32 %v6073_v17 }
 0x69b   : > { %v4534_v7 = vpop.eup %4533  ;;  %v4236_v25 = vpop.f32.mrb[73].mxu1  ;;  %4549 = vrcp.f32 %v6075_v55 }
 0x69c   : > { %v6109_v56 = vmul.f32 %v4534_v7, %v2201_v26  ;;  %v3084_v39 = vpop.f32.mrb[74].mxu1  ;;  %v4536_v32 = vpop.eup %4535  ;;  %4551 = vrcp.f32 %v6077_v5 }
 0x69d   : > { %v4237_v53 = vpop.f32.mrb[75].mxu1  ;;  %v6114_v51 = vmul.f32 %v4536_v32, %v6098_v44  ;;  %4553 = vrcp.f32 %v6079_v12 }
 0x69e   : > { %v3125_v60 = vpop.f32.mrb[72].mxu0  ;;  %4555 = vrcp.f32 %v6081_v52 }
 0x69f   : > { %v4538_v30 = vpop.eup %4537  ;;  %v4242_v18 = vpop.f32.mrb[73].mxu0  ;;  %v3243_v55 = vmul.f32 %v5980_v48, %v6114_v51  ;;  %4557 = vrcp.f32 %v6083_v42 }
 0x6a0   : > { %v4540_v34 = vpop.eup %4539  ;;  %v2316_v24 = vmul.f32 %v4538_v30, %v2208_v22  ;;  %v3128_v17 = vpop.f32.mrb[74].mxu0  ;;  %4559 = vrcp.f32 %v6085_v50 }
 0x6a1   : > { %v4542_v23 = vpop.eup %4541  ;;  %v4243_v45 = vpop.f32.mrb[75].mxu0  ;;  %v6120_v20 = vmul.f32 %v4540_v34, %v6101_v19  ;;  %3259 = vadd.xlane.f32.xlu0 %v3243_v55  ;;  %4561 = vrcp.f32 %v6087_v46 }
 0x6a2   : > { %v4544_v43 = vpop.eup %4543  ;;  %v3169_v14 = vpop.f32.mrb[76].mxu1  ;;  %v6123_v57 = vmul.f32 %v4542_v23, %v2949_v31  ;;  %4563 = vrcp.f32 %v6089_v49  ;;  %v6161_v49 = vsel %vm2331_vm2, %v2316_v24, %v6109_v56 }
 0x6a3   : > { %v4546_v5 = vpop.eup %4545  ;;  %v4248_v44 = vpop.f32.mrb[77].mxu1  ;;  %v3244_v38 = vmul.f32 %v5980_v48, %v6120_v20  ;;  %v6127_v12 = vmul.f32 %v4544_v43, %v2952_v33  ;;  %4565 = vrcp.f32 %v6091_v6  ;;  %6541 = vst [vmem:[#allocation20_spill] sm:$0xff] %v6161_v49 }
 0x6a4   : > { %v6129_v36 = vmul.f32 %v4546_v5, %v2993_v8  ;;  %v3172_v16 = vpop.f32.mrb[78].mxu1  ;;  %v4548_v9 = vpop.eup %4547  ;;  %v3245_v19 = vmul.f32 %v5980_v48, %v6123_v57  ;;  %4567 = vrcp.f32 %v6093_v11  ;;  %v4357_v44 = vld [vmem:[#allocation9] sm:$0xff]  }
 0x6a5   : > { %v4249_v40 = vpop.f32.mrb[79].mxu1  ;;  %3261 = vadd.xlane.f32.xlu1 %v3244_v38  ;;  %v3246_v52 = vmul.f32 %v5980_v48, %v6127_v12  ;;  %v6136_v31 = vmul.f32 %v4548_v9, %v2996_v13  ;;  %v4550_v28 = vpop.eup %4549  ;;  %4257 = vmatpush3.bf16.msra.mxu1 %v4357_v44 }
 0x6a6   : > { %6535 = vst [vmem:[#allocation14_spill] sm:$0xff] %v6129_v36  ;;  %v3213_v47 = vpop.f32.mrb[76].mxu0  ;;  %v3247_v8 = vmul.f32 %v5980_v48, %v6129_v36  ;;  %3263 = vadd.xlane.f32.xlu0 %v3245_v19  ;;  %v6141_v42 = vmul.f32 %v4550_v28, %v3037_v27  ;;  %v4552_v21 = vpop.eup %4551  ;;  %4258 = vmatprep.subr.bf16.mxu1 %v4816_v63  ;;  %v4359_v40 = vld [vmem:[#allocation9 + $0x10] sm:$0xff]  }
 0x6a7   : > { %6536 = vst [vmem:[#allocation15_spill] sm:$0xff] %v6136_v31  ;;  %v4254_v33 = vpop.f32.mrb[77].mxu0  ;;  %v3248_v13 = vmul.f32 %v5980_v48, %v6136_v31  ;;  %v6146_v61 = vmul.f32 %v4552_v21, %v3040_v29  ;;  %v4554_v7 = vpop.eup %4553 }
 0x6a8   : > { %6537 = vst [vmem:[#allocation16_spill] sm:$0xff] %v6141_v42  ;;  %v3216_v0 = vpop.f32.mrb[78].mxu0  ;;  %v3249_v50 = vmul.f32 %v5980_v48, %v6141_v42  ;;  %v6151_v27 = vmul.f32 %v4554_v7, %v3081_v15  ;;  %v4556_v25 = vpop.eup %4555 }
 0x6a9   : > { %v4255_v26 = vpop.f32.mrb[79].mxu0  ;;  %3265 = vadd.xlane.f32.xlu1 %v3246_v52  ;;  %6538 = vst [vmem:[#allocation17_spill] sm:$0xff] %v6146_v61  ;;  %v3250_v46 = vmul.f32 %v5980_v48, %v6146_v61  ;;  %v6156_v53 = vmul.f32 %v4556_v25, %v3084_v39  ;;  %v4558_v29 = vpop.eup %4557 }
 0x6aa   : > { %3267 = vadd.xlane.f32.xlu0 %v3247_v8  ;;  %6539 = vst [vmem:[#allocation18_spill] sm:$0xff] %v6151_v27  ;;  %v3251_v15 = vmul.f32 %v5980_v48, %v6151_v27  ;;  %v6165_v32 = vmul.f32 %v4558_v29, %v3125_v60  ;;  %v4560_v6 = vpop.eup %4559  ;;  %v2054_v38 = vpop.xlane.xlu1 %2053  ;;  %v4362_v26 = vld [vmem:[#allocation9 + $0x28] sm:$0xff]   ;;  %v4363_v29 = vld [vmem:[#allocation9 + $0x30] sm:$0xff]  }
 0x6ab   : > { %6540 = vst [vmem:[#allocation19_spill] sm:$0xff] %v6156_v53  ;;  %v3252_v22 = vmul.f32 %v5980_v48, %v6156_v53  ;;  %v6169_v39 = vmul.f32 %v4560_v6, %v3128_v17  ;;  %v4562_v30 = vpop.eup %4561  ;;  %v2052_v9 = vpop.xlane.xlu0 %2051 }
 0x6ac   : > { %6542 = vst [vmem:[#allocation21_spill] sm:$0xff] %v6165_v32  ;;  %v3253_v11 = vmul.f32 %v5980_v48, %v6165_v32  ;;  %v6173_v56 = vmul.f32 %v4562_v30, %v3169_v14  ;;  %v4564_v18 = vpop.eup %4563  ;;  %v2089_v19 = vmax.f32 %v2052_v9, %v2054_v38  ;;  %v4364_v30 = vld [vmem:[#allocation9 + $0x38] sm:$0xff]  }
 0x6ad   : > { %3269 = vadd.xlane.f32.xlu1 %v3248_v13  ;;  %6543 = vst [vmem:[#allocation22_spill] sm:$0xff] %v6169_v39  ;;  %v3254_v34 = vmul.f32 %v5980_v48, %v6169_v39  ;;  %v6177_v60 = vmul.f32 %v4564_v18, %v3172_v16  ;;  %v4566_v24 = vpop.eup %4565  ;;  %v4358_v16 = vld [vmem:[#allocation9 + $0x8] sm:$0xff]  }
 0x6ae   : > { %3271 = vadd.xlane.f32.xlu0 %v3249_v50  ;;  %6544 = vst [vmem:[#allocation23_spill] sm:$0xff] %v6173_v56  ;;  %v3255_v23 = vmul.f32 %v5980_v48, %v6173_v56  ;;  %v6181_v17 = vmul.f32 %v4566_v24, %v3213_v47  ;;  %v4568_v45 = vpop.eup %4567  ;;  %4259 = vmatpush3.bf16.msra.mxu1 %v4358_v16  ;;  %v2090_v52 = vrot.slane %v2089_v19, 4  ;;  %v2058_v47 = vpop.xlane.xlu1 %2057 }
 0x6af   : > { %6545 = vst [vmem:[#allocation24_spill] sm:$0xff] %v6177_v60  ;;  %v3256_v43 = vmul.f32 %v5980_v48, %v6177_v60  ;;  %v6185_v55 = vmul.f32 %v4568_v45, %v3216_v0  ;;  %4260 = vmatprep.subr.bf16.mxu1 %v4816_v63  ;;  %v2056_v33 = vpop.xlane.xlu0 %2055  ;;  %v4361_v0 = vld [vmem:[#allocation9 + $0x20] sm:$0xff]  }
 0x6b0   : > { %6546 = vst [vmem:[#allocation25_spill] sm:$0xff] %v6181_v17  ;;  %v3257_v14 = vmul.f32 %v5980_v48, %v6181_v17  ;;  %v2091_v28 = vmax.f32 %v2089_v19, %v2090_v52  ;;  %v2096_v8 = vmax.f32 %v2056_v33, %v2058_v47 }
 0x6b1   : > { %3273 = vadd.xlane.f32.xlu1 %v3250_v46  ;;  %6547 = vst [vmem:[#allocation26_spill] sm:$0xff] %v6185_v55  ;;  %v3258_v5 = vmul.f32 %v5980_v48, %v6185_v55  ;;  %v4360_v48 = vld [vmem:[#allocation9 + $0x18] sm:$0xff]  }
 0x6b2   : > { %3275 = vadd.xlane.f32.xlu0 %v3251_v15  ;;  %4261 = vmatpush3.bf16.msra.mxu1 %v4359_v40  ;;  %v2092_v21 = vrot.slane %v2091_v28, 2  ;;  %v6195_v13 = vpop.xlane.xlu1 %2061  ;;  %v2097_v7 = vrot.slane %v2096_v8, 4 }
 0x6b3   : > { %4262 = vmatprep.subr.bf16.mxu1 %v4816_v63  ;;  %v6198_v50 = vpop.xlane.xlu0 %2059 }
 0x6b4   : > { %v2093_v25 = vmax.f32 %v2091_v28, %v2092_v21  ;;  %v2103_v46 = vmax.f32 %v6198_v50, %v6195_v13  ;;  %v2098_v15 = vmax.f32 %v2096_v8, %v2097_v7 }
 0x6b5   : > { %3277 = vadd.xlane.f32.xlu1 %v3252_v22 }
 0x6b6   : > { %3279 = vadd.xlane.f32.xlu0 %v3253_v11  ;;  %4263 = vmatpush3.bf16.msra.mxu1 %v4360_v48  ;;  %v2094_v6 = vrot.slane %v2093_v25, 1  ;;  %v2104_v22 = vrot.slane %v2103_v46, 4  ;;  %v6203_v11 = vpop.xlane.xlu1 %2065  ;;  %v2099_v18 = vrot.slane %v2098_v15, 2 }
 0x6b7   : > { %4264 = vmatprep.subr.bf16.mxu1 %v4816_v63 }
 0x6b8   : > { %v2095_v24 = vmax.f32 %v2093_v25, %v2094_v6 }
 0x6b9   : > { %3281 = vadd.xlane.f32.xlu1 %v3254_v34  ;;  %v6206_v34 = vpop.xlane.xlu0 %2063 }
 0x6ba   : > { %3283 = vadd.xlane.f32.xlu0 %v3255_v23  ;;  %4265 = vmatpush3.bf16.msra.mxu1 %v4361_v0  ;;  %v2105_v23 = vmax.f32 %v2103_v46, %v2104_v22  ;;  %v2110_v45 = vmax.f32 %v6206_v34, %v6203_v11  ;;  %v2136_v19 = vsub.f32 %v2054_v38, %v2095_v24 }
 0x6bb   : > { %4266 = vmatprep.subr.bf16.mxu1 %v4816_v63 }
 0x6bc   : > { %v2106_v44 = vrot.slane %v2105_v23, 2  ;;  %v2111_v16 = vrot.slane %v2110_v45, 4  ;;  %v2157_v0 = vmul.f32 1.442695, %v2136_v19 }
 0x6bd   : > { %3285 = vadd.xlane.f32.xlu1 %v3256_v43  ;;  %v2100_v43 = vmax.f32 %v2098_v15, %v2099_v18  ;;  %v6212_v40 = vpop.xlane.xlu0 %2067 }
 0x6be   : > { %3287 = vadd.xlane.f32.xlu0 %v3257_v14  ;;  %4267 = vmatpush3.bf16.msra.mxu1 %v4362_v26  ;;  %v6210_v14 = vpop.xlane.xlu1 %2069  ;;  %v2107_v28 = vmax.f32 %v2105_v23, %v2106_v44  ;;  %v2112_v8 = vmax.f32 %v2110_v45, %v2111_v16 }
 0x6bf   : > { %4268 = vmatprep.subr.bf16.mxu1 %v4816_v63  ;;  %v2101_v52 = vrot.slane %v2100_v43, 1 }
 0x6c0   : > { %v2108_v25 = vrot.slane %v2107_v28, 1 }
 0x6c1   : > { %3289 = vadd.xlane.f32.xlu1 %v3258_v5  ;;  %v2135_v5 = vsub.f32 %v2052_v9, %v2095_v24  ;;  %v2102_v21 = vmax.f32 %v2100_v43, %v2101_v52  ;;  %v6216_v7 = vpop.xlane.xlu0 %2071  ;;  %v2113_v9 = vrot.slane %v2112_v8, 2 }
 0x6c2   : > { %4269 = vmatpush3.bf16.msra.mxu1 %v4363_v29  ;;  %v6218_v46 = vpop.xlane.xlu1 %2073  ;;  %v2109_v22 = vmax.f32 %v2107_v28, %v2108_v25 }
 0x6c3   : > { %4270 = vmatprep.subr.bf16.mxu1 %v4816_v63  ;;  %v2117_v63 = vmax.f32 %v6212_v40, %v6210_v14  ;;  %v2155_v48 = vmul.f32 1.442695, %v2135_v5  ;;  %v2137_v38 = vsub.f32 %v2056_v33, %v2102_v21  ;;  %v2138_v15 = vsub.f32 %v2058_v47, %v2102_v21 }
 0x6c4   : > { %v2124_v43 = vmax.f32 %v6216_v7, %v6218_v46  ;;  %v2139_v44 = vsub.f32 %v6198_v50, %v2109_v22 }
 0x6c5   : > { %v2118_v26 = vrot.slane %v2117_v63, 4  ;;  %4569 = vpow2.f32 %v2155_v48  ;;  %v2159_v24 = vmul.f32 1.442695, %v2137_v38  ;;  %v2161_v45 = vmul.f32 1.442695, %v2138_v15 }
 0x6c6   : > { %4271 = vmatpush3.bf16.msra.mxu1 %v4364_v30  ;;  %4571 = vpow2.f32 %v2157_v0  ;;  %v2114_v30 = vmax.f32 %v2112_v8, %v2113_v9  ;;  %v2140_v48 = vsub.f32 %v6195_v13, %v2109_v22  ;;  %v2125_v28 = vrot.slane %v2124_v43, 4 }
 0x6c7   : > { %v2119_v29 = vmax.f32 %v2117_v63, %v2118_v26  ;;  %4573 = vpow2.f32 %v2159_v24  ;;  %v2163_v50 = vmul.f32 1.442695, %v2139_v44 }
 0x6c8   : > { %v2115_v16 = vrot.slane %v2114_v30, 1  ;;  %4575 = vpow2.f32 %v2161_v45  ;;  %v2165_v15 = vmul.f32 1.442695, %v2140_v48  ;;  %v2126_v24 = vmax.f32 %v2124_v43, %v2125_v28 }
 0x6c9   : > { %v2120_v23 = vrot.slane %v2119_v29, 2  ;;  %4577 = vpow2.f32 %v2163_v50 }
 0x6ca   : > { %v2116_v21 = vmax.f32 %v2114_v30, %v2115_v16  ;;  %4579 = vpow2.f32 %v2165_v15  ;;  %v2127_v48 = vrot.slane %v2126_v24, 2 }
 0x6cb   : > { %v2121_v52 = vmax.f32 %v2119_v29, %v2120_v23 }
 0x6cc   : > { %v2141_v30 = vsub.f32 %v6206_v34, %v2116_v21  ;;  %v2142_v44 = vsub.f32 %v6203_v11, %v2116_v21  ;;  %v2128_v15 = vmax.f32 %v2126_v24, %v2127_v48 }
 0x6cd   : > { %v2122_v38 = vrot.slane %v2121_v52, 1 }
 0x6ce   : > { %v2169_v50 = vmul.f32 1.442695, %v2142_v44  ;;  %v2129_v48 = vrot.slane %v2128_v15, 1 }
 0x6cf   : > { %v4570_v19 = vpop.eup %4569  ;;  %v2123_v60 = vmax.f32 %v2121_v52, %v2122_v38 }
 0x6d0   : > { %v4572_v63 = vpop.eup %4571  ;;  %v2183_v22 = vmul.f32 %v4570_v19, %v6004_v58 }
 0x6d1   : > { %v2265_v9 = vadd.f32 %v4572_v63, %v4570_v19  ;;  %v2184_v45 = vmul.f32 %v4572_v63, %v6007_v2  ;;  %v4574_v2 = vpop.eup %4573  ;;  %v2167_v63 = vmul.f32 1.442695, %v2141_v30  ;;  %v2143_v52 = vsub.f32 %v6212_v40, %v2123_v60 }
 0x6d2   : > { %v4576_v34 = vpop.eup %4575  ;;  %v2144_v38 = vsub.f32 %v6210_v14, %v2123_v60  ;;  %v2185_v30 = vmul.f32 %v4574_v2, %v6014_v35 }
 0x6d3   : > { %v2266_v17 = vrot.slane %v2265_v9, 4  ;;  %v2209_v19 = vadd.f32 %v2184_v45, %v2183_v22  ;;  %4581 = vpow2.f32 %v2167_v63  ;;  %v4578_v60 = vpop.eup %4577  ;;  %v2171_v24 = vmul.f32 1.442695, %v2143_v52 }
 0x6d4   : > { %4583 = vpow2.f32 %v2169_v50  ;;  %v2173_v44 = vmul.f32 1.442695, %v2144_v38  ;;  %v2272_v63 = vadd.f32 %v4576_v34, %v4574_v2  ;;  %v4580_v50 = vpop.eup %4579  ;;  %v2130_v2 = vmax.f32 %v2128_v15, %v2129_v48 }
 0x6d5   : > { %v2267_v56 = vadd.f32 %v2266_v17, %v2265_v9  ;;  %v2210_v45 = vrot.slane %v2209_v19, 4  ;;  %4585 = vpow2.f32 %v2171_v24 }
 0x6d6   : > { %4587 = vpow2.f32 %v2173_v44  ;;  %v2145_v15 = vsub.f32 %v6216_v7, %v2130_v2 }
 0x6d7   : > { %v2268_v14 = vrot.slane %v2267_v56, 2  ;;  %v6268_v53 = vadd.f32 %v2210_v45, %v2209_v19 }
 0x6d9   : > { %v6275_v31 = vadd.f32 %v2268_v14, %v2267_v56 }
 0x6dd   : > { %v4582_v56 = vpop.eup %4581 }
 0x72e   : > { %v6220_v6 = vpop.xlane.xlu0 %3259 }
 0x732   : > { %v6222_v18 = vpop.xlane.xlu1 %3261 }
 0x733   : > { %v6226_v5 = vpop.xlane.xlu0 %3263  ;;  %v3291_v47 = vmax.f32 %v6220_v6, %v6222_v18 }
 0x735   : > { %v3292_v26 = vrot.slane %v3291_v47, 4 }
 0x736   : > { %v6231_v33 = vpop.xlane.xlu1 %3265 }
 0x737   : > { %v3298_v8 = vmax.f32 %v6226_v5, %v6231_v33  ;;  %v6236_v0 = vpop.xlane.xlu0 %3267  ;;  %v3293_v16 = vmax.f32 %v3291_v47, %v3292_v26 }
 0x739   : > { %v3299_v23 = vrot.slane %v3298_v8, 4  ;;  %v3294_v11 = vrot.slane %v3293_v16, 2 }
 0x73a   : > { %v6238_v25 = vpop.xlane.xlu1 %3269 }
 0x73b   : > { %v3305_v29 = vmax.f32 %v6236_v0, %v6238_v25  ;;  %v6242_v13 = vpop.xlane.xlu0 %3271  ;;  %v3300_v28 = vmax.f32 %v3298_v8, %v3299_v23  ;;  %v3295_v17 = vmax.f32 %v3293_v16, %v3294_v11  ;;  %v2187_v11 = vmul.f32 %v4578_v60, %v6024_v62 }
 0x73c   : > { %v2273_v62 = vrot.slane %v2272_v63, 4 }
 0x73d   : > { %v3306_v49 = vrot.slane %v3305_v29, 4  ;;  %v3301_v39 = vrot.slane %v3300_v28, 2  ;;  %v3296_v27 = vrot.slane %v3295_v17, 1 }
 0x73e   : > { %v6248_v55 = vpop.xlane.xlu1 %3273 }
 0x73f   : > { %v3312_v43 = vmax.f32 %v6242_v13, %v6248_v55  ;;  %v6252_v58 = vpop.xlane.xlu0 %3275  ;;  %v3307_v47 = vmax.f32 %v3305_v29, %v3306_v49  ;;  %v2186_v49 = vmul.f32 %v4576_v34, %v6017_v3 }
 0x741   : > { %v3313_v21 = vrot.slane %v3312_v43, 4  ;;  %v3308_v9 = vrot.slane %v3307_v47, 2  ;;  %v2216_v3 = vadd.f32 %v2186_v49, %v2185_v30  ;;  %v3297_v30 = vmax.f32 %v3295_v17, %v3296_v27 }
 0x742   : > { %v6254_v26 = vpop.xlane.xlu1 %3277 }
 0x743   : > { %v3314_v8 = vmax.f32 %v3312_v43, %v3313_v21  ;;  %v3319_v23 = vmax.f32 %v6252_v58, %v6254_v26  ;;  %v6260_v22 = vpop.xlane.xlu0 %3279  ;;  %v3302_v21 = vmax.f32 %v3300_v28, %v3301_v39  ;;  %v3309_v61 = vmax.f32 %v3307_v47, %v3308_v9 }
 0x744   : > { %v2188_v47 = vmul.f32 %v4580_v50, %v6027_v4  ;;  %v2274_v4 = vadd.f32 %v2273_v62, %v2272_v63  ;;  %v3347_v27 = vsub.f32 %v6220_v6, %v3297_v30  ;;  %v3348_v7 = vsub.f32 %v6222_v18, %v3297_v30 }
 0x745   : > { %v3320_v40 = vrot.slane %v3319_v23, 4  ;;  %v3315_v32 = vrot.slane %v3314_v8, 2  ;;  %v3303_v19 = vrot.slane %v3302_v21, 1  ;;  %v3310_v49 = vrot.slane %v3309_v61, 1 }
 0x746   : > { %v6264_v29 = vpop.xlane.xlu1 %3281  ;;  %v6285_v36 = vadd.f32 %v2188_v47, %v2187_v11 }
 0x747   : > { %v3326_v43 = vmax.f32 %v6260_v22, %v6264_v29  ;;  %v3321_v35 = vmax.f32 %v3319_v23, %v3320_v40  ;;  %v6271_v52 = vpop.xlane.xlu0 %3283  ;;  %v3316_v34 = vmax.f32 %v3314_v8, %v3315_v32  ;;  %v2217_v23 = vrot.slane %v2216_v3, 4 }
 0x748   : > { %v3304_v44 = vmax.f32 %v3302_v21, %v3303_v19  ;;  %v3311_v17 = vmax.f32 %v3309_v61, %v3310_v49  ;;  %v2175_v21 = vmul.f32 1.442695, %v2145_v15 }
 0x749   : > { %v3327_v16 = vrot.slane %v3326_v43, 4  ;;  %v3322_v42 = vrot.slane %v3321_v35, 2  ;;  %v3317_v32 = vrot.slane %v3316_v34, 1  ;;  %v6283_v48 = vadd.f32 %v2217_v23, %v2216_v3 }
 0x74a   : > { %v6273_v38 = vpop.xlane.xlu1 %3285  ;;  %v3349_v3 = vsub.f32 %v6226_v5, %v3304_v44  ;;  %v3350_v61 = vsub.f32 %v6231_v33, %v3304_v44  ;;  %v3351_v23 = vsub.f32 %v6236_v0, %v3311_v17  ;;  %v3352_v5 = vsub.f32 %v6238_v25, %v3311_v17 }
 0x74b   : > { %v3328_v39 = vmax.f32 %v3326_v43, %v3327_v16  ;;  %v3333_v28 = vmax.f32 %v6271_v52, %v6273_v38  ;;  %v3323_v9 = vmax.f32 %v3321_v35, %v3322_v42  ;;  %v2279_v43 = vadd.f32 %v4580_v50, %v4578_v60  ;;  %v4584_v16 = vpop.eup %4583 }
 0x74c   : > { %v2146_v42 = vsub.f32 %v6218_v46, %v2130_v2  ;;  %v2189_v60 = vmul.f32 %v4582_v56, %v6034_v41  ;;  %v2286_v50 = vadd.f32 %v4584_v16, %v4582_v56  ;;  %v4586_v11 = vpop.eup %4585  ;;  %v2219_v19 = vrot.slane %v6283_v48, 2 }
 0x74d   : > { %v3329_v45 = vrot.slane %v3328_v39, 2  ;;  %v3334_v40 = vrot.slane %v3333_v28, 4  ;;  %v3324_v35 = vrot.slane %v3323_v9, 1  ;;  %v2280_v24 = vrot.slane %v2279_v43, 4  ;;  %v4588_v6 = vpop.eup %4587 }
 0x74e   : > { %v2275_v46 = vrot.slane %v2274_v4, 2  ;;  %v2177_v2 = vmul.f32 1.442695, %v2146_v42  ;;  %v2287_v18 = vrot.slane %v2286_v50, 4  ;;  %4589 = vpow2.f32 %v2175_v21 }
 0x74f   : > { %v3330_v8 = vmax.f32 %v3328_v39, %v3329_v45  ;;  %v3335_v14 = vmax.f32 %v3333_v28, %v3334_v40  ;;  %v3318_v39 = vmax.f32 %v3316_v34, %v3317_v32  ;;  %v3363_v28 = vmul.f32 1.442695, %v3347_v27 }
 0x750   : > { %v3325_v41 = vmax.f32 %v3323_v9, %v3324_v35  ;;  %v2281_v47 = vadd.f32 %v2280_v24, %v2279_v43  ;;  %v3365_v45 = vmul.f32 1.442695, %v3348_v7  ;;  %v3367_v34 = vmul.f32 1.442695, %v3349_v3  ;;  %v6305_v3 = vpop.xlane.xlu1 %3289 }
 0x751   : > { %v3331_v63 = vrot.slane %v3330_v8, 1  ;;  %v3336_v62 = vrot.slane %v3335_v14, 2  ;;  %v3353_v30 = vsub.f32 %v6242_v13, %v3318_v39  ;;  %v2293_v40 = vadd.f32 %v4588_v6, %v4586_v11 }
 0x752   : > { %4591 = vpow2.f32 %v2177_v2  ;;  %v3369_v56 = vmul.f32 1.442695, %v3350_v61  ;;  %v3354_v33 = vsub.f32 %v6248_v55, %v3318_v39  ;;  %v3371_v15 = vmul.f32 1.442695, %v3351_v23 }
 0x753   : > { %v3332_v49 = vmax.f32 %v3330_v8, %v3331_v63  ;;  %4593 = vpow2.f32 %v3363_v28  ;;  %v3355_v0 = vsub.f32 %v6252_v58, %v3325_v41  ;;  %v3337_v9 = vmax.f32 %v3335_v14, %v3336_v62  ;;  %v6313_v28 = vpop.xlane.xlu0 %3287 }
 0x754   : > { %v2288_v24 = vadd.f32 %v2287_v18, %v2286_v50  ;;  %4595 = vpow2.f32 %v3365_v45  ;;  %v3373_v43 = vmul.f32 1.442695, %v3352_v5  ;;  %v3356_v25 = vsub.f32 %v6254_v26, %v3325_v41 }
 0x755   : > { %v2190_v44 = vmul.f32 %v4584_v16, %v6037_v10  ;;  %4597 = vpow2.f32 %v3367_v34  ;;  %v3375_v13 = vmul.f32 1.442695, %v3353_v30  ;;  %v3357_v32 = vsub.f32 %v6260_v22, %v3332_v49 }
 0x756   : > { %v2282_v8 = vrot.slane %v2281_v47, 2  ;;  %4599 = vpow2.f32 %v3369_v56  ;;  %v3377_v42 = vmul.f32 1.442695, %v3354_v33  ;;  %v3358_v55 = vsub.f32 %v6264_v29, %v3332_v49 }
 0x757   : > { %v2294_v27 = vrot.slane %v2293_v40, 4  ;;  %4601 = vpow2.f32 %v3371_v15  ;;  %v3379_v58 = vmul.f32 1.442695, %v3355_v0  ;;  %v3338_v14 = vrot.slane %v3337_v9, 1 }
 0x758   : > { %v2224_v17 = vrot.slane %v6285_v36, 4  ;;  %v2289_v35 = vrot.slane %v2288_v24, 2  ;;  %4603 = vpow2.f32 %v3373_v43  ;;  %v3381_v26 = vmul.f32 1.442695, %v3356_v25  ;;  %v4590_v29 = vpop.eup %4589 }
 0x759   : > { %v2276_v50 = vadd.f32 %v2275_v46, %v2274_v4  ;;  %v2230_v10 = vadd.f32 %v2190_v44, %v2189_v60  ;;  %4605 = vpow2.f32 %v3375_v13  ;;  %v3383_v16 = vmul.f32 1.442695, %v3357_v32 }
 0x75a   : > { %v2283_v7 = vadd.f32 %v2282_v8, %v2281_v47  ;;  %v2191_v22 = vmul.f32 %v4586_v11, %v6044_v37  ;;  %4607 = vpow2.f32 %v3377_v42  ;;  %v3385_v21 = vmul.f32 1.442695, %v3358_v55 }
 0x75b   : > { %v2192_v39 = vmul.f32 %v4588_v6, %v6047_v59  ;;  %v2295_v63 = vadd.f32 %v2294_v27, %v2293_v40  ;;  %4609 = vpow2.f32 %v3379_v58  ;;  %v3339_v2 = vmax.f32 %v3337_v9, %v3338_v14 }
 0x75c   : > { %v4592_v61 = vpop.eup %4591  ;;  %v6548_v4 = vrot.slane %v6268_v53, 2  ;;  %v2290_v46 = vadd.f32 %v2289_v35, %v2288_v24  ;;  %4611 = vpow2.f32 %v3381_v26  ;;  %v6549_v11 = vrot.slane %v6275_v31, 1 }
 0x75d   : > { %v6315_v37 = vpop.eup %4593  ;;  %v2277_v59 = vrot.slane %v2276_v50, 1  ;;  %4613 = vpow2.f32 %v3383_v16  ;;  %v3340_v6 = vmax.f32 %v6313_v28, %v6305_v3  ;;  %v2284_v62 = vrot.slane %v2283_v7, 1 }
 0x75e   : > { %v6311_v60 = vadd.f32 %v6548_v4, %v6268_v53  ;;  %v2271_v23 = vadd.f32 %v6549_v11, %v6275_v31  ;;  %v6322_v41 = vpop.eup %4595  ;;  %v2225_v53 = vadd.f32 %v2224_v17, %v6285_v36  ;;  %v2231_v47 = vrot.slane %v2230_v10, 4 }
 0x75f   : > { %4615 = vpow2.f32 %v3385_v21  ;;  %v4598_v18 = vpop.eup %4597  ;;  %v6328_v45 = vadd.f32 %v2219_v19, %v6283_v48  ;;  %v2237_v5 = vadd.f32 %v2192_v39, %v2191_v22  ;;  %v2296_v31 = vrot.slane %v2295_v63, 2 }
 0x760   : > { %v3359_v34 = vsub.f32 %v6271_v52, %v3339_v2  ;;  %v4600_v30 = vpop.eup %4599  ;;  %v2214_v49 = vrot.slane %v6311_v60, 1  ;;  %v2291_v40 = vrot.slane %v2290_v46, 1  ;;  %v2300_v56 = vadd.f32 %v4592_v61, %v4590_v29 }
 0x761   : > { %v6332_v33 = vpop.eup %4601  ;;  %4617 = vrcp.f32 %v2271_v23  ;;  %v2278_v36 = vadd.f32 %v2277_v59, %v2276_v50  ;;  %v3360_v15 = vsub.f32 %v6273_v38, %v3339_v2  ;;  %v3341_v0 = vrot.slane %v3340_v6, 4 }
 0x762   : > { %v4604_v9 = vpop.eup %4603  ;;  %v2226_v24 = vrot.slane %v2225_v53, 2  ;;  %v2285_v48 = vadd.f32 %v2284_v62, %v2283_v7  ;;  %v6335_v19 = vadd.f32 %v2231_v47, %v2230_v10  ;;  %v3467_v52 = vadd.f32 %v6322_v41, %v6315_v37 }
 0x763   : > { %v6339_v43 = vpop.eup %4605  ;;  %v2221_v25 = vrot.slane %v6328_v45, 1  ;;  %v2238_v44 = vrot.slane %v2237_v5, 4  ;;  %v2297_v13 = vadd.f32 %v2296_v31, %v2295_v63  ;;  %v3387_v32 = vmul.f32 1.442695, %v3359_v34 }
 0x764   : > { %v6342_v8 = vpop.eup %4607  ;;  %v2292_v42 = vadd.f32 %v2291_v40, %v2290_v46  ;;  %v2193_v38 = vmul.f32 %v4590_v29, %v6054_v1  ;;  %v2194_v55 = vmul.f32 %v4592_v61, %v6057_v54  ;;  %v2301_v27 = vrot.slane %v2300_v56, 4 }
 0x765   : > { %v6346_v58 = vpop.eup %4609  ;;  %4619 = vrcp.f32 %v2278_v36  ;;  %v3474_v14 = vadd.f32 %v4600_v30, %v4598_v18  ;;  %v3389_v17 = vmul.f32 1.442695, %v3360_v15  ;;  %v3342_v35 = vmax.f32 %v3340_v6, %v3341_v0  ;;  %v6550_v0 = vld [vmem:[#allocation14_spill] sm:$0xff] }
 0x766   : > { %v6348_v26 = vpop.eup %4611  ;;  %v6350_v50 = vadd.f32 %v2226_v24, %v2225_v53  ;;  %4621 = vrcp.f32 %v2285_v48  ;;  %v2233_v10 = vrot.slane %v6335_v19, 2  ;;  %v3468_v16 = vrot.slane %v3467_v52, 4 }
 0x767   : > { %v6353_v7 = vpop.eup %4613  ;;  %v6355_v1 = vadd.f32 %v2238_v44, %v2237_v5  ;;  %v2298_v54 = vrot.slane %v2297_v13, 1  ;;  %4623 = vpow2.f32 %v3387_v32  ;;  %v3343_v22 = vrot.slane %v3342_v35, 2  ;;  %v6551_v44 = vld [vmem:[#allocation15_spill] sm:$0xff] }
 0x768   : > { %4625 = vrcp.f32 %v2292_v42  ;;  %v2244_v29 = vadd.f32 %v2194_v55, %v2193_v38  ;;  %v2302_v39 = vadd.f32 %v2301_v27, %v2300_v56  ;;  %v3481_v63 = vadd.f32 %v4604_v9, %v6332_v33 }
 0x769   : > { %v6357_v21 = vpop.eup %4615  ;;  %v3475_v2 = vrot.slane %v3474_v14, 4  ;;  %v3488_v61 = vadd.f32 %v6342_v8, %v6339_v43  ;;  %4627 = vpow2.f32 %v3389_v17  ;;  %v3344_v4 = vmax.f32 %v3342_v35, %v3343_v22 }
 0x76a   : > { %v3469_v46 = vadd.f32 %v3468_v16, %v3467_v52  ;;  %v3397_v11 = vmul.f32 %v4598_v18, %v6123_v57  ;;  %v3398_v23 = vmul.f32 %v4600_v30, %v6127_v12  ;;  %v3495_v59 = vadd.f32 %v6348_v26, %v6346_v58 }
 0x76b   : > { %v6366_v6 = vpop.eup %4617  ;;  %v2240_v53 = vrot.slane %v6355_v1, 2  ;;  %v2299_v62 = vadd.f32 %v2298_v54, %v2297_v13  ;;  %v3502_v47 = vadd.f32 %v6357_v21, %v6353_v7  ;;  %v3345_v5 = vrot.slane %v3344_v4, 1 }
 0x76c   : > { %v2245_v31 = vrot.slane %v2244_v29, 4  ;;  %v2303_v34 = vrot.slane %v2302_v39, 2  ;;  %v3395_v40 = vmul.f32 %v6315_v37, %v6114_v51  ;;  %v3482_v57 = vrot.slane %v3481_v63, 4 }
 0x76d   : > { %v3396_v12 = vmul.f32 %v6322_v41, %v6120_v20  ;;  %v3476_v18 = vadd.f32 %v3475_v2, %v3474_v14  ;;  %v3489_v30 = vrot.slane %v3488_v61, 4  ;;  %v3346_v56 = vmax.f32 %v3344_v4, %v3345_v5  ;;  %v6552_v2 = vld [vmem:[#allocation16_spill] sm:$0xff]  ;;  %v6554_v5 = vld [vmem:[#allocation18_spill] sm:$0xff] }
 0x76e   : > { %v3470_v36 = vrot.slane %v3469_v46, 2  ;;  %v3418_v15 = vadd.f32 %v3398_v23, %v3397_v11  ;;  %v3399_v24 = vmul.f32 %v6332_v33, %v6550_v0  ;;  %v3496_v48 = vrot.slane %v3495_v59, 4 }
 0x76f   : > { %v6377_v52 = vpop.eup %4619  ;;  %v3400_v13 = vmul.f32 %v4604_v9, %v6551_v44  ;;  %v3503_v32 = vrot.slane %v3502_v47, 4  ;;  %v3361_v51 = vsub.f32 %v6313_v28, %v3346_v56  ;;  %v3362_v37 = vsub.f32 %v6305_v3, %v3346_v56  ;;  %v6558_v56 = vld [vmem:[#allocation23_spill] sm:$0xff] }
 0x770   : > { %v6382_v42 = vpop.eup %4621  ;;  %4629 = vrcp.f32 %v2299_v62  ;;  %v6384_v20 = vadd.f32 %v2245_v31, %v2244_v29  ;;  %v6386_v41 = vadd.f32 %v2303_v34, %v2302_v39  ;;  %v3483_v38 = vadd.f32 %v3482_v57, %v3481_v63  ;;  %v6553_v63 = vld [vmem:[#allocation17_spill] sm:$0xff]  ;;  %v6555_v31 = vld [vmem:[#allocation19_spill] sm:$0xff] }
 0x771   : > { %v4624_v55 = vpop.eup %4623  ;;  %v3477_v33 = vrot.slane %v3476_v18, 2  ;;  %v3490_v27 = vadd.f32 %v3489_v30, %v3488_v61  ;;  %v3391_v14 = vmul.f32 1.442695, %v3361_v51  ;;  %v3393_v17 = vmul.f32 1.442695, %v3362_v37 }
 0x772   : > { %v6388_v35 = vpop.eup %4625  ;;  %v3411_v9 = vadd.f32 %v3396_v12, %v3395_v40  ;;  %v3471_v16 = vadd.f32 %v3470_v36, %v3469_v46  ;;  %v3419_v28 = vrot.slane %v3418_v15, 4  ;;  %v3497_v54 = vadd.f32 %v3496_v48, %v3495_v59  ;;  %v6556_v40 = vld [vmem:[#allocation21_spill] sm:$0xff] }
 0x773   : > { %v4628_v3 = vpop.eup %4627  ;;  %v3425_v22 = vadd.f32 %v3400_v13, %v3399_v24  ;;  %v3401_v29 = vmul.f32 %v6339_v43, %v6552_v2  ;;  %v3504_v4 = vadd.f32 %v3503_v32, %v3502_v47  ;;  %4631 = vpow2.f32 %v3391_v14  ;;  %v6557_v47 = vld [vmem:[#allocation22_spill] sm:$0xff] }
 0x774   : > { %v3484_v39 = vrot.slane %v3483_v38, 2  ;;  %v3402_v11 = vmul.f32 %v6342_v8, %v6553_v63  ;;  %v3509_v61 = vadd.f32 %v4628_v3, %v4624_v55  ;;  %4633 = vpow2.f32 %v3393_v17 }
 0x775   : > { %v3478_v23 = vadd.f32 %v3477_v33, %v3476_v18  ;;  %v3491_v62 = vrot.slane %v3490_v27, 2  ;;  %v3403_v46 = vmul.f32 %v6346_v58, %v6554_v5  ;;  %v3404_v59 = vmul.f32 %v6348_v26, %v6555_v31  ;;  %v6559_v18 = vld [vmem:[#allocation24_spill] sm:$0xff]  ;;  %v6560_v31 = vld [vmem:[#allocation25_spill] sm:$0xff] }
 0x776   : > { %v3498_v34 = vrot.slane %v3497_v54, 2  ;;  %v3405_v43 = vmul.f32 %v6353_v7, %v6556_v40  ;;  %v3406_v57 = vmul.f32 %v6357_v21, %v6557_v47  ;;  %v3510_v12 = vrot.slane %v3509_v61, 4 }
 0x777   : > { %v3412_v30 = vrot.slane %v3411_v9, 4  ;;  %v3505_v8 = vrot.slane %v3504_v4, 2  ;;  %v3407_v36 = vmul.f32 %v4624_v55, %v6558_v56  ;;  %v3408_v0 = vmul.f32 %v4628_v3, %v6559_v18 }
 0x778   : > { %v3472_v24 = vrot.slane %v3471_v16, 1  ;;  %v3485_v48 = vadd.f32 %v3484_v39, %v3483_v38  ;;  %v3432_v58 = vadd.f32 %v3402_v11, %v3401_v29  ;;  %v3511_v44 = vadd.f32 %v3510_v12, %v3509_v61 }
 0x779   : > { %v3420_v13 = vadd.f32 %v3419_v28, %v3418_v15  ;;  %v3426_v26 = vrot.slane %v3425_v22, 4  ;;  %v3492_v32 = vadd.f32 %v3491_v62, %v3490_v27  ;;  %v3439_v51 = vadd.f32 %v3404_v59, %v3403_v46 }
 0x77a   : > { %v6404_v37 = vpop.eup %4629  ;;  %v3479_v7 = vrot.slane %v3478_v23, 1  ;;  %v3499_v33 = vadd.f32 %v3498_v34, %v3497_v54  ;;  %v3446_v21 = vadd.f32 %v3406_v57, %v3405_v43  ;;  %v3512_v14 = vrot.slane %v3511_v44, 2 }
 0x77b   : > { %v2305_v17 = vrot.slane %v6386_v41, 1  ;;  %v3413_v2 = vadd.f32 %v3412_v30, %v3411_v9  ;;  %v3506_v55 = vadd.f32 %v3505_v8, %v3504_v4  ;;  %v3453_v63 = vadd.f32 %v3408_v0, %v3407_v36  ;;  %v6561_v9 = vld [vmem:[#allocation26_spill] sm:$0xff] }
 0x77c   : > { %v3473_v3 = vadd.f32 %v3472_v24, %v3471_v16  ;;  %v3486_v5 = vrot.slane %v3485_v48, 1  ;;  %v3433_v38 = vrot.slane %v3432_v58, 4  ;;  %v3513_v29 = vadd.f32 %v3512_v14, %v3511_v44 }
 0x77d   : > { %v4632_v39 = vpop.eup %4631  ;;  %v3421_v15 = vrot.slane %v3420_v13, 2  ;;  %v3427_v28 = vadd.f32 %v3426_v26, %v3425_v22  ;;  %v3493_v27 = vrot.slane %v3492_v32, 1  ;;  %v3440_v11 = vrot.slane %v3439_v51, 4 }
 0x77e   : > { %v4634_v61 = vpop.eup %4633  ;;  %v3480_v62 = vadd.f32 %v3479_v7, %v3478_v23  ;;  %v3500_v46 = vrot.slane %v3499_v33, 1  ;;  %v3447_v54 = vrot.slane %v3446_v21, 4  ;;  %v3409_v59 = vmul.f32 %v4632_v39, %v6560_v31 }
 0x77f   : > { %v3507_v34 = vrot.slane %v3506_v55, 1  ;;  %v3454_v40 = vrot.slane %v3453_v63, 4  ;;  %v3410_v4 = vmul.f32 %v4634_v61, %v6561_v9  ;;  %v3516_v43 = vadd.f32 %v4634_v61, %v4632_v39 }
 0x780   : > { %4635 = vrcp.f32 %v3473_v3  ;;  %v3487_v16 = vadd.f32 %v3486_v5, %v3485_v48  ;;  %v3434_v47 = vadd.f32 %v3433_v38, %v3432_v58  ;;  %v3514_v57 = vrot.slane %v3513_v29, 1 }
 0x781   : > { %v3494_v12 = vadd.f32 %v3493_v27, %v3492_v32  ;;  %v3441_v30 = vadd.f32 %v3440_v11, %v3439_v51  ;;  %v3460_v22 = vadd.f32 %v3410_v4, %v3409_v59  ;;  %v3517_v8 = vrot.slane %v3516_v43, 4 }
 0x782   : > { %4637 = vrcp.f32 %v3480_v62  ;;  %v3428_v56 = vrot.slane %v3427_v28, 2  ;;  %v3501_v23 = vadd.f32 %v3500_v46, %v3499_v33  ;;  %v3448_v36 = vadd.f32 %v3447_v54, %v3446_v21 }
 0x783   : > { %v3508_v18 = vadd.f32 %v3507_v34, %v3506_v55  ;;  %v3455_v0 = vadd.f32 %v3454_v40, %v3453_v63  ;;  %v3461_v24 = vrot.slane %v3460_v22, 4  ;;  %v3518_v44 = vadd.f32 %v3517_v8, %v3516_v43 }
 0x784   : > { %v3414_v26 = vrot.slane %v3413_v2, 2  ;;  %4639 = vrcp.f32 %v3487_v16  ;;  %v3435_v7 = vrot.slane %v3434_v47, 2  ;;  %v3515_v14 = vadd.f32 %v3514_v57, %v3513_v29 }
 0x785   : > { %v2306_v48 = vadd.f32 %v2305_v17, %v6386_v41  ;;  %4641 = vrcp.f32 %v3494_v12  ;;  %v3442_v58 = vrot.slane %v3441_v30, 2  ;;  %v3519_v32 = vrot.slane %v3518_v44, 2 }
 0x786   : > { %v3422_v51 = vadd.f32 %v3421_v15, %v3420_v13  ;;  %4643 = vrcp.f32 %v3501_v23  ;;  %v3449_v3 = vrot.slane %v3448_v36, 2  ;;  %v3462_v5 = vadd.f32 %v3461_v24, %v3460_v22 }
 0x787   : > { %v3429_v38 = vadd.f32 %v3428_v56, %v3427_v28  ;;  %4645 = vrcp.f32 %v3508_v18  ;;  %v3456_v33 = vrot.slane %v3455_v0, 2  ;;  %v3520_v21 = vadd.f32 %v3519_v32, %v3518_v44 }
 0x788   : > { %v3415_v55 = vadd.f32 %v3414_v26, %v3413_v2  ;;  %v3436_v63 = vadd.f32 %v3435_v7, %v3434_v47  ;;  %4647 = vrcp.f32 %v3515_v14  ;;  %v2247_v39 = vrot.slane %v6384_v20, 2 }
 0x789   : > { %v2234_v41 = vadd.f32 %v2233_v10, %v6335_v19  ;;  %4649 = vrcp.f32 %v2306_v48  ;;  %v3443_v17 = vadd.f32 %v3442_v58, %v3441_v30  ;;  %v3521_v29 = vrot.slane %v3520_v21, 1 }
 0x78a   : > { %v4636_v13 = vpop.eup %4635  ;;  %v2228_v15 = vrot.slane %v6350_v50, 1  ;;  %v3423_v27 = vrot.slane %v3422_v51, 1  ;;  %v3450_v28 = vadd.f32 %v3449_v3, %v3448_v36  ;;  %v3463_v11 = vrot.slane %v3462_v5, 2 }
 0x78b   : > { %v3430_v61 = vrot.slane %v3429_v38, 1  ;;  %v3522_v2 = vadd.f32 %v3521_v29, %v3520_v21  ;;  %v2241_v62 = vadd.f32 %v2240_v53, %v6355_v1  ;;  %v3457_v46 = vadd.f32 %v3456_v33, %v3455_v0 }
 0x78c   : > { %v4638_v54 = vpop.eup %4637  ;;  %v2215_v19 = vadd.f32 %v2214_v49, %v6311_v60  ;;  %v3416_v10 = vrot.slane %v3415_v55, 1  ;;  %v3437_v31 = vrot.slane %v3436_v63, 1  ;;  %v2248_v59 = vadd.f32 %v2247_v39, %v6384_v20 }
 0x78d   : > { %v2222_v34 = vadd.f32 %v2221_v25, %v6328_v45  ;;  %v3444_v40 = vrot.slane %v3443_v17, 1  ;;  %4651 = vrcp.f32 %v3522_v2  ;;  %v2235_v9 = vrot.slane %v2234_v41, 1 }
 0x78e   : > { %v4640_v1 = vpop.eup %4639  ;;  %v2317_v53 = vmul.f32 %v6366_v6, %v2215_v19  ;;  %v3424_v4 = vadd.f32 %v3423_v27, %v3422_v51  ;;  %v3451_v43 = vrot.slane %v3450_v28, 1  ;;  %v3464_v60 = vadd.f32 %v3463_v11, %v3462_v5 }
 0x78f   : > { %v4642_v49 = vpop.eup %4641  ;;  %v3431_v16 = vadd.f32 %v3430_v61, %v3429_v38  ;;  %v2229_v20 = vadd.f32 %v2228_v15, %v6350_v50  ;;  %v2242_v47 = vrot.slane %v2241_v62, 1  ;;  %v3458_v57 = vrot.slane %v3457_v46, 1  ;;  %v6562_v38 = vld [vmem:[#allocation20_spill] sm:$0xff] }
 0x790   : > { %v4644_v12 = vpop.eup %4643  ;;  %v3417_v30 = vadd.f32 %v3416_v10, %v3415_v55  ;;  %v3532_v45 = vmul.f32 %v4638_v54, %v3424_v4  ;;  %v3438_v25 = vadd.f32 %v3437_v31, %v3436_v63  ;;  %v2249_v22 = vrot.slane %v2248_v59, 1 }
 0x791   : > { %v4646_v8 = vpop.eup %4645  ;;  %v3533_v56 = vmul.f32 %v4640_v1, %v3431_v16  ;;  %v2236_v23 = vadd.f32 %v2235_v9, %v2234_v41  ;;  %v2318_v6 = vmul.f32 %v6377_v52, %v2222_v34  ;;  %v3445_v36 = vadd.f32 %v3444_v40, %v3443_v17 }
 0x792   : > { %v4648_v18 = vpop.eup %4647  ;;  %v3531_v0 = vmul.f32 %v4636_v13, %v3417_v30  ;;  %v3452_v24 = vadd.f32 %v3451_v43, %v3450_v28  ;;  %v3465_v44 = vrot.slane %v3464_v60, 1  ;;  %v3534_v26 = vmul.f32 %v4642_v49, %v3438_v25 }
 0x793   : > { %v4650_v7 = vpop.eup %4649  ;;  %v2243_v50 = vadd.f32 %v2242_v47, %v2241_v62  ;;  %v2319_v14 = vmul.f32 %v6382_v42, %v2229_v20  ;;  %v3459_v48 = vadd.f32 %v3458_v57, %v3457_v46  ;;  %v3535_v58 = vmul.f32 %v4644_v12, %v3445_v36  ;;  %v3823_v62 = vld [vmem:[%s6504_s7] ss:$0 sm:$0xff] }
 0x794   : > { %v2250_v32 = vadd.f32 %v2249_v22, %v2248_v59  ;;  %v2320_v51 = vmul.f32 %v6388_v35, %v2236_v23  ;;  %v3536_v3 = vmul.f32 %v4646_v8, %v3452_v24  ;;  %v3547_v5 = vsel %vm2331_vm2, %v3532_v45, %v3531_v0 }
 0x795   : > { %v2321_v52 = vmul.f32 %v6404_v37, %v2243_v50  ;;  %v2334_v33 = vsel %vm2333_vm3, %v2317_v53, %v6562_v38  ;;  %v3537_v21 = vmul.f32 %v4648_v18, %v3459_v48  ;;  %v3548_v55 = vsel %vm2333_vm3, %v3533_v56, %v3547_v5 }
 0x796   : > { %v2322_v63 = vmul.f32 %v4650_v7, %v2250_v32  ;;  %v2336_v39 = vsel %vm2335_vm4, %v2318_v6, %v2334_v33  ;;  %v3466_v42 = vadd.f32 %v3465_v44, %v3464_v60  ;;  %v3549_v41 = vsel %vm2335_vm4, %v3534_v26, %v3548_v55 }
 0x797   : > { %v4652_v17 = vpop.eup %4651  ;;  %v2338_v35 = vsel %vm2337_vm5, %v2319_v14, %v2336_v39  ;;  %v3550_v37 = vsel %vm2337_vm5, %v3535_v58, %v3549_v41 }
 0x798   : > { %v2340_v29 = vsel %vm2339_vm6, %v2320_v51, %v2338_v35  ;;  %v3538_v13 = vmul.f32 %v4652_v17, %v3466_v42  ;;  %v3551_v15 = vsel %vm2339_vm6, %v3536_v3, %v3550_v37 }
 0x799   : > { %v2342_v27 = vsel %vm2341_vm7, %v2321_v52, %v2340_v29  ;;  %v3552_v28 = vsel %vm2341_vm7, %v3537_v21, %v3551_v15 }
 0x79a   : > { %v2344_v11 = vsel %vm2343_vm8, %v2322_v63, %v2342_v27  ;;  %v3553_v61 = vsel %vm2343_vm8, %v3538_v13, %v3552_v28 }
 0x79b   : > { %v3559_v2 = vpack.c.bf16 %v3553_v61, %v2344_v11 }
 0x79d   : > { %4273 = vmatmul.mubr.bf16.vlgmr.msra.gmra.mrb[80].mxu1 %v3559_v2 }
 0x870   : > { %v3665_v46 = vpop.f32.mrb[80].mxu1 }
 0x871   : > { %v3666_v54 = vadd.f32 %v3823_v62, %v3665_v46  ;;  %v4274_v19 = vpop.f32.mrb[81].mxu1 }
 0x872   : > { %v3668_v10 = vpop.f32.mrb[82].mxu1 }
 0x873   : > { %3672 = vst [vmem:[%s353_s18] sm:$0xff] %v3666_v54  ;;  %v3669_v31 = vadd.f32 %v3823_v62, %v3668_v10  ;;  %v4275_v59 = vpop.f32.mrb[83].mxu1 }
 0x875   : > { %3673 = vst [vmem:[%s353_s18 + $0x8] sm:$0xff] %v3669_v31 }
 0x876   : > { %4752 = shalt.err (!%p4749_p1)
}
 0x877   : > { %s4753_s24 = scalar_lea.hbm %s6453_s21, 256  ;;  %s4757_s13 = scalar_lea.hbm %s6505_s8, 512 }
 0x878   : > { %p4754_p13 = scmp.ne.s32.totalorder %s6453_s21, %s4753_s24  ;;  %p4758_p4 = scmp.lt.u32.totalorder %s6453_s21, %s6505_s8 }
 0x879   : > { %p4759_p5 = scmp.lt.u32.totalorder %s4757_s13, %s4753_s24  ;;  %p4761_p11 = scmp.lt.u32.totalorder %s4753_s24, %s6453_s21 }
 0x87a   : > { %p4755_p6 = pnand %p4754_p13, %p6563_p0 }
 0x87b   : > { %p4760_p8 = por %p4759_p5, %p4758_p4 }
 0x87c   : > { %p4756_p10 = pneg %p4755_p6 }
 0x87d   : > { %p4762_p2 = por %p4761_p11, %p4760_p8 }
 0x87f   : > { %p4763_p3 = pnand %p4762_p2, %p4756_p10 }
 0x881   : > { %4766 = shalt.err (!%p4763_p3)
}
 0x882   : > { %s4819_s9 = smov 128   ;;  %s4820_s15 = smov 8  }
 0x883   : > { %4286 = dma.vmem_to_hbm [thread:$0]  (%p6563_p0), %s6448_s11, 256, %s6453_s21, %s3675_s20, %s4819_s9, %s4819_s9, %s4820_s15  }
 0x884 PF: > { %s3703_s14 = sand.u32 1, %s4797_s27   ;;  %p6564_p7 = scmp.ne.s32.totalorder %s6524_s12, 0 }
 0x885   : > { %p6565_p9 = scmp.ge.s32.totalorder %s4809_s30, 2  ;;  %s3704_s26 = scalar_lea.sflag [#allocation6], %s3703_s14 }
 0x887   : > { %p4300_p12 = pnand %p6565_p9, %p6564_p7 }
 0x889   : > { %4792 = dma.done.wait (!%p4300_p12), %s3704_s26, 256  }
 0x88a   : > { %4794 = vsyncadd (!%p4300_p12), %s3704_s26, 4294967040  ;;  %p22_p1 = scmp.ge.s32.totalorder %s4982_s16, 4   ;;  %s6566_s27 = smov %s4801_s28 }
 0x88b   : > { %s6567_s28 = smov %s4805_s29  ;;  %s6568_s29 = smov %s4998_s23 }
 0x88c   : > { %s6569_s30 = smov %s4982_s16  ;;  %24 = sbr.rel (!%p22_p1) target bundleno = 6 (0x6), region = 107 }
 0x893   :  { %3709 = vsyncpa [#allocation5], 1 }
 0x894   :  { %3711 = vsyncpa [#allocation5 + $0x1], 1 }
 0x895   :  { %3712 = vsyncpa [#allocation8], 1 }
 0x896   :  { %3713 = vsyncpa [#allocation6], 1 }
 0x897   :  { %3715 = vsyncpa [#allocation6 + $0x1], 1 }

</bundles_post_ra>
